<compile_context>
chip_gen: v7x
topology: tpu7x:2x2x1
jax: 0.10.0
libtpu: 0.0.40
codegen_flags: <defaults>
</compile_context>

<pallas_src>
import functools

import jax
import jax.numpy as jnp
from jax.experimental import pallas as pl
from jax.experimental.pallas import tpu as pltpu


_LANE = 128
_MAX_TILE_B = 16384                      # double-buffered blocks stay < ~32 MiB
_VMEM_LIMIT_BYTES = 48 * 1024 * 1024     # within v7x's 64 MiB physical VMEM


def _round_up(x, m):
    return ((x + m - 1) // m) * m


def _pick_tile_b(batch, requested):
    """Batch tile: multiple of 128, as large as allowed, but capped so the grid
    has >= 2 steps whenever possible (keeps both v7x TensorCores busy via the
    'parallel' batch axis; harmless on single-core v5e/v6e)."""
    t = max(_LANE, (int(requested) // _LANE) * _LANE)
    t = min(t, _MAX_TILE_B)
    if batch > _LANE:
        t = min(t, _round_up(pl.cdiv(batch, 2), _LANE))
    return t


# --------------------------------------------------------------------------- #
# Kernels
# --------------------------------------------------------------------------- #
def _lr_kernel_batch_major(wg_ref, val_ref, b_ref, out_ref, *, apply_sigmoid):
    """Weighted reduce over features, natural [batch, feature] layout.

    wg_ref  : (tile_b, F) gathered weights w[id]
    val_ref : (tile_b, F) feature values
    b_ref   : (1,)        f32 bias, in SMEM
    out_ref : (1, tile_b) f32 per-batch logits (lane-dense row)
    """
    prod = wg_ref[...].astype(jnp.float32) * val_ref[...].astype(jnp.float32)
    y = jnp.sum(prod, axis=1)                        # (tile_b,) per-batch sums
    y = y.reshape(1, y.shape[0]) + b_ref[0]          # lane-dense (1, tile_b)
    if apply_sigmoid:
        y = 1.0 / (1.0 + jnp.exp(-y))                # EUP: otherwise-idle slot
    out_ref[...] = y


def _lr_kernel_feature_major(wg_ref, val_ref, b_ref, out_ref, *, apply_sigmoid):
    """Same reduction for feature-major [F, batch] inputs (fully lane-dense).

    wg_ref  : (F, tile_b),  val_ref : (F, tile_b),  out_ref : (1, tile_b)
    """
    prod = wg_ref[...].astype(jnp.float32) * val_ref[...].astype(jnp.float32)
    y = jnp.sum(prod, axis=0, keepdims=True) + b_ref[0]
    if apply_sigmoid:
        y = 1.0 / (1.0 + jnp.exp(-y))
    out_ref[...] = y


# --------------------------------------------------------------------------- #
# Forward wrapper
# --------------------------------------------------------------------------- #
def lr_forward(ids, values, weight, bias, *, tile_b=8192, feature_major=False,
               low_precision=False, apply_sigmoid=False):
    """LRModel forward: y[b] = sum_f weight[ids[b, f]] * values[b, f] + bias.

    ids/values : [B, F] (or [F, B] when feature_major=True -- the preferred
                 layout, avoids any relayout work anywhere).
    weight     : [nfeat] f32,  bias : scalar.
    Returns y  : [B] f32 (apply_sigmoid=True fuses the classification sigmoid
                 into the kernel epilogue).
    low_precision=True stores the gathered weights as bf16 (saves HBM traffic,
    mostly for v5e); accumulation stays f32, ~1e-3 relative deviation vs f32.
    """
    if feature_major:
        F, B = ids.shape
    else:
        B, F = ids.shape

    tb = _pick_tile_b(B, tile_b)
    grid = pl.cdiv(B, tb)

    # Per-element weight lookup by XLA's native gather (table size unlimited).
    w_dtype = jnp.bfloat16 if low_precision else jnp.float32
    wg = jnp.take(weight.astype(w_dtype), ids.astype(jnp.int32), axis=0)
    vals = values.astype(jnp.float32)
    b_arr = jnp.asarray(bias, jnp.float32).reshape(1)

    if feature_major:
        kernel = functools.partial(_lr_kernel_feature_major,
                                   apply_sigmoid=apply_sigmoid)
        data_spec = pl.BlockSpec((F, tb), lambda i: (0, i))
    else:
        kernel = functools.partial(_lr_kernel_batch_major,
                                   apply_sigmoid=apply_sigmoid)
        data_spec = pl.BlockSpec((tb, F), lambda i: (i, 0))

    out = pl.pallas_call(
        kernel,
        out_shape=jax.ShapeDtypeStruct((1, B), jnp.float32),
        grid=(grid,),
        in_specs=[
            data_spec,                                           # gathered w
            data_spec,                                           # values
            pl.BlockSpec(memory_space=pltpu.MemorySpace.SMEM),   # bias scalar
        ],
        out_specs=pl.BlockSpec((1, tb), lambda i: (0, i)),       # lane-dense
        compiler_params=pltpu.CompilerParams(
            dimension_semantics=("parallel",),                   # megacore
            vmem_limit_bytes=_VMEM_LIMIT_BYTES),
        cost_estimate=pl.CostEstimate(
            flops=2 * B * F,
            transcendentals=(B if apply_sigmoid else 0),
            bytes_accessed=int((4 + wg.dtype.itemsize) * B * F + 4 * B)),
    )(wg, vals, b_arr)
    return out[0]


# --------------------------------------------------------------------------- #
# Demo / self-check
# --------------------------------------------------------------------------- #
if __name__ == "__main__":
    key = jax.random.PRNGKey(0)
    k_id, k_val, k_w, k_b = jax.random.split(key, 4)

    # Small CTR-like shapes; B deliberately not a tile multiple so the ragged
    # tail is exercised, and the tile cap keeps grid == 2 (both paths tested).
    B, F, NFEAT = 1000, 16, 1000

    ids = jax.random.randint(k_id, (B, F), 0, NFEAT, dtype=jnp.int32)
    values = jax.random.normal(k_val, (B, F), dtype=jnp.float32)
    weight = jax.random.normal(k_w, (NFEAT,), dtype=jnp.float32) * 0.01
    bias = jax.random.normal(k_b, (), dtype=jnp.float32) * 0.01

    # Pure-JAX reference (same math as the PyTorch module).
    y_ref = jnp.sum(weight[ids] * values, axis=1) + bias

    # Natural [B, F] layout path (module-equivalent entry point).
    y = jax.block_until_ready(lr_forward(ids, values, weight, bias))
    assert y.shape == (B,)
    assert jnp.allclose(y, y_ref, atol=1e-4, rtol=1e-4), (y[:4], y_ref[:4])

    # Feature-major [F, B] path (caller-supplied layout; fully lane-dense).
    y_fm = jax.block_until_ready(
        lr_forward(ids.T, values.T, weight, bias, feature_major=True))
    assert y_fm.shape == (B,)
    assert jnp.allclose(y_fm, y_ref, atol=1e-4, rtol=1e-4), (y_fm[:4], y_ref[:4])

    print("KERNEL_OK")
</pallas_src>

<mosaic_0001>
module attributes {stable_mosaic.version = 11 : i64} {
  func.func @_lr_kernel_batch_major(%arg0: i32, %arg1: memref<512x16xf32, #tpu.memory_space<vmem>>, %arg2: memref<512x16xf32, #tpu.memory_space<vmem>>, %arg3: memref<1xf32, #tpu.memory_space<smem>>, %arg4: memref<1x512xf32, #tpu.memory_space<vmem>>) attributes {dimension_semantics = [#tpu.dimension_semantics<parallel>], iteration_bounds = array<i64: 2>, scalar_prefetch = 0 : i64, scratch_operands = 0 : i64, tpu.core_type = #tpu.core_type<tc>, window_params = [{transform_indices = @transform_0, window_bounds = array<i64: 512, 16>}, {transform_indices = @transform_1, window_bounds = array<i64: 512, 16>}, {transform_indices = @transform_2, window_bounds = array<i64: 1>}, {transform_indices = @transform_3, window_bounds = array<i64: 1, 512>}]} {
    %c0 = arith.constant 0 : index
    %c0_0 = arith.constant 0 : index
    %0 = vector.load %arg1[%c0, %c0_0] : memref<512x16xf32, #tpu.memory_space<vmem>>, vector<512x16xf32>
    %c0_1 = arith.constant 0 : index
    %c0_2 = arith.constant 0 : index
    %1 = vector.load %arg2[%c0_1, %c0_2] : memref<512x16xf32, #tpu.memory_space<vmem>>, vector<512x16xf32>
    %2 = arith.mulf %0, %1 : vector<512x16xf32>
    %cst = arith.constant dense<0.000000e+00> : vector<512xf32>
    %3 = vector.multi_reduction <add>, %2, %cst [1] : vector<512x16xf32> to vector<512xf32>
    %4 = vector.shape_cast %3 : vector<512xf32> to vector<1x512xf32>
    %c0_3 = arith.constant 0 : index
    %5 = memref.load %arg3[%c0_3] : memref<1xf32, #tpu.memory_space<smem>>
    %6 = vector.broadcast %5 : f32 to vector<1x512xf32>
    %7 = arith.addf %4, %6 : vector<1x512xf32>
    %c0_4 = arith.constant 0 : index
    %c0_5 = arith.constant 0 : index
    %8 = vector.load %arg4[%c0_4, %c0_5] : memref<1x512xf32, #tpu.memory_space<vmem>>, vector<1x512xf32>
    tpu.vector_store %arg4[%c0_4, %c0_5], %7 {strides = array<i32>} : memref<1x512xf32, #tpu.memory_space<vmem>>, vector<1x512xf32>,
    return
  }
  func.func @transform_0(%arg0: i32) -> (i32, i32) {
    %c0_i32 = arith.constant 0 : i32
    %c0_i32_0 = arith.constant 0 : i32
    return %arg0, %c0_i32 : i32, i32
  }
  func.func @transform_1(%arg0: i32) -> (i32, i32) {
    %c0_i32 = arith.constant 0 : i32
    %c0_i32_0 = arith.constant 0 : i32
    return %arg0, %c0_i32 : i32, i32
  }
  func.func @transform_2(%arg0: i32) -> i32 {
    %c0_i32 = arith.constant 0 : i32
    %c0_i32_0 = arith.constant 0 : i32
    return %c0_i32 : i32
  }
  func.func @transform_3(%arg0: i32) -> (i32, i32) {
    %c0_i32 = arith.constant 0 : i32
    %c0_i32_0 = arith.constant 0 : i32
    return %c0_i32, %arg0 : i32, i32
  }
}

</mosaic_0001>

<bundles_post_ra>
// kernel: tpu_custom_call.1
= control target key start
LH: loop header
LB: loop body
LE: loop exit
PB: predicated region body
PF: predicated region fallthrough
CT: control target
= control target key end

     0   :  { %s8954_s0 = inlined_call_operand.vmem [shape: f32[1000,16], index: 0, kind: input, shape index: {}]   ;;  %s8955_s1 = inlined_call_operand.vmem [shape: f32[1000,16], index: 1, kind: input, shape index: {}]   ;;  %s8956_s2 = inlined_call_operand.<no memory space> [shape: f32[1], index: 2, kind: input, shape index: {}]   ;;  %s8957_s3 = inlined_call_operand.hbm [shape: f32[1,1000], index: 3, kind: output, shape index: {}]  }
   0x1   :  { %8 = sst [smem:[#allocation2]] %s8956_s2 }
   0x2   :  { %9 = vsyncpa [#allocation4], 0 }
   0x3   :  { %11 = vsyncpa [#allocation4 + $0x1], 0  ;;  %s6738_s14 = smov 0   ;;  %s6740_s15 = smov 0  }
   0x4   :  { %s6742_s16 = smov 0   ;;  %s6744_s17 = smov 0  }
   0x5 LB: > { %s6589_s2 = sadd.s32 4294967295, %s6710_s17   ;;  %s6590_s18 = sadd.s32 4294967294, %s6710_s17   ;;  %s6710_s17 = sphi %s6744_s17, %s8977_s17   ;;  %s6706_s16 = sphi %s6742_s16, %s8976_s16   ;;  %s6702_s15 = sphi %s6740_s15, %s8975_s15   ;;  %s6698_s14 = sphi %s6738_s14, %s8974_s14  }
   0x6   : > { %s6761_s19 = sadd.s32 1, %s6710_s17   ;;  %s97_s20 = sadd.s32 1, %s6706_s16 }
   0x7   : > { %s94_s21 = ssub.s32 %s6710_s17, %s6761_s19  ;;  %p107_p0 = scmp.ne.s32.totalorder %s6706_s16, %s6702_s15 }
   0x8   : > { %p95_p1 = scmp.eq.s32.totalorder %s94_s21, 0  ;;  %p108_p2 = scmp.eq.s32.totalorder %s6589_s2, 1 }
   0x9   : > { %p113_p3 = scmp.ne.s32.totalorder %s6702_s15, %s6698_s14  ;;  %p114_p4 = scmp.eq.s32.totalorder %s6590_s18, 1 }
   0xa   : > { %s6771_s22 = scalar_select %p95_p1, %s6706_s16, %s97_s20  }
   0xb   : > { %p6773_p5 = por %p108_p2, %p107_p0  ;;  %p6777_p6 = por %p114_p4, %p113_p3 }
   0xc   : > { %p6593_p7 = scmp.ge.s32.totalorder %s6710_s17, 1  ;;  %p169_p8 = scmp.lt.s32.totalorder %s6710_s17, 3 }
   0xe   : > { %p170_p9 = pnand %p6593_p7, %p169_p8 }
  0x10   : > { %173 = sbr.rel (%p170_p9) target bundleno = 691 (0x2b3), region = 32 }
  0x17   : > { %s6783_s25 = sshll.u32 %s6589_s2, 6  ;;  %vm427_vm0 = vcmask 130048   ;;  %s620_s7 = sld [smem:[#allocation2]]  ;;  %vm6137_vm1 = vcmask 130112   ;;  %vm6144_vm2 = vcmask 195712   ;;  %vm6151_vm3 = vcmask 261312  }
  0x18   : > { %p211_p10 = scmp.lt.s32.totalorder %s6783_s25, 124  ;;  %vm6158_vm4 = vcmask 326912   ;;  %vm6165_vm5 = vcmask 392512   ;;  %vm6172_vm6 = vcmask 458112   ;;  %vm6179_vm7 = vcmask 523712   ;;  %s203_s8 = sand.u32 1, %s6702_s15  }
  0x19   : > { %vm6186_vm8 = vcmask 589312   ;;  %vm6193_vm9 = vcmask 654912   ;;  %vm6200_vm10 = vcmask 720512   ;;  %vm6207_vm11 = vcmask 786112   ;;  %s6594_s9 = sshll.u32 %s203_s8, 2  ;;  %s8912_s2 = scalar_lea.hbm %s8957_s3, %s6783_s25 }
  0x1a   : > { %s212_s26 = scalar_select %p211_p10, %s6783_s25, 124  ;;  %vm6214_vm12 = vcmask 851712   ;;  %vm6221_vm13 = vcmask 917312   ;;  %vm6228_vm14 = vcmask 982912   ;;  %vm6235_vm15 = vcmask 1048512  }
  0x1b   : > { %s205_s10 = scalar_lea.vmem [#allocation3], %s6594_s9  ;;  %s6505_s18 = scalar_lea.sflag [#allocation4], %s203_s8 }
  0x1c   : > { %s6596_s27 = sshll.u32 %s212_s26, 3  ;;  %s6519_s11 = sshll.u32 %s205_s10, 4  ;;  %s8914_s11 = int_to_ptr.vmem [resolvable:$true] %s6519_s11 }
  0x1d   : > { %s6790_s30 = scalar_lea.vmem %s8954_s0, %s6596_s27  ;;  %s6795_s6 = scalar_lea.vmem %s8955_s1, %s6596_s27 }
  0x1e   : > { %v237_v0 = vld [vmem:[%s6790_s30 + $0x10] sm:$0xff]  ;;  %v235_v2 = vld [vmem:[%s6790_s30] sm:$0xff]  ;;  %v238_v5 = vld [vmem:[%s6790_s30 + $0x18] sm:$0xff]  ;;  %s6648_s20 = scalar_lea.vmem %s8914_s11, 64  ;;  %s6714_s21 = smov [#allocation3]  }
  0x1f   : > { %v301_v1 = vld [vmem:[%s6795_s6 + $0x10] sm:$0xff]  ;;  %v299_v4 = vld [vmem:[%s6795_s6] sm:$0xff]  ;;  %v302_v6 = vld [vmem:[%s6795_s6 + $0x18] sm:$0xff]  ;;  %p6649_p11 = scmp.ne.s32.totalorder %s8914_s11, %s6648_s20  ;;  %s6652_s26 = sshll.u32 %s6714_s21, 4  ;;  %s6653_s26 = int_to_ptr.vmem [resolvable:$false] %s6652_s26 }
  0x20   : > { %v365_v3 = vmul.f32 %v301_v1, %v237_v0  ;;  %v363_v7 = vmul.f32 %v299_v4, %v235_v2  ;;  %v366_v8 = vmul.f32 %v302_v6, %v238_v5  ;;  %v236_v9 = vld [vmem:[%s6790_s30 + $0x8] sm:$0xff]  ;;  %v239_v15 = vld [vmem:[%s6790_s30 + $0x20] sm:$0xff]  ;;  %v242_v22 = vld [vmem:[%s6790_s30 + $0x38] sm:$0xff]  ;;  %s6654_s27 = scalar_lea.vmem %s6653_s26, 128  ;;  %p6655_p0 = scmp.lt.s32.totalorder %s8914_s11, %s6653_s26 }
  0x21   : > { %v300_v10 = vld [vmem:[%s6795_s6 + $0x8] sm:$0xff]  ;;  %v303_v16 = vld [vmem:[%s6795_s6 + $0x20] sm:$0xff]  ;;  %v306_v23 = vld [vmem:[%s6795_s6 + $0x38] sm:$0xff]  ;;  %p6650_p12 = pnand %p6649_p11, %p6773_p5  ;;  %p6656_p1 = scmp.lt.s32.totalorder %s6654_s27, %s6648_s20 }
  0x22   : > { %v240_v11 = vld [vmem:[%s6790_s30 + $0x28] sm:$0xff]  ;;  %v434_v12 = vsel %vm427_vm0, %v365_v3, 0.0  ;;  %v364_v13 = vmul.f32 %v300_v10, %v236_v9  ;;  %v428_v17 = vsel %vm427_vm0, %v363_v7, 0.0  ;;  %v437_v18 = vsel %vm427_vm0, %v366_v8, 0.0  ;;  %v241_v24 = vld [vmem:[%s6790_s30 + $0x30] sm:$0xff]  ;;  %v243_v32 = vld [vmem:[%s6790_s30 + $0x40] sm:$0xff] }
  0x23   : > { %v304_v14 = vld [vmem:[%s6795_s6 + $0x28] sm:$0xff]  ;;  %435 = vadd.xlane.f32.xlu1 %v434_v12  ;;  %429 = vadd.xlane.f32.xlu0 %v428_v17  ;;  %v367_v21 = vmul.f32 %v303_v16, %v239_v15  ;;  %v305_v25 = vld [vmem:[%s6795_s6 + $0x30] sm:$0xff]  ;;  %v370_v27 = vmul.f32 %v306_v23, %v242_v22  ;;  %v307_v33 = vld [vmem:[%s6795_s6 + $0x40] sm:$0xff]  ;;  %p6651_p13 = pneg %p6650_p12  ;;  %p6657_p2 = por %p6656_p1, %p6655_p0 }
  0x24   : > { %v368_v19 = vmul.f32 %v304_v14, %v240_v11  ;;  %v431_v20 = vsel %vm427_vm0, %v364_v13, 0.0  ;;  %v369_v29 = vmul.f32 %v305_v25, %v241_v24  ;;  %v244_v30 = vld [vmem:[%s6790_s30 + $0x48] sm:$0xff]  ;;  %v371_v37 = vmul.f32 %v307_v33, %v243_v32  ;;  %v246_v38 = vld [vmem:[%s6790_s30 + $0x58] sm:$0xff]  ;;  %v245_v40 = vld [vmem:[%s6790_s30 + $0x50] sm:$0xff] }
  0x25   : > { %v440_v28 = vsel %vm427_vm0, %v367_v21, 0.0  ;;  %v308_v31 = vld [vmem:[%s6795_s6 + $0x48] sm:$0xff]  ;;  %v449_v34 = vsel %vm427_vm0, %v370_v27, 0.0  ;;  %v310_v39 = vld [vmem:[%s6795_s6 + $0x58] sm:$0xff]  ;;  %v309_v41 = vld [vmem:[%s6795_s6 + $0x50] sm:$0xff]  ;;  %p6658_p3 = pnand %p6657_p2, %p6651_p13 }
  0x26   : > { %v443_v26 = vsel %vm427_vm0, %v368_v19, 0.0  ;;  %v372_v35 = vmul.f32 %v308_v31, %v244_v30  ;;  %v446_v36 = vsel %vm427_vm0, %v369_v29, 0.0  ;;  %v248_v42 = vld [vmem:[%s6790_s30 + $0x68] sm:$0xff]  ;;  %v374_v45 = vmul.f32 %v310_v39, %v246_v38  ;;  %v247_v46 = vld [vmem:[%s6790_s30 + $0x60] sm:$0xff]  ;;  %v250_v50 = vld [vmem:[%s6790_s30 + $0x78] sm:$0xff] }
  0x27   : > { %438 = vadd.xlane.f32.xlu1 %v437_v18  ;;  %432 = vadd.xlane.f32.xlu0 %v431_v20  ;;  %v312_v43 = vld [vmem:[%s6795_s6 + $0x68] sm:$0xff]  ;;  %v452_v47 = vsel %vm427_vm0, %v371_v37, 0.0  ;;  %v373_v48 = vmul.f32 %v309_v41, %v245_v40  ;;  %v311_v49 = vld [vmem:[%s6795_s6 + $0x60] sm:$0xff]  ;;  %v314_v51 = vld [vmem:[%s6795_s6 + $0x78] sm:$0xff] }
  0x28   : > { %v455_v44 = vsel %vm427_vm0, %v372_v35, 0.0  ;;  %v376_v52 = vmul.f32 %v312_v43, %v248_v42  ;;  %v249_v53 = vld [vmem:[%s6790_s30 + $0x70] sm:$0xff]  ;;  %v461_v54 = vsel %vm427_vm0, %v374_v45, 0.0  ;;  %v375_v55 = vmul.f32 %v311_v49, %v247_v46  ;;  %v268_v58 = vld [vmem:[%s6790_s30 + $0x108] sm:$0xff]  ;;  %v251_v63 = vld [vmem:[%s6790_s30 + $0x80] sm:$0xff] }
  0x29   : > { %v378_v56 = vmul.f32 %v314_v51, %v250_v50  ;;  %v313_v57 = vld [vmem:[%s6795_s6 + $0x70] sm:$0xff]  ;;  %v332_v59 = vld [vmem:[%s6795_s6 + $0x108] sm:$0xff]  ;;  %v458_v60 = vsel %vm427_vm0, %v373_v48, 0.0  ;;  %v315_v0 = vld [vmem:[%s6795_s6 + $0x80] sm:$0xff] }
  0x2a   : > { %v252_v61 = vld [vmem:[%s6790_s30 + $0x88] sm:$0xff]  ;;  %v396_v1 = vmul.f32 %v332_v59, %v268_v58  ;;  %v267_v2 = vld [vmem:[%s6790_s30 + $0x100] sm:$0xff]  ;;  %v270_v4 = vld [vmem:[%s6790_s30 + $0x118] sm:$0xff]  ;;  %v467_v5 = vsel %vm427_vm0, %v376_v52, 0.0  ;;  %v377_v10 = vmul.f32 %v313_v57, %v249_v53  ;;  %v464_v19 = vsel %vm427_vm0, %v375_v55, 0.0 }
  0x2b   : > { %444 = vadd.xlane.f32.xlu1 %v443_v26  ;;  %441 = vadd.xlane.f32.xlu0 %v440_v28  ;;  %v316_v62 = vld [vmem:[%s6795_s6 + $0x88] sm:$0xff]  ;;  %v331_v3 = vld [vmem:[%s6795_s6 + $0x100] sm:$0xff]  ;;  %v334_v7 = vld [vmem:[%s6795_s6 + $0x118] sm:$0xff]  ;;  %v473_v20 = vsel %vm427_vm0, %v378_v56, 0.0 }
  0x2c   : > { %v395_v6 = vmul.f32 %v331_v3, %v267_v2  ;;  %v269_v8 = vld [vmem:[%s6790_s30 + $0x110] sm:$0xff]  ;;  %v254_v11 = vld [vmem:[%s6790_s30 + $0x98] sm:$0xff]  ;;  %v6857_v13 = vsel %vm427_vm0, %v396_v1, 0.0  ;;  %v398_v14 = vmul.f32 %v334_v7, %v270_v4  ;;  %v272_v16 = vld [vmem:[%s6790_s30 + $0x128] sm:$0xff]  ;;  %v380_v33 = vmul.f32 %v316_v62, %v252_v61 }
  0x2d   : > { %v333_v9 = vld [vmem:[%s6795_s6 + $0x110] sm:$0xff]  ;;  %v318_v12 = vld [vmem:[%s6795_s6 + $0x98] sm:$0xff]  ;;  %v336_v17 = vld [vmem:[%s6795_s6 + $0x128] sm:$0xff]  ;;  %v470_v49 = vsel %vm427_vm0, %v377_v10, 0.0 }
  0x2e   : > { %v397_v15 = vmul.f32 %v333_v9, %v269_v8  ;;  %v271_v18 = vld [vmem:[%s6790_s30 + $0x120] sm:$0xff]  ;;  %v6865_v21 = vsel %vm427_vm0, %v395_v6, 0.0  ;;  %v400_v22 = vmul.f32 %v336_v17, %v272_v16  ;;  %v274_v24 = vld [vmem:[%s6790_s30 + $0x138] sm:$0xff]  ;;  %v6871_v26 = vsel %vm427_vm0, %v398_v14, 0.0  ;;  %v273_v30 = vld [vmem:[%s6790_s30 + $0x130] sm:$0xff] }
  0x2f   : > { %450 = vadd.xlane.f32.xlu1 %v449_v34  ;;  %447 = vadd.xlane.f32.xlu0 %v446_v36  ;;  %v335_v23 = vld [vmem:[%s6795_s6 + $0x120] sm:$0xff]  ;;  %v338_v25 = vld [vmem:[%s6795_s6 + $0x138] sm:$0xff]  ;;  %v337_v31 = vld [vmem:[%s6795_s6 + $0x130] sm:$0xff]  ;;  %v379_v34 = vmul.f32 %v315_v0, %v251_v63  ;;  %v382_v50 = vmul.f32 %v318_v12, %v254_v11  ;;  %v479_v1 = vsel %vm427_vm0, %v380_v33, 0.0  ;;  %v6712_v17 = vmov 0  }
  0x30   : > { %v6874_v27 = vsel %vm427_vm0, %v397_v15, 0.0  ;;  %v399_v28 = vmul.f32 %v335_v23, %v271_v18  ;;  %v402_v29 = vmul.f32 %v338_v25, %v274_v24  ;;  %v276_v32 = vld [vmem:[%s6790_s30 + $0x148] sm:$0xff]  ;;  %v6880_v35 = vsel %vm427_vm0, %v400_v22, 0.0  ;;  %v275_v38 = vld [vmem:[%s6790_s30 + $0x140] sm:$0xff]  ;;  %v253_v40 = vld [vmem:[%s6790_s30 + $0x90] sm:$0xff]  ;;  %6646 = vset.pattern.permute.xlu0 %v6712_v17  ;;  %6647 = vset.pattern.permute.xlu1 %v6712_v17 }
  0x31   : > { %v401_v36 = vmul.f32 %v337_v31, %v273_v30  ;;  %v340_v37 = vld [vmem:[%s6795_s6 + $0x148] sm:$0xff]  ;;  %v339_v39 = vld [vmem:[%s6795_s6 + $0x140] sm:$0xff]  ;;  %v317_v41 = vld [vmem:[%s6795_s6 + $0x90] sm:$0xff]  ;;  %v476_v18 = vsel %vm427_vm0, %v379_v34, 0.0 }
  0x32   : > { %v6888_v42 = vsel %vm427_vm0, %v399_v28, 0.0  ;;  %v6891_v43 = vsel %vm427_vm0, %v402_v29, 0.0  ;;  %v403_v45 = vmul.f32 %v339_v39, %v275_v38  ;;  %v278_v46 = vld [vmem:[%s6790_s30 + $0x158] sm:$0xff]  ;;  %v277_v48 = vld [vmem:[%s6790_s30 + $0x150] sm:$0xff]  ;;  %v344_v55 = vld [vmem:[%s6795_s6 + $0x168] sm:$0xff]  ;;  %v485_v38 = vsel %vm427_vm0, %v382_v50, 0.0 }
  0x33   : > { %456 = vadd.xlane.f32.xlu1 %v455_v44  ;;  %453 = vadd.xlane.f32.xlu0 %v452_v47  ;;  %v404_v44 = vmul.f32 %v340_v37, %v276_v32  ;;  %v342_v47 = vld [vmem:[%s6795_s6 + $0x158] sm:$0xff]  ;;  %v6898_v51 = vsel %vm427_vm0, %v401_v36, 0.0  ;;  %v341_v53 = vld [vmem:[%s6795_s6 + $0x150] sm:$0xff]  ;;  %v256_v56 = vld [vmem:[%s6790_s30 + $0xa8] sm:$0xff] }
  0x34   : > { %v406_v52 = vmul.f32 %v342_v47, %v278_v46  ;;  %v320_v57 = vld [vmem:[%s6795_s6 + $0xa8] sm:$0xff]  ;;  %v6909_v59 = vsel %vm427_vm0, %v403_v45, 0.0  ;;  %v279_v62 = vld [vmem:[%s6790_s30 + $0x160] sm:$0xff]  ;;  %v282_v0 = vld [vmem:[%s6790_s30 + $0x178] sm:$0xff] }
  0x35   : > { %v6906_v58 = vsel %vm427_vm0, %v404_v44, 0.0  ;;  %v343_v63 = vld [vmem:[%s6795_s6 + $0x160] sm:$0xff]  ;;  %v346_v4 = vld [vmem:[%s6795_s6 + $0x178] sm:$0xff]  ;;  %v345_v6 = vld [vmem:[%s6795_s6 + $0x170] sm:$0xff]  ;;  %v384_v39 = vmul.f32 %v320_v57, %v256_v56 }
  0x36   : > { %v6916_v2 = vsel %vm427_vm0, %v406_v52, 0.0  ;;  %v407_v3 = vmul.f32 %v343_v63, %v279_v62  ;;  %v255_v7 = vld [vmem:[%s6790_s30 + $0xa0] sm:$0xff]  ;;  %v410_v11 = vmul.f32 %v346_v4, %v282_v0  ;;  %v284_v14 = vld [vmem:[%s6790_s30 + $0x188] sm:$0xff]  ;;  %v286_v24 = vld [vmem:[%s6790_s30 + $0x198] sm:$0xff] }
  0x37   : > { %462 = vadd.xlane.f32.xlu1 %v461_v54  ;;  %459 = vadd.xlane.f32.xlu0 %v458_v60  ;;  %v280_v54 = vld [vmem:[%s6790_s30 + $0x168] sm:$0xff]  ;;  %v405_v60 = vmul.f32 %v341_v53, %v277_v48  ;;  %v319_v8 = vld [vmem:[%s6795_s6 + $0xa0] sm:$0xff]  ;;  %v350_v25 = vld [vmem:[%s6795_s6 + $0x198] sm:$0xff] }
  0x38   : > { %v408_v61 = vmul.f32 %v344_v55, %v280_v54  ;;  %v348_v15 = vld [vmem:[%s6795_s6 + $0x188] sm:$0xff]  ;;  %v283_v16 = vld [vmem:[%s6790_s30 + $0x180] sm:$0xff]  ;;  %v258_v28 = vld [vmem:[%s6790_s30 + $0xb8] sm:$0xff]  ;;  %v6942_v30 = vsel %vm427_vm0, %v410_v11, 0.0  ;;  %v414_v33 = vmul.f32 %v350_v25, %v286_v24 }
  0x39   : > { %v6924_v9 = vsel %vm427_vm0, %v405_v60, 0.0  ;;  %v412_v22 = vmul.f32 %v348_v15, %v284_v14  ;;  %v347_v23 = vld [vmem:[%s6795_s6 + $0x180] sm:$0xff]  ;;  %v322_v29 = vld [vmem:[%s6795_s6 + $0xb8] sm:$0xff]  ;;  %v285_v34 = vld [vmem:[%s6790_s30 + $0x190] sm:$0xff]  ;;  %v383_v60 = vmul.f32 %v319_v8, %v255_v7 }
  0x3a   : > { %v6927_v10 = vsel %vm427_vm0, %v408_v61, 0.0  ;;  %v411_v32 = vmul.f32 %v347_v23, %v283_v16  ;;  %v349_v36 = vld [vmem:[%s6795_s6 + $0x190] sm:$0xff]  ;;  %v288_v37 = vld [vmem:[%s6790_s30 + $0x1a8] sm:$0xff]  ;;  %v287_v45 = vld [vmem:[%s6790_s30 + $0x1a0] sm:$0xff]  ;;  %v6963_v50 = vsel %vm427_vm0, %v414_v33, 0.0  ;;  %v386_v14 = vmul.f32 %v322_v29, %v258_v28 }
  0x3b   : > { %468 = vadd.xlane.f32.xlu1 %v467_v5  ;;  %465 = vadd.xlane.f32.xlu0 %v464_v19  ;;  %v281_v5 = vld [vmem:[%s6790_s30 + $0x170] sm:$0xff]  ;;  %v381_v19 = vmul.f32 %v317_v41, %v253_v40  ;;  %v6952_v40 = vsel %vm427_vm0, %v412_v22, 0.0  ;;  %v413_v41 = vmul.f32 %v349_v36, %v285_v34  ;;  %v352_v44 = vld [vmem:[%s6795_s6 + $0x1a8] sm:$0xff]  ;;  %v351_v46 = vld [vmem:[%s6795_s6 + $0x1a0] sm:$0xff]  ;;  %v488_v34 = vsel %vm427_vm0, %v383_v60, 0.0 }
  0x3c   : > { %v409_v12 = vmul.f32 %v345_v6, %v281_v5  ;;  %v257_v47 = vld [vmem:[%s6790_s30 + $0xb0] sm:$0xff]  ;;  %v416_v52 = vmul.f32 %v352_v44, %v288_v37  ;;  %v415_v53 = vmul.f32 %v351_v46, %v287_v45  ;;  %v290_v54 = vld [vmem:[%s6790_s30 + $0x1b8] sm:$0xff]  ;;  %v292_v0 = vld [vmem:[%s6790_s30 + $0x1c8] sm:$0xff] }
  0x3d   : > { %v321_v48 = vld [vmem:[%s6795_s6 + $0xb0] sm:$0xff]  ;;  %v354_v55 = vld [vmem:[%s6795_s6 + $0x1b8] sm:$0xff]  ;;  %v482_v57 = vsel %vm427_vm0, %v381_v19, 0.0  ;;  %v6970_v61 = vsel %vm427_vm0, %v413_v41, 0.0  ;;  %v291_v7 = vld [vmem:[%s6790_s30 + $0x1c0] sm:$0xff] }
  0x3e   : > { %v6945_v31 = vsel %vm427_vm0, %v409_v12, 0.0  ;;  %v289_v56 = vld [vmem:[%s6790_s30 + $0x1b0] sm:$0xff]  ;;  %v418_v62 = vmul.f32 %v354_v55, %v290_v54  ;;  %v6979_v4 = vsel %vm427_vm0, %v415_v53, 0.0  ;;  %v355_v8 = vld [vmem:[%s6795_s6 + $0x1c0] sm:$0xff]  ;;  %v491_v12 = vsel %vm427_vm0, %v384_v39, 0.0  ;;  %v358_v19 = vld [vmem:[%s6795_s6 + $0x1d8] sm:$0xff] }
  0x3f   : > { %474 = vadd.xlane.f32.xlu1 %v473_v20  ;;  %471 = vadd.xlane.f32.xlu0 %v470_v49  ;;  %v6934_v20 = vsel %vm427_vm0, %v407_v3, 0.0  ;;  %v6960_v49 = vsel %vm427_vm0, %v411_v32, 0.0  ;;  %v353_v63 = vld [vmem:[%s6795_s6 + $0x1b0] sm:$0xff]  ;;  %v6976_v3 = vsel %vm427_vm0, %v416_v52, 0.0  ;;  %v419_v16 = vmul.f32 %v355_v8, %v291_v7  ;;  %v260_v22 = vld [vmem:[%s6790_s30 + $0xc8] sm:$0xff]  ;;  %v295_v29 = vld [vmem:[%s6790_s30 + $0x1e0] sm:$0xff] }
  0x40   : > { %v417_v5 = vmul.f32 %v353_v63, %v289_v56  ;;  %v293_v11 = vld [vmem:[%s6790_s30 + $0x1d0] sm:$0xff]  ;;  %v6986_v15 = vsel %vm427_vm0, %v418_v62, 0.0  ;;  %v359_v32 = vld [vmem:[%s6795_s6 + $0x1e0] sm:$0xff]  ;;  %v296_v33 = vld [vmem:[%s6790_s30 + $0x1e8] sm:$0xff]  ;;  %v385_v36 = vmul.f32 %v321_v48, %v257_v47 }
  0x41   : > { %v357_v17 = vld [vmem:[%s6795_s6 + $0x1d0] sm:$0xff]  ;;  %v7003_v37 = vsel %vm427_vm0, %v419_v16, 0.0  ;;  %v360_v39 = vld [vmem:[%s6795_s6 + $0x1e8] sm:$0xff]  ;;  %v298_v55 = vld [vmem:[%s6790_s30 + $0x1f8] sm:$0xff] }
  0x42   : > { %v6993_v23 = vsel %vm427_vm0, %v417_v5, 0.0  ;;  %v421_v25 = vmul.f32 %v357_v17, %v293_v11  ;;  %v297_v41 = vld [vmem:[%s6790_s30 + $0x1f0] sm:$0xff]  ;;  %v324_v45 = vld [vmem:[%s6795_s6 + $0xc8] sm:$0xff]  ;;  %v424_v53 = vmul.f32 %v360_v39, %v296_v33  ;;  %v362_v47 = vld [vmem:[%s6795_s6 + $0x1f8] sm:$0xff] }
  0x43   : > { %480 = vadd.xlane.f32.xlu1 %v479_v1  ;;  %477 = vadd.xlane.f32.xlu0 %v476_v18  ;;  %v356_v1 = vld [vmem:[%s6795_s6 + $0x1c8] sm:$0xff]  ;;  %v294_v18 = vld [vmem:[%s6790_s30 + $0x1d8] sm:$0xff]  ;;  %v361_v44 = vld [vmem:[%s6795_s6 + $0x1f0] sm:$0xff]  ;;  %v426_v60 = vmul.f32 %v362_v47, %v298_v55 }
  0x44   : > { %v420_v6 = vmul.f32 %v356_v1, %v292_v0  ;;  %v422_v28 = vmul.f32 %v358_v19, %v294_v18  ;;  %v7010_v46 = vsel %vm427_vm0, %v421_v25, 0.0  ;;  %v425_v54 = vmul.f32 %v361_v44, %v297_v41  ;;  %v259_v48 = vld [vmem:[%s6790_s30 + $0xc0] sm:$0xff]  ;;  %v262_v8 = vld [vmem:[%s6790_s30 + $0xd8] sm:$0xff]  ;;  %v325_v16 = vld [vmem:[%s6795_s6 + $0xd0] sm:$0xff] }
  0x45   : > { %v323_v56 = vld [vmem:[%s6795_s6 + $0xc0] sm:$0xff]  ;;  %v7023_v62 = vsel %vm427_vm0, %v424_v53, 0.0  ;;  %v497_v0 = vsel %vm427_vm0, %v386_v14, 0.0  ;;  %v388_v1 = vmul.f32 %v324_v45, %v260_v22  ;;  %v7030_v5 = vsel %vm427_vm0, %v426_v60, 0.0  ;;  %v326_v11 = vld [vmem:[%s6795_s6 + $0xd8] sm:$0xff]  ;;  %v264_v22 = vld [vmem:[%s6790_s30 + $0xe8] sm:$0xff] }
  0x46   : > { %v6996_v24 = vsel %vm427_vm0, %v420_v6, 0.0  ;;  %v7013_v52 = vsel %vm427_vm0, %v422_v28, 0.0  ;;  %v7026_v63 = vsel %vm427_vm0, %v425_v54, 0.0  ;;  %v494_v6 = vsel %vm427_vm0, %v385_v36, 0.0  ;;  %v328_v25 = vld [vmem:[%s6795_s6 + $0xe8] sm:$0xff]  ;;  %v263_v28 = vld [vmem:[%s6790_s30 + $0xe0] sm:$0xff] }
  0x47   : > { %486 = vadd.xlane.f32.xlu1 %v485_v38  ;;  %483 = vadd.xlane.f32.xlu0 %v482_v57  ;;  %v423_v38 = vmul.f32 %v359_v32, %v295_v29  ;;  %v387_v7 = vmul.f32 %v323_v56, %v259_v48  ;;  %v503_v14 = vsel %vm427_vm0, %v388_v1, 0.0  ;;  %v390_v17 = vmul.f32 %v326_v11, %v262_v8  ;;  %v327_v29 = vld [vmem:[%s6795_s6 + $0xe0] sm:$0xff]  ;;  %v330_v39 = vld [vmem:[%s6795_s6 + $0xf8] sm:$0xff]  ;;  %v265_v41 = vld [vmem:[%s6790_s30 + $0xf0] sm:$0xff] }
  0x48   : > { %v392_v33 = vmul.f32 %v328_v25, %v264_v22  ;;  %v391_v36 = vmul.f32 %v327_v29, %v263_v28  ;;  %v329_v44 = vld [vmem:[%s6795_s6 + $0xf0] sm:$0xff] }
  0x49   : > { %v7020_v57 = vsel %vm427_vm0, %v423_v38, 0.0  ;;  %v500_v18 = vsel %vm427_vm0, %v387_v7, 0.0  ;;  %v509_v32 = vsel %vm427_vm0, %v390_v17, 0.0  ;;  %v266_v38 = vld [vmem:[%s6790_s30 + $0xf8] sm:$0xff]  ;;  %v393_v55 = vmul.f32 %v329_v44, %v265_v41 }
  0x4a   : > { %v515_v45 = vsel %vm427_vm0, %v392_v33, 0.0  ;;  %v394_v53 = vmul.f32 %v330_v39, %v266_v38  ;;  %v512_v54 = vsel %vm427_vm0, %v391_v36, 0.0 }
  0x4b   : > { %492 = vadd.xlane.f32.xlu1 %v491_v12  ;;  %489 = vadd.xlane.f32.xlu0 %v488_v34  ;;  %v261_v12 = vld [vmem:[%s6790_s30 + $0xd0] sm:$0xff]  ;;  %v518_v48 = vsel %vm427_vm0, %v393_v55, 0.0 }
  0x4c   : > { %v389_v19 = vmul.f32 %v325_v16, %v261_v12  ;;  %v521_v47 = vsel %vm427_vm0, %v394_v53, 0.0 }
  0x4e   : > { %v506_v34 = vsel %vm427_vm0, %v389_v19, 0.0 }
  0x4f   : > { %498 = vadd.xlane.f32.xlu1 %v497_v0  ;;  %495 = vadd.xlane.f32.xlu0 %v494_v6 }
  0x53   : > { %504 = vadd.xlane.f32.xlu1 %v503_v14  ;;  %501 = vadd.xlane.f32.xlu0 %v500_v18 }
  0x57   : > { %510 = vadd.xlane.f32.xlu1 %v509_v32  ;;  %507 = vadd.xlane.f32.xlu0 %v506_v34 }
  0x5b   : > { %516 = vadd.xlane.f32.xlu1 %v515_v45  ;;  %513 = vadd.xlane.f32.xlu0 %v512_v54 }
  0x5f   : > { %522 = vadd.xlane.f32.xlu1 %v521_v47  ;;  %519 = vadd.xlane.f32.xlu0 %v518_v48 }
  0x63   : > { %528 = vadd.xlane.f32.xlu1 %v6857_v13  ;;  %525 = vadd.xlane.f32.xlu0 %v6865_v21  ;;  %v8958_v13 = vlaneseq  ;;  %v6713_v21 = vmov 1966171168  }
  0x67   : > { %534 = vadd.xlane.f32.xlu1 %v6871_v26  ;;  %531 = vadd.xlane.f32.xlu0 %v6874_v27  ;;  %v2803_v26 = vunpack.c.l.s4 %v6713_v21  ;;  %v7086_v27 = vshrl.u32 %v8958_v13, 7 }
  0x6b   : > { %540 = vadd.xlane.f32.xlu1 %v6880_v35  ;;  %537 = vadd.xlane.f32.xlu0 %v6888_v42  ;;  %v7088_v35 = vstv %s620_s7  ;;  %v2804_v42 = vunpack.c.0.s8 %v2803_v26 }
  0x6f   : > { %546 = vadd.xlane.f32.xlu1 %v6891_v43  ;;  %543 = vadd.xlane.f32.xlu0 %v6898_v51  ;;  %v7091_v51 = vsub.s32 0, %v7086_v27 }
  0x73   : > { %552 = vadd.xlane.f32.xlu1 %v6906_v58  ;;  %549 = vadd.xlane.f32.xlu0 %v6909_v59  ;;  %v7094_v58 = vsub.s32 1, %v7086_v27  ;;  %v7097_v59 = vsub.s32 2, %v7086_v27 }
  0x77   : > { %558 = vadd.xlane.f32.xlu1 %v6916_v2  ;;  %555 = vadd.xlane.f32.xlu0 %v6924_v9  ;;  %v7100_v2 = vsub.s32 3, %v7086_v27 }
  0x7b   : > { %564 = vadd.xlane.f32.xlu1 %v6927_v10  ;;  %561 = vadd.xlane.f32.xlu0 %v6934_v20  ;;  %v7106_v20 = vsub.s32 4, %v7086_v27 }
  0x7f   : > { %570 = vadd.xlane.f32.xlu1 %v6942_v30  ;;  %567 = vadd.xlane.f32.xlu0 %v6945_v31  ;;  %v7109_v30 = vsub.s32 5, %v7086_v27  ;;  %v7112_v31 = vsub.s32 6, %v7086_v27 }
  0x83   : > { %576 = vadd.xlane.f32.xlu1 %v6952_v40  ;;  %573 = vadd.xlane.f32.xlu0 %v6960_v49  ;;  %v7116_v49 = vsub.s32 7, %v7086_v27 }
  0x87   : > { %582 = vadd.xlane.f32.xlu1 %v6963_v50  ;;  %579 = vadd.xlane.f32.xlu0 %v6970_v61  ;;  %v7119_v50 = vsub.s32 %v2804_v42, %v7086_v27 }
  0x89   : > { %8965 = vst [vmem:[#allocation6_spill] sm:$0xff] %v7119_v50 }
  0x8b   : > { %588 = vadd.xlane.f32.xlu1 %v6976_v3  ;;  %585 = vadd.xlane.f32.xlu0 %v6979_v4 }
  0x8f   : > { %594 = vadd.xlane.f32.xlu1 %v6986_v15  ;;  %591 = vadd.xlane.f32.xlu0 %v6993_v23 }
  0x93   : > { %600 = vadd.xlane.f32.xlu1 %v6996_v24  ;;  %597 = vadd.xlane.f32.xlu0 %v7003_v37 }
  0x97   : > { %606 = vadd.xlane.f32.xlu1 %v7013_v52  ;;  %603 = vadd.xlane.f32.xlu0 %v7010_v46 }
  0x9b   : > { %612 = vadd.xlane.f32.xlu1 %v7023_v62  ;;  %609 = vadd.xlane.f32.xlu0 %v7020_v57 }
  0x9f   : > { %618 = vadd.xlane.f32.xlu1 %v7030_v5  ;;  %615 = vadd.xlane.f32.xlu0 %v7026_v63 }
  0xb0   : > { %v436_v43 = vpop.xlane.xlu1 %435  ;;  %v430_v10 = vpop.xlane.xlu0 %429 }
  0xb1   : > { %v7103_v9 = vadd.f32 %v7088_v35, %v436_v43  ;;  %v622_v40 = vadd.f32 %v7088_v35, %v430_v10 }
  0xb3   : > { %v817_v61 = vrot.slane %v7103_v9, %v7091_v51  ;;  %v753_v4 = vrot.slane %v622_v40, %v7091_v51  ;;  %v757_v15 = vrot.slane %v622_v40, %v7094_v58  ;;  %v761_v23 = vrot.slane %v622_v40, %v7097_v59 }
  0xb4   : > { %v439_v3 = vpop.xlane.xlu1 %438  ;;  %v765_v24 = vrot.slane %v622_v40, %v7100_v2  ;;  %v433_v37 = vpop.xlane.xlu0 %432  ;;  %v769_v46 = vrot.slane %v622_v40, %v7106_v20  ;;  %v773_v52 = vrot.slane %v622_v40, %v7109_v30  ;;  %v777_v56 = vrot.slane %v622_v40, %v7112_v31 }
  0xb5   : > { %v821_v57 = vrot.slane %v7103_v9, %v7094_v58  ;;  %v623_v60 = vadd.f32 %v7088_v35, %v433_v37  ;;  %v781_v62 = vrot.slane %v622_v40, %v7116_v49  ;;  %v2798_v63 = vcombine.low %v753_v4, %v757_v15 }
  0xb6   : > { %v2799_v0 = vcombine.low %v761_v23, %v765_v24  ;;  %v2800_v1 = vcombine.low %v769_v46, %v773_v52  ;;  %v825_v5 = vrot.slane %v7103_v9, %v7097_v59  ;;  %v829_v6 = vrot.slane %v7103_v9, %v7100_v2 }
  0xb7   : > { %v833_v7 = vrot.slane %v7103_v9, %v7106_v20  ;;  %v2801_v11 = vcombine.low %v777_v56, %v781_v62  ;;  %v2808_v12 = vrot.slane %v2798_v63, %v7119_v50  ;;  %v785_v14 = vrot.slane %v623_v60, %v7091_v51 }
  0xb8   : > { %v445_v8 = vpop.xlane.xlu1 %444  ;;  %v2815_v16 = vrot.slane %v2799_v0, %v7119_v50  ;;  %v2822_v17 = vrot.slane %v2800_v1, %v7119_v50  ;;  %v789_v18 = vrot.slane %v623_v60, %v7094_v58  ;;  %v793_v19 = vrot.slane %v623_v60, %v7097_v59 }
  0xb9   : > { %v837_v22 = vrot.slane %v7103_v9, %v7109_v30  ;;  %v2829_v25 = vrot.slane %v2801_v11, %v7119_v50  ;;  %v797_v29 = vrot.slane %v623_v60, %v7100_v2  ;;  %v841_v32 = vrot.slane %v7103_v9, %v7112_v31 }
  0xba   : > { %v2830_v28 = vcombine.low %v2808_v12, %v2815_v16  ;;  %v801_v33 = vrot.slane %v623_v60, %v7106_v20  ;;  %v805_v34 = vrot.slane %v623_v60, %v7109_v30  ;;  %v809_v36 = vrot.slane %v623_v60, %v7112_v31  ;;  %v442_v12 = vpop.xlane.xlu0 %441 }
  0xbb   : > { %v813_v38 = vrot.slane %v623_v60, %v7116_v49  ;;  %v2831_v41 = vcombine.low %v2822_v17, %v2829_v25  ;;  %v2847_v45 = vcombine.low %v785_v14, %v789_v18  ;;  %v2848_v53 = vcombine.low %v793_v19, %v797_v29 }
  0xbc   : > { %v451_v39 = vpop.xlane.xlu1 %450  ;;  %v2838_v44 = vrot.slane %v2830_v28, %v7119_v50  ;;  %v2849_v54 = vcombine.low %v801_v33, %v805_v34  ;;  %v845_v47 = vrot.slane %v7103_v9, %v7116_v49  ;;  %v625_v48 = vadd.f32 %v7088_v35, %v439_v3 }
  0xbd   : > { %v2850_v55 = vcombine.low %v809_v36, %v813_v38  ;;  %v2845_v21 = vrot.slane %v2831_v41, %v7119_v50  ;;  %v2857_v26 = vrot.slane %v2847_v45, %v7119_v50  ;;  %v2864_v42 = vrot.slane %v2848_v53, %v7119_v50 }
  0xbe   : > { %v2871_v43 = vrot.slane %v2849_v54, %v7119_v50  ;;  %v2896_v40 = vcombine.low %v817_v61, %v821_v57  ;;  %v2897_v4 = vcombine.low %v825_v5, %v829_v6  ;;  %v2898_v37 = vcombine.low %v833_v7, %v837_v22 }
  0xbf   : > { %v2878_v10 = vrot.slane %v2850_v55, %v7119_v50  ;;  %v2846_v15 = vcombine.low %v2838_v44, %v2845_v21  ;;  %v2879_v24 = vcombine.low %v2857_v26, %v2864_v42  ;;  %v2899_v46 = vcombine.low %v841_v32, %v845_v47  ;;  %v448_v26 = vpop.xlane.xlu0 %447 }
  0xc0   : > { %v457_v23 = vpop.xlane.xlu1 %456  ;;  %v2906_v3 = vrot.slane %v2896_v40, %v7119_v50  ;;  %v2913_v52 = vrot.slane %v2897_v4, %v7119_v50  ;;  %v2920_v62 = vrot.slane %v2898_v37, %v7119_v50  ;;  %v849_v0 = vrot.slane %v625_v48, %v7091_v51 }
  0xc1   : > { %v2880_v9 = vcombine.low %v2871_v43, %v2878_v10  ;;  %5935 = vperm.xlu0 %6646, %v2846_v15   ;;  %v631_v56 = vadd.f32 %v7088_v35, %v457_v23  ;;  %v2887_v60 = vrot.slane %v2879_v24, %v7119_v50  ;;  %v2927_v61 = vrot.slane %v2899_v46, %v7119_v50 }
  0xc2   : > { %v2928_v63 = vcombine.low %v2906_v3, %v2913_v52  ;;  %v853_v1 = vrot.slane %v625_v48, %v7094_v58  ;;  %v857_v6 = vrot.slane %v625_v48, %v7097_v59  ;;  %v861_v7 = vrot.slane %v625_v48, %v7100_v2 }
  0xc3   : > { %v2894_v57 = vrot.slane %v2880_v9, %v7119_v50  ;;  %v2929_v5 = vcombine.low %v2920_v62, %v2927_v61  ;;  %v865_v11 = vrot.slane %v625_v48, %v7106_v20  ;;  %v869_v17 = vrot.slane %v625_v48, %v7109_v30 }
  0xc4   : > { %v2936_v14 = vrot.slane %v2928_v63, %v7119_v50  ;;  %v7180_v18 = vadd.f32 %v7088_v35, %v445_v8  ;;  %v873_v22 = vrot.slane %v625_v48, %v7112_v31  ;;  %v877_v25 = vrot.slane %v625_v48, %v7116_v49  ;;  %v463_v55 = vpop.xlane.xlu1 %462 }
  0xc5   : > { %v2895_v16 = vcombine.low %v2887_v60, %v2894_v57  ;;  %v2943_v19 = vrot.slane %v2929_v5, %v7119_v50  ;;  %v626_v28 = vadd.f32 %v7088_v35, %v442_v12  ;;  %v2945_v29 = vcombine.low %v849_v0, %v853_v1 }
  0xc6   : > { %v2946_v32 = vcombine.low %v857_v6, %v861_v7  ;;  %v2947_v33 = vcombine.low %v865_v11, %v869_v17  ;;  %v2948_v34 = vcombine.low %v873_v22, %v877_v25  ;;  %v1041_v36 = vrot.slane %v631_v56, %v7091_v51  ;;  %v454_v11 = vpop.xlane.xlu0 %453 }
  0xc7   : > { %5938 = vperm.xlu1 %6647, %v2895_v16   ;;  %v1045_v38 = vrot.slane %v631_v56, %v7094_v58  ;;  %v1049_v8 = vrot.slane %v631_v56, %v7097_v59  ;;  %v2944_v41 = vcombine.low %v2936_v14, %v2943_v19  ;;  %v2955_v44 = vrot.slane %v2945_v29, %v7119_v50 }
  0xc8   : > { %v2962_v45 = vrot.slane %v2946_v32, %v7119_v50  ;;  %v2969_v53 = vrot.slane %v2947_v33, %v7119_v50  ;;  %v7193_v54 = vadd.f32 %v7088_v35, %v451_v39  ;;  %v2976_v47 = vrot.slane %v2948_v34, %v7119_v50  ;;  %v469_v0 = vpop.xlane.xlu1 %468 }
  0xc9   : > { %v1053_v48 = vrot.slane %v631_v56, %v7100_v2  ;;  %v1057_v21 = vrot.slane %v631_v56, %v7106_v20  ;;  %v1061_v43 = vrot.slane %v631_v56, %v7109_v30  ;;  %v1065_v10 = vrot.slane %v631_v56, %v7112_v31 }
  0xca   : > { %v2977_v42 = vcombine.low %v2955_v44, %v2962_v45  ;;  %v1069_v40 = vrot.slane %v631_v56, %v7116_v49  ;;  %v7202_v4 = vadd.f32 %v7088_v35, %v448_v26  ;;  %v2978_v39 = vcombine.low %v2969_v53, %v2976_v47 }
  0xcb   : > { %5941 = vperm.xlu1 %6647, %v2944_v41   ;;  %v3239_v15 = vcombine.low %v1041_v36, %v1045_v38  ;;  %v3240_v23 = vcombine.low %v1049_v8, %v1053_v48  ;;  %v633_v24 = vadd.f32 %v7088_v35, %v463_v55  ;;  %v3241_v46 = vcombine.low %v1057_v21, %v1061_v43 }
  0xcc   : > { %v2985_v37 = vrot.slane %v2977_v42, %v7119_v50  ;;  %v3242_v9 = vcombine.low %v1065_v10, %v1069_v40  ;;  %v2992_v3 = vrot.slane %v2978_v39, %v7119_v50  ;;  %v881_v56 = vrot.slane %v626_v28, %v7091_v51 }
  0xcd   : > { %v3249_v52 = vrot.slane %v3239_v15, %v7119_v50  ;;  %v3256_v60 = vrot.slane %v3240_v23, %v7119_v50  ;;  %v3263_v62 = vrot.slane %v3241_v46, %v7119_v50  ;;  %v885_v57 = vrot.slane %v626_v28, %v7094_v58 }
  0xce   : > { %v3270_v61 = vrot.slane %v3242_v9, %v7119_v50  ;;  %v889_v63 = vrot.slane %v626_v28, %v7097_v59  ;;  %v2993_v1 = vcombine.low %v2985_v37, %v2992_v3  ;;  %v893_v6 = vrot.slane %v626_v28, %v7100_v2 }
  0xcf   : > { %v3271_v5 = vcombine.low %v3249_v52, %v3256_v60  ;;  %v897_v7 = vrot.slane %v626_v28, %v7106_v20  ;;  %v901_v16 = vrot.slane %v626_v28, %v7109_v30  ;;  %v905_v14 = vrot.slane %v626_v28, %v7112_v31 }
  0xd0   : > { %v3272_v12 = vcombine.low %v3263_v62, %v3270_v61  ;;  %v909_v17 = vrot.slane %v626_v28, %v7116_v49  ;;  %v7220_v19 = vadd.f32 %v7088_v35, %v454_v11  ;;  %5944 = vperm.xlu1 %6647, %v2993_v1   ;;  %v2994_v25 = vcombine.low %v881_v56, %v885_v57  ;;  %v475_v61 = vpop.xlane.xlu1 %474 }
  0xd1   : > { %v3279_v22 = vrot.slane %v3271_v5, %v7119_v50  ;;  %v2995_v29 = vcombine.low %v889_v63, %v893_v6  ;;  %v7224_v32 = vadd.f32 %v7088_v35, %v469_v0  ;;  %v2996_v34 = vcombine.low %v897_v7, %v901_v16  ;;  %v460_v5 = vpop.xlane.xlu0 %459 }
  0xd2   : > { %v3286_v33 = vrot.slane %v3272_v12, %v7119_v50  ;;  %v2997_v36 = vcombine.low %v905_v14, %v909_v17  ;;  %v3004_v38 = vrot.slane %v2994_v25, %v7119_v50  ;;  %v1105_v28 = vrot.slane %v633_v24, %v7091_v51 }
  0xd3   : > { %v3011_v8 = vrot.slane %v2995_v29, %v7119_v50  ;;  %v1109_v41 = vrot.slane %v633_v24, %v7094_v58  ;;  %v3018_v45 = vrot.slane %v2996_v34, %v7119_v50  ;;  %v1113_v55 = vrot.slane %v633_v24, %v7097_v59 }
  0xd4   : > { %v3287_v44 = vcombine.low %v3279_v22, %v3286_v33  ;;  %v3025_v53 = vrot.slane %v2997_v36, %v7119_v50  ;;  %v1117_v48 = vrot.slane %v633_v24, %v7100_v2  ;;  %v1121_v21 = vrot.slane %v633_v24, %v7106_v20 }
  0xd5   : > { %v3026_v47 = vcombine.low %v3004_v38, %v3011_v8  ;;  %v1125_v26 = vrot.slane %v633_v24, %v7109_v30  ;;  %v1129_v43 = vrot.slane %v633_v24, %v7112_v31  ;;  %v1133_v10 = vrot.slane %v633_v24, %v7116_v49 }
  0xd6   : > { %5962 = vperm.xlu0 %6646, %v3287_v44   ;;  %v3027_v42 = vcombine.low %v3018_v45, %v3025_v53  ;;  %v3337_v40 = vcombine.low %v1105_v28, %v1109_v41  ;;  %v3338_v15 = vcombine.low %v1113_v55, %v1117_v48  ;;  %v913_v37 = vrot.slane %v7180_v18, %v7091_v51 }
  0xd7   : > { %v3034_v39 = vrot.slane %v3026_v47, %v7119_v50  ;;  %v3339_v23 = vcombine.low %v1121_v21, %v1125_v26  ;;  %v3340_v9 = vcombine.low %v1129_v43, %v1133_v10  ;;  %v917_v52 = vrot.slane %v7180_v18, %v7094_v58 }
  0xd8   : > { %v3041_v46 = vrot.slane %v3027_v42, %v7119_v50  ;;  %v3347_v3 = vrot.slane %v3337_v40, %v7119_v50  ;;  %v3354_v60 = vrot.slane %v3338_v15, %v7119_v50  ;;  %v921_v56 = vrot.slane %v7180_v18, %v7097_v59 }
  0xd9   : > { %v3361_v24 = vrot.slane %v3339_v23, %v7119_v50  ;;  %v925_v62 = vrot.slane %v7180_v18, %v7100_v2  ;;  %v3368_v63 = vrot.slane %v3340_v9, %v7119_v50  ;;  %v929_v0 = vrot.slane %v7180_v18, %v7106_v20 }
  0xda   : > { %v3042_v57 = vcombine.low %v3034_v39, %v3041_v46  ;;  %v933_v1 = vrot.slane %v7180_v18, %v7109_v30  ;;  %v3369_v6 = vcombine.low %v3347_v3, %v3354_v60  ;;  %v937_v7 = vrot.slane %v7180_v18, %v7112_v31 }
  0xdb   : > { %v941_v11 = vrot.slane %v7180_v18, %v7116_v49  ;;  %v3043_v12 = vcombine.low %v913_v37, %v917_v52  ;;  %v7262_v16 = vadd.f32 %v7088_v35, %v460_v5  ;;  %v3370_v14 = vcombine.low %v3361_v24, %v3368_v63  ;;  %v481_v24 = vpop.xlane.xlu1 %480  ;;  %v466_v63 = vpop.xlane.xlu0 %465 }
  0xdc   : > { %5947 = vperm.xlu1 %6647, %v3042_v57   ;;  %v3044_v17 = vcombine.low %v921_v56, %v925_v62  ;;  %v3045_v22 = vcombine.low %v929_v0, %v933_v1  ;;  %v7265_v25 = vadd.f32 %v7088_v35, %v475_v61  ;;  %v3377_v29 = vrot.slane %v3369_v6, %v7119_v50 }
  0xdd   : > { %v3046_v33 = vcombine.low %v937_v7, %v941_v11  ;;  %v3053_v34 = vrot.slane %v3043_v12, %v7119_v50  ;;  %v3384_v36 = vrot.slane %v3370_v14, %v7119_v50  ;;  %v1169_v8 = vrot.slane %v7224_v32, %v7091_v51 }
  0xde   : > { %v3060_v18 = vrot.slane %v3044_v17, %v7119_v50  ;;  %v3067_v38 = vrot.slane %v3045_v22, %v7119_v50  ;;  %v1173_v41 = vrot.slane %v7224_v32, %v7094_v58  ;;  %v1177_v44 = vrot.slane %v7224_v32, %v7097_v59 }
  0xdf   : > { %v3074_v28 = vrot.slane %v3046_v33, %v7119_v50  ;;  %v1181_v45 = vrot.slane %v7224_v32, %v7100_v2  ;;  %v3385_v53 = vcombine.low %v3377_v29, %v3384_v36  ;;  %v1185_v47 = vrot.slane %v7224_v32, %v7106_v20 }
  0xe0   : > { %v3075_v55 = vcombine.low %v3053_v34, %v3060_v18  ;;  %v1189_v48 = vrot.slane %v7224_v32, %v7109_v30  ;;  %v1193_v26 = vrot.slane %v7224_v32, %v7112_v31  ;;  %v1197_v42 = vrot.slane %v7224_v32, %v7116_v49 }
  0xe1   : > { %v3076_v21 = vcombine.low %v3067_v38, %v3074_v28  ;;  %v3435_v43 = vcombine.low %v1169_v8, %v1173_v41  ;;  %5968 = vperm.xlu0 %6646, %v3385_v53   ;;  %v3436_v40 = vcombine.low %v1177_v44, %v1181_v45  ;;  %v945_v15 = vrot.slane %v7202_v4, %v7091_v51 }
  0xe2   : > { %v3083_v10 = vrot.slane %v3075_v55, %v7119_v50  ;;  %v3437_v39 = vcombine.low %v1185_v47, %v1189_v48  ;;  %v3438_v37 = vcombine.low %v1193_v26, %v1197_v42  ;;  %v949_v9 = vrot.slane %v7202_v4, %v7094_v58 }
  0xe3   : > { %v3090_v23 = vrot.slane %v3076_v21, %v7119_v50  ;;  %v3445_v46 = vrot.slane %v3435_v43, %v7119_v50  ;;  %v3452_v3 = vrot.slane %v3436_v40, %v7119_v50  ;;  %v953_v52 = vrot.slane %v7202_v4, %v7097_v59 }
  0xe4   : > { %v3459_v32 = vrot.slane %v3437_v39, %v7119_v50  ;;  %v957_v60 = vrot.slane %v7202_v4, %v7100_v2  ;;  %v3466_v62 = vrot.slane %v3438_v37, %v7119_v50  ;;  %v961_v61 = vrot.slane %v7202_v4, %v7106_v20 }
  0xe5   : > { %v3091_v56 = vcombine.low %v3083_v10, %v3090_v23  ;;  %v965_v57 = vrot.slane %v7202_v4, %v7109_v30  ;;  %v3467_v0 = vcombine.low %v3445_v46, %v3452_v3  ;;  %v969_v1 = vrot.slane %v7202_v4, %v7112_v31 }
  0xe6   : > { %v973_v5 = vrot.slane %v7202_v4, %v7116_v49  ;;  %v3092_v6 = vcombine.low %v945_v15, %v949_v9  ;;  %v7312_v7 = vadd.f32 %v7088_v35, %v466_v63  ;;  %v3468_v11 = vcombine.low %v3459_v32, %v3466_v62  ;;  %v487_v32 = vpop.xlane.xlu1 %486  ;;  %v472_v62 = vpop.xlane.xlu0 %471 }
  0xe7   : > { %5950 = vperm.xlu1 %6647, %v3091_v56   ;;  %v3093_v12 = vcombine.low %v953_v52, %v957_v60  ;;  %v3094_v14 = vcombine.low %v961_v61, %v965_v57  ;;  %v7315_v17 = vadd.f32 %v7088_v35, %v481_v24  ;;  %v3475_v22 = vrot.slane %v3467_v0, %v7119_v50 }
  0xe8   : > { %v3095_v29 = vcombine.low %v969_v1, %v973_v5  ;;  %v3102_v33 = vrot.slane %v3092_v6, %v7119_v50  ;;  %v3482_v34 = vrot.slane %v3468_v11, %v7119_v50  ;;  %v1233_v18 = vrot.slane %v7265_v25, %v7091_v51 }
  0xe9   : > { %v3109_v4 = vrot.slane %v3093_v12, %v7119_v50  ;;  %v3116_v36 = vrot.slane %v3094_v14, %v7119_v50  ;;  %v1237_v8 = vrot.slane %v7265_v25, %v7094_v58  ;;  %v1241_v28 = vrot.slane %v7265_v25, %v7097_v59 }
  0xea   : > { %v3123_v38 = vrot.slane %v3095_v29, %v7119_v50  ;;  %v1245_v41 = vrot.slane %v7265_v25, %v7100_v2  ;;  %v3483_v44 = vcombine.low %v3475_v22, %v3482_v34  ;;  %v1249_v53 = vrot.slane %v7265_v25, %v7106_v20 }
  0xeb   : > { %v3124_v45 = vcombine.low %v3102_v33, %v3109_v4  ;;  %v1253_v55 = vrot.slane %v7265_v25, %v7109_v30  ;;  %v1257_v48 = vrot.slane %v7265_v25, %v7112_v31  ;;  %v1261_v21 = vrot.slane %v7265_v25, %v7116_v49 }
  0xec   : > { %v3125_v47 = vcombine.low %v3116_v36, %v3123_v38  ;;  %v3533_v26 = vcombine.low %v1233_v18, %v1237_v8  ;;  %5974 = vperm.xlu0 %6646, %v3483_v44   ;;  %v3534_v43 = vcombine.low %v1241_v28, %v1245_v41  ;;  %v977_v40 = vrot.slane %v7193_v54, %v7091_v51 }
  0xed   : > { %v3132_v42 = vrot.slane %v3124_v45, %v7119_v50  ;;  %v3535_v10 = vcombine.low %v1249_v53, %v1253_v55  ;;  %v3536_v15 = vcombine.low %v1257_v48, %v1261_v21  ;;  %v981_v37 = vrot.slane %v7193_v54, %v7094_v58 }
  0xee   : > { %v3139_v39 = vrot.slane %v3125_v47, %v7119_v50  ;;  %v3543_v23 = vrot.slane %v3533_v26, %v7119_v50  ;;  %v3550_v46 = vrot.slane %v3534_v43, %v7119_v50  ;;  %v985_v9 = vrot.slane %v7193_v54, %v7097_v59 }
  0xef   : > { %v3557_v25 = vrot.slane %v3535_v10, %v7119_v50  ;;  %v989_v3 = vrot.slane %v7193_v54, %v7100_v2  ;;  %v3564_v60 = vrot.slane %v3536_v15, %v7119_v50  ;;  %v993_v24 = vrot.slane %v7193_v54, %v7106_v20 }
  0xf0   : > { %v3140_v52 = vcombine.low %v3132_v42, %v3139_v39  ;;  %v997_v56 = vrot.slane %v7193_v54, %v7109_v30  ;;  %v3565_v61 = vcombine.low %v3543_v23, %v3550_v46  ;;  %v1001_v57 = vrot.slane %v7193_v54, %v7112_v31 }
  0xf1   : > { %v1005_v63 = vrot.slane %v7193_v54, %v7116_v49  ;;  %v3141_v0 = vcombine.low %v977_v40, %v981_v37  ;;  %v7362_v1 = vadd.f32 %v7088_v35, %v472_v62  ;;  %v3566_v5 = vcombine.low %v3557_v25, %v3564_v60  ;;  %v493_v25 = vpop.xlane.xlu1 %492  ;;  %v478_v60 = vpop.xlane.xlu0 %477 }
  0xf2   : > { %5953 = vperm.xlu1 %6647, %v3140_v52   ;;  %v3142_v6 = vcombine.low %v985_v9, %v989_v3  ;;  %v3143_v11 = vcombine.low %v993_v24, %v997_v56  ;;  %v7365_v12 = vadd.f32 %v7088_v35, %v487_v32  ;;  %v3573_v14 = vrot.slane %v3565_v61, %v7119_v50 }
  0xf3   : > { %v3144_v22 = vcombine.low %v1001_v57, %v1005_v63  ;;  %v3151_v29 = vrot.slane %v3141_v0, %v7119_v50  ;;  %v3580_v33 = vrot.slane %v3566_v5, %v7119_v50  ;;  %v1297_v4 = vrot.slane %v7315_v17, %v7091_v51 }
  0xf4   : > { %v3158_v54 = vrot.slane %v3142_v6, %v7119_v50  ;;  %v3165_v34 = vrot.slane %v3143_v11, %v7119_v50  ;;  %v1301_v18 = vrot.slane %v7315_v17, %v7094_v58  ;;  %v1305_v38 = vrot.slane %v7315_v17, %v7097_v59 }
  0xf5   : > { %v3172_v36 = vrot.slane %v3144_v22, %v7119_v50  ;;  %v1309_v8 = vrot.slane %v7315_v17, %v7100_v2  ;;  %v3581_v28 = vcombine.low %v3573_v14, %v3580_v33  ;;  %v1313_v44 = vrot.slane %v7315_v17, %v7106_v20 }
  0xf6   : > { %v3173_v41 = vcombine.low %v3151_v29, %v3158_v54  ;;  %v1317_v45 = vrot.slane %v7315_v17, %v7109_v30  ;;  %v1321_v55 = vrot.slane %v7315_v17, %v7112_v31  ;;  %v1325_v47 = vrot.slane %v7315_v17, %v7116_v49 }
  0xf7   : > { %v3174_v53 = vcombine.low %v3165_v34, %v3172_v36  ;;  %v3631_v48 = vcombine.low %v1297_v4, %v1301_v18  ;;  %5980 = vperm.xlu0 %6646, %v3581_v28   ;;  %v3632_v26 = vcombine.low %v1305_v38, %v1309_v8  ;;  %v1009_v43 = vrot.slane %v7220_v19, %v7091_v51 }
  0xf8   : > { %v3181_v21 = vrot.slane %v3173_v41, %v7119_v50  ;;  %v3633_v42 = vcombine.low %v1313_v44, %v1317_v45  ;;  %v3634_v40 = vcombine.low %v1321_v55, %v1325_v47  ;;  %v1013_v15 = vrot.slane %v7220_v19, %v7094_v58 }
  0xf9   : > { %v3188_v10 = vrot.slane %v3174_v53, %v7119_v50  ;;  %v3641_v39 = vrot.slane %v3631_v48, %v7119_v50  ;;  %v3648_v23 = vrot.slane %v3632_v26, %v7119_v50  ;;  %v1017_v37 = vrot.slane %v7220_v19, %v7097_v59 }
  0xfa   : > { %v3655_v17 = vrot.slane %v3633_v42, %v7119_v50  ;;  %v1021_v46 = vrot.slane %v7220_v19, %v7100_v2  ;;  %v3662_v3 = vrot.slane %v3634_v40, %v7119_v50  ;;  %v1025_v32 = vrot.slane %v7220_v19, %v7106_v20 }
  0xfb   : > { %v3189_v9 = vcombine.low %v3181_v21, %v3188_v10  ;;  %v1029_v52 = vrot.slane %v7220_v19, %v7109_v30  ;;  %v3663_v24 = vcombine.low %v3641_v39, %v3648_v23  ;;  %v1033_v56 = vrot.slane %v7220_v19, %v7112_v31 }
  0xfc   : > { %v1037_v62 = vrot.slane %v7220_v19, %v7116_v49  ;;  %v3190_v61 = vcombine.low %v1009_v43, %v1013_v15  ;;  %v7412_v57 = vadd.f32 %v7088_v35, %v478_v60  ;;  %v3664_v63 = vcombine.low %v3655_v17, %v3662_v3  ;;  %v499_v17 = vpop.xlane.xlu1 %498  ;;  %v484_v3 = vpop.xlane.xlu0 %483 }
  0xfd   : > { %5956 = vperm.xlu1 %6647, %v3189_v9   ;;  %v3191_v0 = vcombine.low %v1017_v37, %v1021_v46  ;;  %v3192_v5 = vcombine.low %v1025_v32, %v1029_v52  ;;  %v7415_v6 = vadd.f32 %v7088_v35, %v493_v25  ;;  %v3671_v11 = vrot.slane %v3663_v24, %v7119_v50 }
  0xfe   : > { %v3193_v14 = vcombine.low %v1033_v56, %v1037_v62  ;;  %v3200_v22 = vrot.slane %v3190_v61, %v7119_v50  ;;  %v3678_v29 = vrot.slane %v3664_v63, %v7119_v50  ;;  %v1361_v54 = vrot.slane %v7365_v12, %v7091_v51 }
  0xff   : > { %v3207_v19 = vrot.slane %v3191_v0, %v7119_v50  ;;  %v3214_v33 = vrot.slane %v3192_v5, %v7119_v50  ;;  %v1365_v4 = vrot.slane %v7365_v12, %v7094_v58  ;;  %v1369_v36 = vrot.slane %v7365_v12, %v7097_v59 }
 0x100   : > { %v3221_v34 = vrot.slane %v3193_v14, %v7119_v50  ;;  %v1373_v18 = vrot.slane %v7365_v12, %v7100_v2  ;;  %v3679_v38 = vcombine.low %v3671_v11, %v3678_v29  ;;  %v1377_v28 = vrot.slane %v7365_v12, %v7106_v20 }
 0x101   : > { %v3222_v8 = vcombine.low %v3200_v22, %v3207_v19  ;;  %v1381_v41 = vrot.slane %v7365_v12, %v7109_v30  ;;  %v1385_v45 = vrot.slane %v7365_v12, %v7112_v31  ;;  %v1389_v53 = vrot.slane %v7365_v12, %v7116_v49 }
 0x102   : > { %v3223_v44 = vcombine.low %v3214_v33, %v3221_v34  ;;  %v3729_v55 = vcombine.low %v1361_v54, %v1365_v4  ;;  %5986 = vperm.xlu0 %6646, %v3679_v38   ;;  %v3730_v48 = vcombine.low %v1369_v36, %v1373_v18  ;;  %v1073_v26 = vrot.slane %v7262_v16, %v7091_v51 }
 0x103   : > { %v3230_v47 = vrot.slane %v3222_v8, %v7119_v50  ;;  %v3731_v21 = vcombine.low %v1377_v28, %v1381_v41  ;;  %v3732_v43 = vcombine.low %v1385_v45, %v1389_v53  ;;  %v1077_v40 = vrot.slane %v7262_v16, %v7094_v58 }
 0x104   : > { %v3237_v42 = vrot.slane %v3223_v44, %v7119_v50  ;;  %v3739_v10 = vrot.slane %v3729_v55, %v7119_v50  ;;  %v3746_v39 = vrot.slane %v3730_v48, %v7119_v50  ;;  %v1081_v15 = vrot.slane %v7262_v16, %v7097_v59 }
 0x105   : > { %v3753_v12 = vrot.slane %v3731_v21, %v7119_v50  ;;  %v1085_v23 = vrot.slane %v7262_v16, %v7100_v2  ;;  %v3760_v46 = vrot.slane %v3732_v43, %v7119_v50  ;;  %v1089_v25 = vrot.slane %v7262_v16, %v7106_v20 }
 0x106   : > { %v3238_v37 = vcombine.low %v3230_v47, %v3237_v42  ;;  %v1093_v9 = vrot.slane %v7262_v16, %v7109_v30  ;;  %v3761_v32 = vcombine.low %v3739_v10, %v3746_v39  ;;  %v1097_v52 = vrot.slane %v7262_v16, %v7112_v31 }
 0x107   : > { %v1101_v60 = vrot.slane %v7262_v16, %v7116_v49  ;;  %v3288_v24 = vcombine.low %v1073_v26, %v1077_v40  ;;  %v7462_v56 = vadd.f32 %v7088_v35, %v484_v3  ;;  %v3762_v62 = vcombine.low %v3753_v12, %v3760_v46  ;;  %v505_v12 = vpop.xlane.xlu1 %504  ;;  %v490_v46 = vpop.xlane.xlu0 %489 }
 0x108   : > { %5959 = vperm.xlu1 %6647, %v3238_v37   ;;  %v3289_v61 = vcombine.low %v1081_v15, %v1085_v23  ;;  %v3290_v63 = vcombine.low %v1089_v25, %v1093_v9  ;;  %v7465_v0 = vadd.f32 %v7088_v35, %v499_v17  ;;  %v3769_v5 = vrot.slane %v3761_v32, %v7119_v50 }
 0x109   : > { %v3291_v11 = vcombine.low %v1097_v52, %v1101_v60  ;;  %v3298_v14 = vrot.slane %v3288_v24, %v7119_v50  ;;  %v3776_v22 = vrot.slane %v3762_v62, %v7119_v50  ;;  %v1425_v19 = vrot.slane %v7415_v6, %v7091_v51 }
 0x10a   : > { %v3305_v16 = vrot.slane %v3289_v61, %v7119_v50  ;;  %v3312_v29 = vrot.slane %v3290_v63, %v7119_v50  ;;  %v1429_v54 = vrot.slane %v7415_v6, %v7094_v58  ;;  %v1433_v34 = vrot.slane %v7415_v6, %v7097_v59 }
 0x10b   : > { %v3319_v33 = vrot.slane %v3291_v11, %v7119_v50  ;;  %v1437_v4 = vrot.slane %v7415_v6, %v7100_v2  ;;  %v3777_v36 = vcombine.low %v3769_v5, %v3776_v22  ;;  %v1441_v38 = vrot.slane %v7415_v6, %v7106_v20 }
 0x10c   : > { %v3320_v18 = vcombine.low %v3298_v14, %v3305_v16  ;;  %v1445_v8 = vrot.slane %v7415_v6, %v7109_v30  ;;  %v1449_v41 = vrot.slane %v7415_v6, %v7112_v31  ;;  %v1453_v44 = vrot.slane %v7415_v6, %v7116_v49 }
 0x10d   : > { %v3321_v28 = vcombine.low %v3312_v29, %v3319_v33  ;;  %v3827_v45 = vcombine.low %v1425_v19, %v1429_v54  ;;  %5992 = vperm.xlu0 %6646, %v3777_v36   ;;  %v3828_v55 = vcombine.low %v1433_v34, %v1437_v4  ;;  %v1137_v48 = vrot.slane %v7312_v7, %v7091_v51 }
 0x10e   : > { %v3328_v53 = vrot.slane %v3320_v18, %v7119_v50  ;;  %v3829_v47 = vcombine.low %v1441_v38, %v1445_v8  ;;  %v3830_v26 = vcombine.low %v1449_v41, %v1453_v44  ;;  %v1141_v43 = vrot.slane %v7312_v7, %v7094_v58 }
 0x10f   : > { %v3335_v21 = vrot.slane %v3321_v28, %v7119_v50  ;;  %v3837_v42 = vrot.slane %v3827_v45, %v7119_v50  ;;  %v3844_v10 = vrot.slane %v3828_v55, %v7119_v50  ;;  %v1145_v40 = vrot.slane %v7312_v7, %v7097_v59 }
 0x110   : > { %v3851_v6 = vrot.slane %v3829_v47, %v7119_v50  ;;  %v1149_v39 = vrot.slane %v7312_v7, %v7100_v2  ;;  %v3858_v23 = vrot.slane %v3830_v26, %v7119_v50  ;;  %v1153_v17 = vrot.slane %v7312_v7, %v7106_v20 }
 0x111   : > { %v3336_v15 = vcombine.low %v3328_v53, %v3335_v21  ;;  %v1157_v37 = vrot.slane %v7312_v7, %v7109_v30  ;;  %v3859_v25 = vcombine.low %v3837_v42, %v3844_v10  ;;  %v1161_v9 = vrot.slane %v7312_v7, %v7112_v31 }
 0x112   : > { %v1165_v3 = vrot.slane %v7312_v7, %v7116_v49  ;;  %v3386_v32 = vcombine.low %v1137_v48, %v1141_v43  ;;  %v7512_v52 = vadd.f32 %v7088_v35, %v490_v46  ;;  %v3860_v60 = vcombine.low %v3851_v6, %v3858_v23  ;;  %v511_v6 = vpop.xlane.xlu1 %510  ;;  %v496_v23 = vpop.xlane.xlu0 %495 }
 0x113   : > { %5965 = vperm.xlu1 %6647, %v3336_v15   ;;  %v3387_v24 = vcombine.low %v1145_v40, %v1149_v39  ;;  %v3388_v62 = vcombine.low %v1153_v17, %v1157_v37  ;;  %v7515_v61 = vadd.f32 %v7088_v35, %v505_v12  ;;  %v3867_v63 = vrot.slane %v3859_v25, %v7119_v50 }
 0x114   : > { %v3389_v5 = vcombine.low %v1161_v9, %v1165_v3  ;;  %v3396_v11 = vrot.slane %v3386_v32, %v7119_v50  ;;  %v3874_v14 = vrot.slane %v3860_v60, %v7119_v50  ;;  %v1489_v16 = vrot.slane %v7465_v0, %v7091_v51 }
 0x115   : > { %v3403_v7 = vrot.slane %v3387_v24, %v7119_v50  ;;  %v3410_v22 = vrot.slane %v3388_v62, %v7119_v50  ;;  %v1493_v19 = vrot.slane %v7465_v0, %v7094_v58  ;;  %v1497_v33 = vrot.slane %v7465_v0, %v7097_v59 }
 0x116   : > { %v3417_v29 = vrot.slane %v3389_v5, %v7119_v50  ;;  %v1501_v54 = vrot.slane %v7465_v0, %v7100_v2  ;;  %v3875_v34 = vcombine.low %v3867_v63, %v3874_v14  ;;  %v1505_v36 = vrot.slane %v7465_v0, %v7106_v20 }
 0x117   : > { %v3418_v4 = vcombine.low %v3396_v11, %v3403_v7  ;;  %v1509_v18 = vrot.slane %v7465_v0, %v7109_v30  ;;  %v1513_v8 = vrot.slane %v7465_v0, %v7112_v31  ;;  %v1517_v28 = vrot.slane %v7465_v0, %v7116_v49 }
 0x118   : > { %v3419_v38 = vcombine.low %v3410_v22, %v3417_v29  ;;  %v3925_v41 = vcombine.low %v1489_v16, %v1493_v19  ;;  %5998 = vperm.xlu0 %6646, %v3875_v34   ;;  %v3926_v45 = vcombine.low %v1497_v33, %v1501_v54  ;;  %v1201_v55 = vrot.slane %v7362_v1, %v7091_v51 }
 0x119   : > { %v3426_v44 = vrot.slane %v3418_v4, %v7119_v50  ;;  %v3927_v53 = vcombine.low %v1505_v36, %v1509_v18  ;;  %v3928_v48 = vcombine.low %v1513_v8, %v1517_v28  ;;  %v1205_v26 = vrot.slane %v7362_v1, %v7094_v58 }
 0x11a   : > { %v3433_v47 = vrot.slane %v3419_v38, %v7119_v50  ;;  %v3935_v21 = vrot.slane %v3925_v41, %v7119_v50  ;;  %v3942_v42 = vrot.slane %v3926_v45, %v7119_v50  ;;  %v1209_v43 = vrot.slane %v7362_v1, %v7097_v59 }
 0x11b   : > { %v3949_v0 = vrot.slane %v3927_v53, %v7119_v50  ;;  %v1213_v10 = vrot.slane %v7362_v1, %v7100_v2  ;;  %v3956_v39 = vrot.slane %v3928_v48, %v7119_v50  ;;  %v1217_v12 = vrot.slane %v7362_v1, %v7106_v20 }
 0x11c   : > { %v3434_v40 = vcombine.low %v3426_v44, %v3433_v47  ;;  %v1221_v15 = vrot.slane %v7362_v1, %v7109_v30  ;;  %v3957_v17 = vcombine.low %v3935_v21, %v3942_v42  ;;  %v1225_v37 = vrot.slane %v7362_v1, %v7112_v31 }
 0x11d   : > { %v1229_v46 = vrot.slane %v7362_v1, %v7116_v49  ;;  %v3484_v25 = vcombine.low %v1201_v55, %v1205_v26  ;;  %v7562_v9 = vadd.f32 %v7088_v35, %v496_v23  ;;  %v3958_v3 = vcombine.low %v3949_v0, %v3956_v39  ;;  %v517_v0 = vpop.xlane.xlu1 %516  ;;  %v502_v39 = vpop.xlane.xlu0 %501 }
 0x11e   : > { %5971 = vperm.xlu1 %6647, %v3434_v40   ;;  %v3485_v32 = vcombine.low %v1209_v43, %v1213_v10  ;;  %v3486_v60 = vcombine.low %v1217_v12, %v1221_v15  ;;  %v7565_v24 = vadd.f32 %v7088_v35, %v511_v6  ;;  %v3965_v62 = vrot.slane %v3957_v17, %v7119_v50 }
 0x11f   : > { %v3487_v63 = vcombine.low %v1225_v37, %v1229_v46  ;;  %v3494_v5 = vrot.slane %v3484_v25, %v7119_v50  ;;  %v3972_v11 = vrot.slane %v3958_v3, %v7119_v50  ;;  %v1553_v7 = vrot.slane %v7515_v61, %v7091_v51 }
 0x120   : > { %v3501_v1 = vrot.slane %v3485_v32, %v7119_v50  ;;  %v3508_v14 = vrot.slane %v3486_v60, %v7119_v50  ;;  %v1557_v16 = vrot.slane %v7515_v61, %v7094_v58  ;;  %v1561_v29 = vrot.slane %v7515_v61, %v7097_v59 }
 0x121   : > { %v3515_v22 = vrot.slane %v3487_v63, %v7119_v50  ;;  %v1565_v19 = vrot.slane %v7515_v61, %v7100_v2  ;;  %v3973_v33 = vcombine.low %v3965_v62, %v3972_v11  ;;  %v1569_v34 = vrot.slane %v7515_v61, %v7106_v20 }
 0x122   : > { %v3516_v54 = vcombine.low %v3494_v5, %v3501_v1  ;;  %v1573_v4 = vrot.slane %v7515_v61, %v7109_v30  ;;  %v1577_v18 = vrot.slane %v7515_v61, %v7112_v31  ;;  %v1581_v38 = vrot.slane %v7515_v61, %v7116_v49 }
 0x123   : > { %v3517_v36 = vcombine.low %v3508_v14, %v3515_v22  ;;  %v4023_v8 = vcombine.low %v1553_v7, %v1557_v16  ;;  %6004 = vperm.xlu0 %6646, %v3973_v33   ;;  %v4024_v41 = vcombine.low %v1561_v29, %v1565_v19  ;;  %v1265_v45 = vrot.slane %v7412_v57, %v7091_v51 }
 0x124   : > { %v3524_v28 = vrot.slane %v3516_v54, %v7119_v50  ;;  %v4025_v44 = vcombine.low %v1569_v34, %v1573_v4  ;;  %v4026_v55 = vcombine.low %v1577_v18, %v1581_v38  ;;  %v1269_v48 = vrot.slane %v7412_v57, %v7094_v58 }
 0x125   : > { %v3531_v53 = vrot.slane %v3517_v36, %v7119_v50  ;;  %v4033_v47 = vrot.slane %v4023_v8, %v7119_v50  ;;  %v4040_v21 = vrot.slane %v4024_v41, %v7119_v50  ;;  %v1273_v26 = vrot.slane %v7412_v57, %v7097_v59 }
 0x126   : > { %v4047_v61 = vrot.slane %v4025_v44, %v7119_v50  ;;  %v1277_v42 = vrot.slane %v7412_v57, %v7100_v2  ;;  %v4054_v10 = vrot.slane %v4026_v55, %v7119_v50  ;;  %v1281_v6 = vrot.slane %v7412_v57, %v7106_v20 }
 0x127   : > { %v3532_v43 = vcombine.low %v3524_v28, %v3531_v53  ;;  %v1285_v40 = vrot.slane %v7412_v57, %v7109_v30  ;;  %v4055_v12 = vcombine.low %v4033_v47, %v4040_v21  ;;  %v1289_v15 = vrot.slane %v7412_v57, %v7112_v31 }
 0x128   : > { %v1293_v23 = vrot.slane %v7412_v57, %v7116_v49  ;;  %v3582_v17 = vcombine.low %v1265_v45, %v1269_v48  ;;  %v7612_v37 = vadd.f32 %v7088_v35, %v502_v39  ;;  %v4056_v46 = vcombine.low %v4047_v61, %v4054_v10  ;;  %v523_v61 = vpop.xlane.xlu1 %522  ;;  %v508_v10 = vpop.xlane.xlu0 %507 }
 0x129   : > { %5977 = vperm.xlu1 %6647, %v3532_v43   ;;  %v3583_v25 = vcombine.low %v1273_v26, %v1277_v42  ;;  %v3584_v3 = vcombine.low %v1281_v6, %v1285_v40  ;;  %v7615_v32 = vadd.f32 %v7088_v35, %v517_v0  ;;  %v4063_v60 = vrot.slane %v4055_v12, %v7119_v50 }
 0x12a   : > { %v3585_v62 = vcombine.low %v1289_v15, %v1293_v23  ;;  %v3592_v63 = vrot.slane %v3582_v17, %v7119_v50  ;;  %v4070_v5 = vrot.slane %v4056_v46, %v7119_v50  ;;  %v1617_v1 = vrot.slane %v7565_v24, %v7091_v51 }
 0x12b   : > { %v3599_v57 = vrot.slane %v3583_v25, %v7119_v50  ;;  %v3606_v11 = vrot.slane %v3584_v3, %v7119_v50  ;;  %v1621_v7 = vrot.slane %v7565_v24, %v7094_v58  ;;  %v1625_v22 = vrot.slane %v7565_v24, %v7097_v59 }
 0x12c   : > { %v3613_v14 = vrot.slane %v3585_v62, %v7119_v50  ;;  %v1629_v16 = vrot.slane %v7565_v24, %v7100_v2  ;;  %v4071_v29 = vcombine.low %v4063_v60, %v4070_v5  ;;  %v1633_v33 = vrot.slane %v7565_v24, %v7106_v20 }
 0x12d   : > { %v3614_v19 = vcombine.low %v3592_v63, %v3599_v57  ;;  %v1637_v54 = vrot.slane %v7565_v24, %v7109_v30  ;;  %v1641_v4 = vrot.slane %v7565_v24, %v7112_v31  ;;  %v1645_v36 = vrot.slane %v7565_v24, %v7116_v49 }
 0x12e   : > { %v3615_v34 = vcombine.low %v3606_v11, %v3613_v14  ;;  %v4121_v18 = vcombine.low %v1617_v1, %v1621_v7  ;;  %6010 = vperm.xlu0 %6646, %v4071_v29   ;;  %v4122_v8 = vcombine.low %v1625_v22, %v1629_v16  ;;  %v1329_v41 = vrot.slane %v7462_v56, %v7091_v51 }
 0x12f   : > { %v3622_v38 = vrot.slane %v3614_v19, %v7119_v50  ;;  %v4123_v28 = vcombine.low %v1633_v33, %v1637_v54  ;;  %v4124_v45 = vcombine.low %v1641_v4, %v1645_v36  ;;  %v1333_v55 = vrot.slane %v7462_v56, %v7094_v58 }
 0x130   : > { %v3629_v44 = vrot.slane %v3615_v34, %v7119_v50  ;;  %v4131_v53 = vrot.slane %v4121_v18, %v7119_v50  ;;  %v4138_v47 = vrot.slane %v4122_v8, %v7119_v50  ;;  %v1337_v48 = vrot.slane %v7462_v56, %v7097_v59 }
 0x131   : > { %v4145_v24 = vrot.slane %v4123_v28, %v7119_v50  ;;  %v1341_v21 = vrot.slane %v7462_v56, %v7100_v2  ;;  %v4152_v42 = vrot.slane %v4124_v45, %v7119_v50  ;;  %v1345_v0 = vrot.slane %v7462_v56, %v7106_v20 }
 0x132   : > { %v3630_v26 = vcombine.low %v3622_v38, %v3629_v44  ;;  %v1349_v43 = vrot.slane %v7462_v56, %v7109_v30  ;;  %v4153_v6 = vcombine.low %v4131_v53, %v4138_v47  ;;  %v1353_v40 = vrot.slane %v7462_v56, %v7112_v31 }
 0x133   : > { %v1357_v39 = vrot.slane %v7462_v56, %v7116_v49  ;;  %v3680_v12 = vcombine.low %v1329_v41, %v1333_v55  ;;  %v7662_v15 = vadd.f32 %v7088_v35, %v508_v10  ;;  %v4154_v23 = vcombine.low %v4145_v24, %v4152_v42  ;;  %v529_v24 = vpop.xlane.xlu1 %528  ;;  %v514_v42 = vpop.xlane.xlu0 %513 }
 0x134   : > { %5983 = vperm.xlu1 %6647, %v3630_v26   ;;  %v3681_v17 = vcombine.low %v1337_v48, %v1341_v21  ;;  %v3682_v46 = vcombine.low %v1345_v0, %v1349_v43  ;;  %v7665_v25 = vadd.f32 %v7088_v35, %v523_v61  ;;  %v4161_v3 = vrot.slane %v4153_v6, %v7119_v50 }
 0x135   : > { %v3683_v60 = vcombine.low %v1353_v40, %v1357_v39  ;;  %v3690_v62 = vrot.slane %v3680_v12, %v7119_v50  ;;  %v4168_v63 = vrot.slane %v4154_v23, %v7119_v50  ;;  %v1681_v57 = vrot.slane %v7615_v32, %v7091_v51 }
 0x136   : > { %v3697_v56 = vrot.slane %v3681_v17, %v7119_v50  ;;  %v3704_v5 = vrot.slane %v3682_v46, %v7119_v50  ;;  %v1685_v1 = vrot.slane %v7615_v32, %v7094_v58  ;;  %v1689_v14 = vrot.slane %v7615_v32, %v7097_v59 }
 0x137   : > { %v3711_v11 = vrot.slane %v3683_v60, %v7119_v50  ;;  %v1693_v7 = vrot.slane %v7615_v32, %v7100_v2  ;;  %v4169_v22 = vcombine.low %v4161_v3, %v4168_v63  ;;  %v1697_v29 = vrot.slane %v7615_v32, %v7106_v20 }
 0x138   : > { %v3712_v16 = vcombine.low %v3690_v62, %v3697_v56  ;;  %v1701_v19 = vrot.slane %v7615_v32, %v7109_v30  ;;  %v1705_v54 = vrot.slane %v7615_v32, %v7112_v31  ;;  %v1709_v34 = vrot.slane %v7615_v32, %v7116_v49 }
 0x139   : > { %v3713_v33 = vcombine.low %v3704_v5, %v3711_v11  ;;  %v4219_v4 = vcombine.low %v1681_v57, %v1685_v1  ;;  %6016 = vperm.xlu0 %6646, %v4169_v22   ;;  %v4220_v18 = vcombine.low %v1689_v14, %v1693_v7  ;;  %v1393_v8 = vrot.slane %v7512_v52, %v7091_v51 }
 0x13a   : > { %v3720_v36 = vrot.slane %v3712_v16, %v7119_v50  ;;  %v4221_v38 = vcombine.low %v1697_v29, %v1701_v19  ;;  %v4222_v41 = vcombine.low %v1705_v54, %v1709_v34  ;;  %v1397_v45 = vrot.slane %v7512_v52, %v7094_v58 }
 0x13b   : > { %v3727_v28 = vrot.slane %v3713_v33, %v7119_v50  ;;  %v4229_v44 = vrot.slane %v4219_v4, %v7119_v50  ;;  %v4236_v53 = vrot.slane %v4220_v18, %v7119_v50  ;;  %v1401_v55 = vrot.slane %v7512_v52, %v7097_v59 }
 0x13c   : > { %v4243_v32 = vrot.slane %v4221_v38, %v7119_v50  ;;  %v1405_v47 = vrot.slane %v7512_v52, %v7100_v2  ;;  %v4250_v21 = vrot.slane %v4222_v41, %v7119_v50  ;;  %v1409_v61 = vrot.slane %v7512_v52, %v7106_v20 }
 0x13d   : > { %v3728_v48 = vcombine.low %v3720_v36, %v3727_v28  ;;  %v1413_v26 = vrot.slane %v7512_v52, %v7109_v30  ;;  %v4251_v0 = vcombine.low %v4229_v44, %v4236_v53  ;;  %v1417_v43 = vrot.slane %v7512_v52, %v7112_v31 }
 0x13e   : > { %v1421_v10 = vrot.slane %v7512_v52, %v7116_v49  ;;  %v3778_v6 = vcombine.low %v1393_v8, %v1397_v45  ;;  %v7712_v40 = vadd.f32 %v7088_v35, %v514_v42  ;;  %v4252_v39 = vcombine.low %v4243_v32, %v4250_v21  ;;  %v535_v32 = vpop.xlane.xlu1 %534  ;;  %v520_v21 = vpop.xlane.xlu0 %519 }
 0x13f   : > { %5989 = vperm.xlu1 %6647, %v3728_v48   ;;  %v3779_v12 = vcombine.low %v1401_v55, %v1405_v47  ;;  %v3780_v23 = vcombine.low %v1409_v61, %v1413_v26  ;;  %v7715_v17 = vadd.f32 %v7088_v35, %v529_v24  ;;  %v4259_v46 = vrot.slane %v4251_v0, %v7119_v50 }
 0x140   : > { %v3781_v3 = vcombine.low %v1417_v43, %v1421_v10  ;;  %v3788_v60 = vrot.slane %v3778_v6, %v7119_v50  ;;  %v4266_v62 = vrot.slane %v4252_v39, %v7119_v50  ;;  %v1745_v56 = vrot.slane %v7665_v25, %v7091_v51 }
 0x141   : > { %v3795_v52 = vrot.slane %v3779_v12, %v7119_v50  ;;  %v3802_v63 = vrot.slane %v3780_v23, %v7119_v50  ;;  %v1749_v57 = vrot.slane %v7665_v25, %v7094_v58  ;;  %v1753_v11 = vrot.slane %v7665_v25, %v7097_v59 }
 0x142   : > { %v3809_v5 = vrot.slane %v3781_v3, %v7119_v50  ;;  %v1757_v1 = vrot.slane %v7665_v25, %v7100_v2  ;;  %v4267_v14 = vcombine.low %v4259_v46, %v4266_v62  ;;  %v1761_v22 = vrot.slane %v7665_v25, %v7106_v20 }
 0x143   : > { %v3810_v7 = vcombine.low %v3788_v60, %v3795_v52  ;;  %v1765_v16 = vrot.slane %v7665_v25, %v7109_v30  ;;  %v1769_v19 = vrot.slane %v7665_v25, %v7112_v31  ;;  %v1773_v33 = vrot.slane %v7665_v25, %v7116_v49 }
 0x144   : > { %v3811_v29 = vcombine.low %v3802_v63, %v3809_v5  ;;  %v4317_v54 = vcombine.low %v1745_v56, %v1749_v57  ;;  %6022 = vperm.xlu0 %6646, %v4267_v14   ;;  %v4318_v4 = vcombine.low %v1753_v11, %v1757_v1  ;;  %v1457_v18 = vrot.slane %v7562_v9, %v7091_v51 }
 0x145   : > { %v3818_v34 = vrot.slane %v3810_v7, %v7119_v50  ;;  %v4319_v36 = vcombine.low %v1761_v22, %v1765_v16  ;;  %v4320_v8 = vcombine.low %v1769_v19, %v1773_v33  ;;  %v1461_v41 = vrot.slane %v7562_v9, %v7094_v58 }
 0x146   : > { %v3825_v38 = vrot.slane %v3811_v29, %v7119_v50  ;;  %v4327_v28 = vrot.slane %v4317_v54, %v7119_v50  ;;  %v4334_v44 = vrot.slane %v4318_v4, %v7119_v50  ;;  %v1465_v45 = vrot.slane %v7562_v9, %v7097_v59 }
 0x147   : > { %v4341_v25 = vrot.slane %v4319_v36, %v7119_v50  ;;  %v1469_v53 = vrot.slane %v7562_v9, %v7100_v2  ;;  %v4348_v47 = vrot.slane %v4320_v8, %v7119_v50  ;;  %v1473_v24 = vrot.slane %v7562_v9, %v7106_v20 }
 0x148   : > { %v3826_v55 = vcombine.low %v3818_v34, %v3825_v38  ;;  %v1477_v48 = vrot.slane %v7562_v9, %v7109_v30  ;;  %v4349_v61 = vcombine.low %v4327_v28, %v4334_v44  ;;  %v1481_v26 = vrot.slane %v7562_v9, %v7112_v31 }
 0x149   : > { %v1485_v42 = vrot.slane %v7562_v9, %v7116_v49  ;;  %v3876_v0 = vcombine.low %v1457_v18, %v1461_v41  ;;  %v7762_v43 = vadd.f32 %v7088_v35, %v520_v21  ;;  %v4350_v10 = vcombine.low %v4341_v25, %v4348_v47  ;;  %v541_v25 = vpop.xlane.xlu1 %540  ;;  %v526_v47 = vpop.xlane.xlu0 %525 }
 0x14a   : > { %5995 = vperm.xlu1 %6647, %v3826_v55   ;;  %v3877_v6 = vcombine.low %v1465_v45, %v1469_v53  ;;  %v3878_v39 = vcombine.low %v1473_v24, %v1477_v48  ;;  %v7765_v12 = vadd.f32 %v7088_v35, %v535_v32  ;;  %v4357_v23 = vrot.slane %v4349_v61, %v7119_v50 }
 0x14b   : > { %v3879_v46 = vcombine.low %v1481_v26, %v1485_v42  ;;  %v3886_v3 = vrot.slane %v3876_v0, %v7119_v50  ;;  %v4364_v60 = vrot.slane %v4350_v10, %v7119_v50  ;;  %v1809_v52 = vrot.slane %v7715_v17, %v7091_v51 }
 0x14c   : > { %v3893_v9 = vrot.slane %v3877_v6, %v7119_v50  ;;  %v3900_v62 = vrot.slane %v3878_v39, %v7119_v50  ;;  %v1813_v56 = vrot.slane %v7715_v17, %v7094_v58  ;;  %v1817_v5 = vrot.slane %v7715_v17, %v7097_v59 }
 0x14d   : > { %v3907_v63 = vrot.slane %v3879_v46, %v7119_v50  ;;  %v1821_v57 = vrot.slane %v7715_v17, %v7100_v2  ;;  %v4365_v11 = vcombine.low %v4357_v23, %v4364_v60  ;;  %v1825_v14 = vrot.slane %v7715_v17, %v7106_v20 }
 0x14e   : > { %v3908_v1 = vcombine.low %v3886_v3, %v3893_v9  ;;  %v1829_v7 = vrot.slane %v7715_v17, %v7109_v30  ;;  %v1833_v16 = vrot.slane %v7715_v17, %v7112_v31  ;;  %v1837_v29 = vrot.slane %v7715_v17, %v7116_v49 }
 0x14f   : > { %v3909_v22 = vcombine.low %v3900_v62, %v3907_v63  ;;  %v4415_v19 = vcombine.low %v1809_v52, %v1813_v56  ;;  %6028 = vperm.xlu0 %6646, %v4365_v11   ;;  %v4416_v54 = vcombine.low %v1817_v5, %v1821_v57  ;;  %v1521_v4 = vrot.slane %v7612_v37, %v7091_v51 }
 0x150   : > { %v3916_v33 = vrot.slane %v3908_v1, %v7119_v50  ;;  %v4417_v34 = vcombine.low %v1825_v14, %v1829_v7  ;;  %v4418_v18 = vcombine.low %v1833_v16, %v1837_v29  ;;  %v1525_v8 = vrot.slane %v7612_v37, %v7094_v58 }
 0x151   : > { %v3923_v36 = vrot.slane %v3909_v22, %v7119_v50  ;;  %v4425_v38 = vrot.slane %v4415_v19, %v7119_v50  ;;  %v4432_v28 = vrot.slane %v4416_v54, %v7119_v50  ;;  %v1529_v41 = vrot.slane %v7612_v37, %v7097_v59 }
 0x152   : > { %v4439_v17 = vrot.slane %v4417_v34, %v7119_v50  ;;  %v1533_v44 = vrot.slane %v7612_v37, %v7100_v2  ;;  %v4446_v53 = vrot.slane %v4418_v18, %v7119_v50  ;;  %v1537_v32 = vrot.slane %v7612_v37, %v7106_v20 }
 0x153   : > { %v3924_v45 = vcombine.low %v3916_v33, %v3923_v36  ;;  %v1541_v55 = vrot.slane %v7612_v37, %v7109_v30  ;;  %v4447_v24 = vcombine.low %v4425_v38, %v4432_v28  ;;  %v1545_v48 = vrot.slane %v7612_v37, %v7112_v31 }
 0x154   : > { %v1549_v21 = vrot.slane %v7612_v37, %v7116_v49  ;;  %v3974_v61 = vcombine.low %v1521_v4, %v1525_v8  ;;  %v7812_v26 = vadd.f32 %v7088_v35, %v526_v47  ;;  %v4448_v42 = vcombine.low %v4439_v17, %v4446_v53  ;;  %v547_v17 = vpop.xlane.xlu1 %546  ;;  %v532_v53 = vpop.xlane.xlu0 %531 }
 0x155   : > { %6001 = vperm.xlu1 %6647, %v3924_v45   ;;  %v3975_v0 = vcombine.low %v1529_v41, %v1533_v44  ;;  %v3976_v10 = vcombine.low %v1537_v32, %v1541_v55  ;;  %v7815_v6 = vadd.f32 %v7088_v35, %v541_v25  ;;  %v4455_v39 = vrot.slane %v4447_v24, %v7119_v50 }
 0x156   : > { %v3977_v23 = vcombine.low %v1545_v48, %v1549_v21  ;;  %v3984_v46 = vrot.slane %v3974_v61, %v7119_v50  ;;  %v4462_v3 = vrot.slane %v4448_v42, %v7119_v50  ;;  %v1873_v9 = vrot.slane %v7765_v12, %v7091_v51 }
 0x157   : > { %v3991_v37 = vrot.slane %v3975_v0, %v7119_v50  ;;  %v3998_v60 = vrot.slane %v3976_v10, %v7119_v50  ;;  %v1877_v52 = vrot.slane %v7765_v12, %v7094_v58  ;;  %v1881_v63 = vrot.slane %v7765_v12, %v7097_v59 }
 0x158   : > { %v4005_v62 = vrot.slane %v3977_v23, %v7119_v50  ;;  %v1885_v56 = vrot.slane %v7765_v12, %v7100_v2  ;;  %v4463_v5 = vcombine.low %v4455_v39, %v4462_v3  ;;  %v1889_v11 = vrot.slane %v7765_v12, %v7106_v20 }
 0x159   : > { %v4006_v57 = vcombine.low %v3984_v46, %v3991_v37  ;;  %v1893_v1 = vrot.slane %v7765_v12, %v7109_v30  ;;  %v1897_v7 = vrot.slane %v7765_v12, %v7112_v31  ;;  %v1901_v22 = vrot.slane %v7765_v12, %v7116_v49 }
 0x15a   : > { %v4007_v14 = vcombine.low %v3998_v60, %v4005_v62  ;;  %v4513_v16 = vcombine.low %v1873_v9, %v1877_v52  ;;  %6034 = vperm.xlu0 %6646, %v4463_v5   ;;  %v4514_v19 = vcombine.low %v1881_v63, %v1885_v56  ;;  %v1585_v54 = vrot.slane %v7662_v15, %v7091_v51 }
 0x15b   : > { %v4014_v29 = vrot.slane %v4006_v57, %v7119_v50  ;;  %v4515_v33 = vcombine.low %v1889_v11, %v1893_v1  ;;  %v4516_v4 = vcombine.low %v1897_v7, %v1901_v22  ;;  %v1589_v18 = vrot.slane %v7662_v15, %v7094_v58 }
 0x15c   : > { %v4021_v34 = vrot.slane %v4007_v14, %v7119_v50  ;;  %v4523_v36 = vrot.slane %v4513_v16, %v7119_v50  ;;  %v4530_v38 = vrot.slane %v4514_v19, %v7119_v50  ;;  %v1593_v8 = vrot.slane %v7662_v15, %v7097_v59 }
 0x15d   : > { %v4537_v12 = vrot.slane %v4515_v33, %v7119_v50  ;;  %v1597_v28 = vrot.slane %v7662_v15, %v7100_v2  ;;  %v4544_v44 = vrot.slane %v4516_v4, %v7119_v50  ;;  %v1601_v25 = vrot.slane %v7662_v15, %v7106_v20 }
 0x15e   : > { %v4022_v41 = vcombine.low %v4014_v29, %v4021_v34  ;;  %v1605_v45 = vrot.slane %v7662_v15, %v7109_v30  ;;  %v4545_v32 = vcombine.low %v4523_v36, %v4530_v38  ;;  %v1609_v55 = vrot.slane %v7662_v15, %v7112_v31  ;;  %v538_v36 = vpop.xlane.xlu0 %537 }
 0x15f   : > { %v1613_v47 = vrot.slane %v7662_v15, %v7116_v49  ;;  %v4072_v24 = vcombine.low %v1585_v54, %v1589_v18  ;;  %v7862_v48 = vadd.f32 %v7088_v35, %v532_v53  ;;  %v4546_v21 = vcombine.low %v4537_v12, %v4544_v44 }
 0x160   : > { %6007 = vperm.xlu1 %6647, %v4022_v41   ;;  %v4073_v61 = vcombine.low %v1593_v8, %v1597_v28  ;;  %v4074_v42 = vcombine.low %v1601_v25, %v1605_v45  ;;  %v7865_v0 = vadd.f32 %v7088_v35, %v547_v17  ;;  %v4553_v10 = vrot.slane %v4545_v32, %v7119_v50  ;;  %v553_v8 = vpop.xlane.xlu1 %552 }
 0x161   : > { %v4075_v39 = vcombine.low %v1609_v55, %v1613_v47  ;;  %v4082_v23 = vrot.slane %v4072_v24, %v7119_v50  ;;  %v4560_v46 = vrot.slane %v4546_v21, %v7119_v50  ;;  %v1937_v37 = vrot.slane %v7815_v6, %v7091_v51 }
 0x162   : > { %v4089_v15 = vrot.slane %v4073_v61, %v7119_v50  ;;  %v4096_v3 = vrot.slane %v4074_v42, %v7119_v50  ;;  %v1941_v9 = vrot.slane %v7815_v6, %v7094_v58  ;;  %v1945_v62 = vrot.slane %v7815_v6, %v7097_v59 }
 0x163   : > { %v4103_v60 = vrot.slane %v4075_v39, %v7119_v50  ;;  %v1949_v52 = vrot.slane %v7815_v6, %v7100_v2  ;;  %v4561_v63 = vcombine.low %v4553_v10, %v4560_v46  ;;  %v1953_v5 = vrot.slane %v7815_v6, %v7106_v20 }
 0x164   : > { %v4104_v56 = vcombine.low %v4082_v23, %v4089_v15  ;;  %v1957_v57 = vrot.slane %v7815_v6, %v7109_v30  ;;  %v1961_v1 = vrot.slane %v7815_v6, %v7112_v31  ;;  %v1965_v14 = vrot.slane %v7815_v6, %v7116_v49 }
 0x165   : > { %v4105_v11 = vcombine.low %v4096_v3, %v4103_v60  ;;  %v4611_v7 = vcombine.low %v1937_v37, %v1941_v9  ;;  %6040 = vperm.xlu0 %6646, %v4561_v63   ;;  %v4612_v16 = vcombine.low %v1945_v62, %v1949_v52  ;;  %v1649_v19 = vrot.slane %v7712_v40, %v7091_v51  ;;  %v544_v3 = vpop.xlane.xlu0 %543 }
 0x166   : > { %v4112_v22 = vrot.slane %v4104_v56, %v7119_v50  ;;  %v4613_v29 = vcombine.low %v1953_v5, %v1957_v57  ;;  %v4614_v54 = vcombine.low %v1961_v1, %v1965_v14  ;;  %v1653_v4 = vrot.slane %v7712_v40, %v7094_v58 }
 0x167   : > { %v4119_v33 = vrot.slane %v4105_v11, %v7119_v50  ;;  %v4621_v34 = vrot.slane %v4611_v7, %v7119_v50  ;;  %v4628_v6 = vrot.slane %v4612_v16, %v7119_v50  ;;  %v1657_v38 = vrot.slane %v7712_v40, %v7097_v59 }
 0x168   : > { %v4635_v18 = vrot.slane %v4613_v29, %v7119_v50  ;;  %v1661_v12 = vrot.slane %v7712_v40, %v7100_v2  ;;  %v4642_v17 = vrot.slane %v4614_v54, %v7119_v50  ;;  %v1665_v41 = vrot.slane %v7712_v40, %v7106_v20 }
 0x169   : > { %v4120_v28 = vcombine.low %v4112_v22, %v4119_v33  ;;  %v1669_v44 = vrot.slane %v7712_v40, %v7109_v30  ;;  %v4643_v25 = vcombine.low %v4621_v34, %v4628_v6  ;;  %v1673_v45 = vrot.slane %v7712_v40, %v7112_v31 }
 0x16a   : > { %v1677_v53 = vrot.slane %v7712_v40, %v7116_v49  ;;  %v4170_v32 = vcombine.low %v1649_v19, %v1653_v4  ;;  %v7912_v55 = vadd.f32 %v7088_v35, %v538_v36  ;;  %v4644_v47 = vcombine.low %v4635_v18, %v4642_v17  ;;  %v7942_v19 = vpop.xlane.xlu1 %558 }
 0x16b   : > { %6013 = vperm.xlu1 %6647, %v4120_v28   ;;  %v4171_v24 = vcombine.low %v1657_v38, %v1661_v12  ;;  %v4172_v21 = vcombine.low %v1665_v41, %v1669_v44  ;;  %v7915_v61 = vadd.f32 %v7088_v35, %v553_v8  ;;  %v4651_v42 = vrot.slane %v4643_v25, %v7119_v50  ;;  %v550_v38 = vpop.xlane.xlu0 %549 }
 0x16c   : > { %v4173_v10 = vcombine.low %v1673_v45, %v1677_v53  ;;  %v4180_v39 = vrot.slane %v4170_v32, %v7119_v50  ;;  %v4658_v23 = vrot.slane %v4644_v47, %v7119_v50  ;;  %v2001_v15 = vrot.slane %v7865_v0, %v7091_v51 }
 0x16d   : > { %v4187_v40 = vrot.slane %v4171_v24, %v7119_v50  ;;  %v4194_v46 = vrot.slane %v4172_v21, %v7119_v50  ;;  %v2005_v60 = vrot.slane %v7865_v0, %v7094_v58  ;;  %v2009_v9 = vrot.slane %v7865_v0, %v7097_v59 }
 0x16e   : > { %v4201_v37 = vrot.slane %v4173_v10, %v7119_v50  ;;  %v2013_v62 = vrot.slane %v7865_v0, %v7100_v2  ;;  %v4659_v52 = vcombine.low %v4651_v42, %v4658_v23  ;;  %v2017_v56 = vrot.slane %v7865_v0, %v7106_v20  ;;  %v7971_v23 = vpop.xlane.xlu1 %564 }
 0x16f   : > { %v4202_v63 = vcombine.low %v4180_v39, %v4187_v40  ;;  %v2021_v5 = vrot.slane %v7865_v0, %v7109_v30  ;;  %v2025_v11 = vrot.slane %v7865_v0, %v7112_v31  ;;  %v2029_v1 = vrot.slane %v7865_v0, %v7116_v49 }
 0x170   : > { %v4203_v57 = vcombine.low %v4194_v46, %v4201_v37  ;;  %v4709_v14 = vcombine.low %v2001_v15, %v2005_v60  ;;  %6046 = vperm.xlu0 %6646, %v4659_v52   ;;  %v4710_v22 = vcombine.low %v2009_v9, %v2013_v62  ;;  %v1713_v29 = vrot.slane %v7762_v43, %v7091_v51  ;;  %v556_v62 = vpop.xlane.xlu0 %555 }
 0x171   : > { %v4210_v7 = vrot.slane %v4202_v63, %v7119_v50  ;;  %v4711_v16 = vcombine.low %v2017_v56, %v2021_v5  ;;  %v4712_v54 = vcombine.low %v2025_v11, %v2029_v1  ;;  %v1717_v4 = vrot.slane %v7762_v43, %v7094_v58 }
 0x172   : > { %v4217_v33 = vrot.slane %v4203_v57, %v7119_v50  ;;  %v4719_v34 = vrot.slane %v4709_v14, %v7119_v50  ;;  %v4726_v0 = vrot.slane %v4710_v22, %v7119_v50  ;;  %v1721_v6 = vrot.slane %v7762_v43, %v7097_v59 }
 0x173   : > { %v4733_v36 = vrot.slane %v4711_v16, %v7119_v50  ;;  %v1725_v18 = vrot.slane %v7762_v43, %v7100_v2  ;;  %v4740_v8 = vrot.slane %v4712_v54, %v7119_v50  ;;  %v1729_v28 = vrot.slane %v7762_v43, %v7106_v20 }
 0x174   : > { %v4218_v12 = vcombine.low %v4210_v7, %v4217_v33  ;;  %v1733_v17 = vrot.slane %v7762_v43, %v7109_v30  ;;  %v4741_v41 = vcombine.low %v4719_v34, %v4726_v0  ;;  %v1737_v44 = vrot.slane %v7762_v43, %v7112_v31  ;;  %v8000_v0 = vpop.xlane.xlu1 %570 }
 0x175   : > { %v1741_v25 = vrot.slane %v7762_v43, %v7116_v49  ;;  %v4268_v45 = vcombine.low %v1713_v29, %v1717_v4  ;;  %v7964_v53 = vadd.f32 %v7088_v35, %v544_v3  ;;  %v4742_v32 = vcombine.low %v4733_v36, %v4740_v8 }
 0x176   : > { %6019 = vperm.xlu1 %6647, %v4218_v12   ;;  %v4269_v47 = vcombine.low %v1721_v6, %v1725_v18  ;;  %v4270_v24 = vcombine.low %v1729_v28, %v1733_v17  ;;  %v7967_v21 = vadd.f32 %v7088_v35, %v550_v38  ;;  %v4749_v42 = vrot.slane %v4741_v41, %v7119_v50  ;;  %v562_v17 = vpop.xlane.xlu0 %561 }
 0x177   : > { %v4271_v10 = vcombine.low %v1737_v44, %v1741_v25  ;;  %v4278_v39 = vrot.slane %v4268_v45, %v7119_v50  ;;  %v4756_v43 = vrot.slane %v4742_v32, %v7119_v50  ;;  %v2065_v15 = vrot.slane %v7915_v61, %v7091_v51 }
 0x178   : > { %v4285_v40 = vrot.slane %v4269_v47, %v7119_v50  ;;  %v4292_v46 = vrot.slane %v4270_v24, %v7119_v50  ;;  %v2069_v37 = vrot.slane %v7915_v61, %v7094_v58  ;;  %v2073_v60 = vrot.slane %v7915_v61, %v7097_v59 }
 0x179   : > { %v4299_v3 = vrot.slane %v4271_v10, %v7119_v50  ;;  %v2077_v9 = vrot.slane %v7915_v61, %v7100_v2  ;;  %v4757_v52 = vcombine.low %v4749_v42, %v4756_v43  ;;  %v2081_v56 = vrot.slane %v7915_v61, %v7106_v20 }
 0x17a   : > { %v4300_v63 = vcombine.low %v4278_v39, %v4285_v40  ;;  %v2085_v5 = vrot.slane %v7915_v61, %v7109_v30  ;;  %v2089_v11 = vrot.slane %v7915_v61, %v7112_v31  ;;  %v2093_v1 = vrot.slane %v7915_v61, %v7116_v49 }
 0x17b   : > { %v4301_v57 = vcombine.low %v4292_v46, %v4299_v3  ;;  %v4807_v14 = vcombine.low %v2065_v15, %v2069_v37  ;;  %6052 = vperm.xlu0 %6646, %v4757_v52   ;;  %v4808_v22 = vcombine.low %v2073_v60, %v2077_v9  ;;  %v1777_v29 = vrot.slane %v7812_v26, %v7091_v51  ;;  %v577_v37 = vpop.xlane.xlu1 %576 }
 0x17c   : > { %v4308_v7 = vrot.slane %v4300_v63, %v7119_v50  ;;  %v4809_v16 = vcombine.low %v2081_v56, %v2085_v5  ;;  %v4810_v54 = vcombine.low %v2089_v11, %v2093_v1  ;;  %v1781_v4 = vrot.slane %v7812_v26, %v7094_v58 }
 0x17d   : > { %v4315_v33 = vrot.slane %v4301_v57, %v7119_v50  ;;  %v4817_v34 = vrot.slane %v4807_v14, %v7119_v50  ;;  %v4824_v61 = vrot.slane %v4808_v22, %v7119_v50  ;;  %v1785_v6 = vrot.slane %v7812_v26, %v7097_v59  ;;  %v8042_v57 = vpop.xlane.xlu0 %567 }
 0x17e   : > { %v4831_v36 = vrot.slane %v4809_v16, %v7119_v50  ;;  %v1789_v18 = vrot.slane %v7812_v26, %v7100_v2  ;;  %v4838_v12 = vrot.slane %v4810_v54, %v7119_v50  ;;  %v1793_v8 = vrot.slane %v7812_v26, %v7106_v20 }
 0x17f   : > { %v4316_v38 = vcombine.low %v4308_v7, %v4315_v33  ;;  %v1797_v28 = vrot.slane %v7812_v26, %v7109_v30  ;;  %v4839_v41 = vcombine.low %v4817_v34, %v4824_v61  ;;  %v1801_v44 = vrot.slane %v7812_v26, %v7112_v31 }
 0x180   : > { %v1805_v25 = vrot.slane %v7812_v26, %v7116_v49  ;;  %v4366_v45 = vcombine.low %v1777_v29, %v1781_v4  ;;  %v8019_v32 = vadd.f32 %v7088_v35, %v7942_v19  ;;  %v4840_v47 = vcombine.low %v4831_v36, %v4838_v12 }
 0x181   : > { %6025 = vperm.xlu1 %6647, %v4316_v38   ;;  %v4367_v24 = vcombine.low %v1785_v6, %v1789_v18  ;;  %v4368_v42 = vcombine.low %v1793_v8, %v1797_v28  ;;  %v8022_v10 = vadd.f32 %v7088_v35, %v556_v62  ;;  %v4847_v39 = vrot.slane %v4839_v41, %v7119_v50  ;;  %v583_v8 = vpop.xlane.xlu1 %582 }
 0x182   : > { %v4369_v43 = vcombine.low %v1801_v44, %v1805_v25  ;;  %v4376_v40 = vrot.slane %v4366_v45, %v7119_v50  ;;  %v4854_v46 = vrot.slane %v4840_v47, %v7119_v50  ;;  %v1841_v19 = vrot.slane %v7862_v48, %v7091_v51  ;;  %v574_v47 = vpop.xlane.xlu0 %573 }
 0x183   : > { %v4383_v26 = vrot.slane %v4367_v24, %v7119_v50  ;;  %v4390_v15 = vrot.slane %v4368_v42, %v7119_v50  ;;  %v1845_v60 = vrot.slane %v7862_v48, %v7094_v58  ;;  %v1849_v9 = vrot.slane %v7862_v48, %v7097_v59 }
 0x184   : > { %v4397_v3 = vrot.slane %v4369_v43, %v7119_v50  ;;  %v1853_v62 = vrot.slane %v7862_v48, %v7100_v2  ;;  %v4855_v52 = vcombine.low %v4847_v39, %v4854_v46  ;;  %v1857_v56 = vrot.slane %v7862_v48, %v7106_v20 }
 0x185   : > { %v4398_v63 = vcombine.low %v4376_v40, %v4383_v26  ;;  %v1861_v5 = vrot.slane %v7862_v48, %v7109_v30  ;;  %v1865_v1 = vrot.slane %v7862_v48, %v7112_v31  ;;  %v1869_v14 = vrot.slane %v7862_v48, %v7116_v49 }
 0x186   : > { %v4399_v11 = vcombine.low %v4390_v15, %v4397_v3  ;;  %v4464_v7 = vcombine.low %v1841_v19, %v1845_v60  ;;  %v8049_v22 = vadd.f32 %v7088_v35, %v562_v17  ;;  %6058 = vperm.xlu0 %6646, %v4855_v52   ;;  %v4465_v29 = vcombine.low %v1849_v9, %v1853_v62 }
 0x187   : > { %v4406_v16 = vrot.slane %v4398_v63, %v7119_v50  ;;  %v4466_v33 = vcombine.low %v1857_v56, %v1861_v5  ;;  %v8054_v34 = vadd.f32 %v7088_v35, %v577_v37  ;;  %v4467_v4 = vcombine.low %v1865_v1, %v1869_v14 }
 0x188   : > { %v4413_v54 = vrot.slane %v4399_v11, %v7119_v50  ;;  %v4474_v61 = vrot.slane %v4464_v7, %v7119_v50  ;;  %v4481_v36 = vrot.slane %v4465_v29, %v7119_v50  ;;  %v1905_v6 = vrot.slane %v7912_v55, %v7091_v51  ;;  %v589_v11 = vpop.xlane.xlu1 %588 }
 0x189   : > { %v4488_v48 = vrot.slane %v4466_v33, %v7119_v50  ;;  %v1909_v18 = vrot.slane %v7912_v55, %v7094_v58  ;;  %v4495_v12 = vrot.slane %v4467_v4, %v7119_v50  ;;  %v1913_v28 = vrot.slane %v7912_v55, %v7097_v59  ;;  %v580_v33 = vpop.xlane.xlu0 %579 }
 0x18a   : > { %v4414_v38 = vcombine.low %v4406_v16, %v4413_v54  ;;  %v1917_v17 = vrot.slane %v7912_v55, %v7100_v2  ;;  %v4496_v41 = vcombine.low %v4474_v61, %v4481_v36  ;;  %v1921_v44 = vrot.slane %v7912_v55, %v7106_v20 }
 0x18b   : > { %v1925_v25 = vrot.slane %v7912_v55, %v7109_v30  ;;  %v1929_v45 = vrot.slane %v7912_v55, %v7112_v31  ;;  %v4497_v24 = vcombine.low %v4488_v48, %v4495_v12  ;;  %v1933_v42 = vrot.slane %v7912_v55, %v7116_v49 }
 0x18c   : > { %6031 = vperm.xlu1 %6647, %v4414_v38   ;;  %v4562_v39 = vcombine.low %v1905_v6, %v1909_v18  ;;  %v4563_v43 = vcombine.low %v1913_v28, %v1917_v17  ;;  %v8077_v40 = vadd.f32 %v7088_v35, %v574_v47  ;;  %v4504_v46 = vrot.slane %v4496_v41, %v7119_v50 }
 0x18d   : > { %v8081_v26 = vadd.f32 %v7088_v35, %v583_v8  ;;  %v4564_v15 = vcombine.low %v1921_v44, %v1925_v25  ;;  %v4511_v19 = vrot.slane %v4497_v24, %v7119_v50  ;;  %v4565_v3 = vcombine.low %v1929_v45, %v1933_v42 }
 0x18e   : > { %v4572_v37 = vrot.slane %v4562_v39, %v7119_v50  ;;  %v4579_v60 = vrot.slane %v4563_v43, %v7119_v50  ;;  %v1969_v9 = vrot.slane %v7964_v53, %v7091_v51  ;;  %v1973_v62 = vrot.slane %v7964_v53, %v7094_v58 }
 0x18f   : > { %v4586_v55 = vrot.slane %v4564_v15, %v7119_v50  ;;  %v1977_v52 = vrot.slane %v7964_v53, %v7097_v59  ;;  %v4512_v63 = vcombine.low %v4504_v46, %v4511_v19  ;;  %v4593_v56 = vrot.slane %v4565_v3, %v7119_v50 }
 0x190   : > { %v4594_v5 = vcombine.low %v4572_v37, %v4579_v60  ;;  %v1981_v1 = vrot.slane %v7964_v53, %v7100_v2  ;;  %v1985_v14 = vrot.slane %v7964_v53, %v7106_v20  ;;  %v1989_v7 = vrot.slane %v7964_v53, %v7109_v30 }
 0x191   : > { %v1993_v16 = vrot.slane %v7964_v53, %v7112_v31  ;;  %v1997_v29 = vrot.slane %v7964_v53, %v7116_v49  ;;  %6037 = vperm.xlu1 %6647, %v4512_v63   ;;  %v4595_v54 = vcombine.low %v4586_v55, %v4593_v56  ;;  %v4660_v61 = vcombine.low %v1969_v9, %v1973_v62 }
 0x192   : > { %v4602_v4 = vrot.slane %v4594_v5, %v7119_v50  ;;  %v4661_v36 = vcombine.low %v1977_v52, %v1981_v1  ;;  %v8106_v48 = vadd.f32 %v7088_v35, %v580_v33  ;;  %v8109_v6 = vadd.f32 %v7088_v35, %v589_v11  ;;  %v595_v1 = vpop.xlane.xlu1 %594 }
 0x193   : > { %v4662_v18 = vcombine.low %v1985_v14, %v1989_v7  ;;  %v4663_v38 = vcombine.low %v1993_v16, %v1997_v29  ;;  %v4609_v12 = vrot.slane %v4595_v54, %v7119_v50  ;;  %v4670_v8 = vrot.slane %v4660_v61, %v7119_v50  ;;  %v586_v29 = vpop.xlane.xlu0 %585 }
 0x194   : > { %v4677_v53 = vrot.slane %v4661_v36, %v7119_v50  ;;  %v2321_v28 = vrot.slane %v8054_v34, %v7091_v51  ;;  %v2325_v44 = vrot.slane %v8054_v34, %v7094_v58  ;;  %v2329_v25 = vrot.slane %v8054_v34, %v7097_v59 }
 0x195   : > { %v4684_v17 = vrot.slane %v4662_v18, %v7119_v50  ;;  %v4691_v41 = vrot.slane %v4663_v38, %v7119_v50  ;;  %v4610_v45 = vcombine.low %v4602_v4, %v4609_v12  ;;  %v2333_v24 = vrot.slane %v8054_v34, %v7100_v2 }
 0x196   : > { %v4692_v47 = vcombine.low %v4670_v8, %v4677_v53  ;;  %v2337_v42 = vrot.slane %v8054_v34, %v7106_v20  ;;  %v2341_v43 = vrot.slane %v8054_v34, %v7109_v30  ;;  %v2345_v46 = vrot.slane %v8054_v34, %v7112_v31 }
 0x197   : > { %v4693_v39 = vcombine.low %v4684_v17, %v4691_v41  ;;  %v2349_v15 = vrot.slane %v8054_v34, %v7116_v49  ;;  %6043 = vperm.xlu1 %6647, %v4610_v45   ;;  %v5199_v3 = vcombine.low %v2321_v28, %v2325_v44  ;;  %v5200_v37 = vcombine.low %v2329_v25, %v2333_v24 }
 0x198   : > { %v4700_v19 = vrot.slane %v4692_v47, %v7119_v50  ;;  %v2033_v60 = vrot.slane %v7967_v21, %v7091_v51  ;;  %v5201_v9 = vcombine.low %v2337_v42, %v2341_v43  ;;  %v2037_v52 = vrot.slane %v7967_v21, %v7094_v58 }
 0x199   : > { %v4707_v55 = vrot.slane %v4693_v39, %v7119_v50  ;;  %v5202_v62 = vcombine.low %v2345_v46, %v2349_v15  ;;  %v5209_v63 = vrot.slane %v5199_v3, %v7119_v50  ;;  %v5216_v56 = vrot.slane %v5200_v37, %v7119_v50 }
 0x19a   : > { %v2041_v34 = vrot.slane %v7967_v21, %v7097_v59  ;;  %v2045_v5 = vrot.slane %v7967_v21, %v7100_v2  ;;  %v5223_v14 = vrot.slane %v5201_v9, %v7119_v50  ;;  %v2049_v16 = vrot.slane %v7967_v21, %v7106_v20 }
 0x19b   : > { %v4708_v11 = vcombine.low %v4700_v19, %v4707_v55  ;;  %v5230_v7 = vrot.slane %v5202_v62, %v7119_v50  ;;  %v5231_v33 = vcombine.low %v5209_v63, %v5216_v56  ;;  %v2053_v54 = vrot.slane %v7967_v21, %v7109_v30 }
 0x19c   : > { %v2057_v4 = vrot.slane %v7967_v21, %v7112_v31  ;;  %v2061_v61 = vrot.slane %v7967_v21, %v7116_v49  ;;  %v8155_v36 = vadd.f32 %v7088_v35, %v586_v29  ;;  %v4758_v38 = vcombine.low %v2033_v60, %v2037_v52 }
 0x19d   : > { %6049 = vperm.xlu1 %6647, %v4708_v11   ;;  %v5232_v18 = vcombine.low %v5223_v14, %v5230_v7  ;;  %v4759_v12 = vcombine.low %v2041_v34, %v2045_v5  ;;  %v8158_v8 = vadd.f32 %v7088_v35, %v595_v1  ;;  %v5239_v53 = vrot.slane %v5231_v33, %v7119_v50 }
 0x19e   : > { %v4760_v28 = vcombine.low %v2049_v16, %v2053_v54  ;;  %v4761_v17 = vcombine.low %v2057_v4, %v2061_v61  ;;  %v4768_v44 = vrot.slane %v4758_v38, %v7119_v50  ;;  %v2385_v25 = vrot.slane %v8081_v26, %v7091_v51  ;;  %v592_v54 = vpop.xlane.xlu0 %591 }
 0x19f   : > { %v5246_v41 = vrot.slane %v5232_v18, %v7119_v50  ;;  %v4775_v21 = vrot.slane %v4759_v12, %v7119_v50  ;;  %v2389_v24 = vrot.slane %v8081_v26, %v7094_v58  ;;  %v2393_v42 = vrot.slane %v8081_v26, %v7097_v59 }
 0x1a0   : > { %v4782_v45 = vrot.slane %v4760_v28, %v7119_v50  ;;  %v4789_v47 = vrot.slane %v4761_v17, %v7119_v50  ;;  %v2397_v46 = vrot.slane %v8081_v26, %v7100_v2  ;;  %v2401_v15 = vrot.slane %v8081_v26, %v7106_v20 }
 0x1a1   : > { %v5247_v39 = vcombine.low %v5239_v53, %v5246_v41  ;;  %v4790_v43 = vcombine.low %v4768_v44, %v4775_v21  ;;  %v2405_v3 = vrot.slane %v8081_v26, %v7109_v30  ;;  %v2409_v37 = vrot.slane %v8081_v26, %v7112_v31 }
 0x1a2   : > { %v4791_v19 = vcombine.low %v4782_v45, %v4789_v47  ;;  %v2413_v60 = vrot.slane %v8081_v26, %v7116_v49  ;;  %v5297_v9 = vcombine.low %v2385_v25, %v2389_v24  ;;  %v5298_v62 = vcombine.low %v2393_v42, %v2397_v46 }
 0x1a3   : > { %6082 = vperm.xlu0 %6646, %v5247_v39   ;;  %v4798_v55 = vrot.slane %v4790_v43, %v7119_v50  ;;  %v2289_v52 = vrot.slane %v8077_v40, %v7091_v51  ;;  %v5299_v56 = vcombine.low %v2401_v15, %v2405_v3  ;;  %v2293_v5 = vrot.slane %v8077_v40, %v7094_v58 }
 0x1a4   : > { %v4805_v63 = vrot.slane %v4791_v19, %v7119_v50  ;;  %v5300_v34 = vcombine.low %v2409_v37, %v2413_v60  ;;  %v5307_v11 = vrot.slane %v5297_v9, %v7119_v50  ;;  %v5314_v1 = vrot.slane %v5298_v62, %v7119_v50 }
 0x1a5   : > { %v2297_v26 = vrot.slane %v8077_v40, %v7097_v59  ;;  %v2301_v14 = vrot.slane %v8077_v40, %v7100_v2  ;;  %v5321_v16 = vrot.slane %v5299_v56, %v7119_v50  ;;  %v2305_v33 = vrot.slane %v8077_v40, %v7106_v20 }
 0x1a6   : > { %v4806_v7 = vcombine.low %v4798_v55, %v4805_v63  ;;  %v5328_v29 = vrot.slane %v5300_v34, %v7119_v50  ;;  %v5329_v4 = vcombine.low %v5307_v11, %v5314_v1  ;;  %v2309_v61 = vrot.slane %v8077_v40, %v7109_v30 }
 0x1a7   : > { %v2313_v18 = vrot.slane %v8077_v40, %v7112_v31  ;;  %v2317_v38 = vrot.slane %v8077_v40, %v7116_v49  ;;  %v8205_v12 = vadd.f32 %v7088_v35, %v592_v54  ;;  %v5150_v28 = vcombine.low %v2289_v52, %v2293_v5 }
 0x1a8   : > { %6055 = vperm.xlu1 %6647, %v4806_v7   ;;  %v5330_v53 = vcombine.low %v5321_v16, %v5328_v29  ;;  %v5151_v17 = vcombine.low %v2297_v26, %v2301_v14  ;;  %v5337_v41 = vrot.slane %v5329_v4, %v7119_v50  ;;  %v5152_v44 = vcombine.low %v2305_v33, %v2309_v61  ;;  %v601_v14 = vpop.xlane.xlu1 %600 }
 0x1a9   : > { %v5153_v21 = vcombine.low %v2313_v18, %v2317_v38  ;;  %v2449_v25 = vrot.slane %v8109_v6, %v7091_v51  ;;  %v5160_v47 = vrot.slane %v5150_v28, %v7119_v50  ;;  %v2453_v24 = vrot.slane %v8109_v6, %v7094_v58 }
 0x1aa   : > { %v5344_v45 = vrot.slane %v5330_v53, %v7119_v50  ;;  %v5167_v40 = vrot.slane %v5151_v17, %v7119_v50  ;;  %v5174_v42 = vrot.slane %v5152_v44, %v7119_v50  ;;  %v2457_v43 = vrot.slane %v8109_v6, %v7097_v59 }
 0x1ab   : > { %v5181_v39 = vrot.slane %v5153_v21, %v7119_v50  ;;  %v2461_v46 = vrot.slane %v8109_v6, %v7100_v2  ;;  %v2465_v3 = vrot.slane %v8109_v6, %v7106_v20  ;;  %v2469_v37 = vrot.slane %v8109_v6, %v7109_v30 }
 0x1ac   : > { %v5345_v15 = vcombine.low %v5337_v41, %v5344_v45  ;;  %v5182_v19 = vcombine.low %v5160_v47, %v5167_v40  ;;  %v2473_v55 = vrot.slane %v8109_v6, %v7112_v31  ;;  %v2477_v9 = vrot.slane %v8109_v6, %v7116_v49  ;;  %v8256_v40 = vpop.xlane.xlu1 %606 }
 0x1ad   : > { %v5183_v60 = vcombine.low %v5174_v42, %v5181_v39  ;;  %v5395_v62 = vcombine.low %v2449_v25, %v2453_v24  ;;  %v5396_v63 = vcombine.low %v2457_v43, %v2461_v46  ;;  %v5397_v56 = vcombine.low %v2465_v3, %v2469_v37 }
 0x1ae   : > { %6088 = vperm.xlu0 %6646, %v5345_v15   ;;  %v5190_v52 = vrot.slane %v5182_v19, %v7119_v50  ;;  %v2353_v34 = vrot.slane %v8106_v48, %v7091_v51  ;;  %v5398_v11 = vcombine.low %v2473_v55, %v2477_v9  ;;  %v2357_v26 = vrot.slane %v8106_v48, %v7094_v58 }
 0x1af   : > { %v5197_v5 = vrot.slane %v5183_v60, %v7119_v50  ;;  %v5405_v1 = vrot.slane %v5395_v62, %v7119_v50  ;;  %v5412_v6 = vrot.slane %v5396_v63, %v7119_v50  ;;  %v5419_v7 = vrot.slane %v5397_v56, %v7119_v50 }
 0x1b0   : > { %v2361_v16 = vrot.slane %v8106_v48, %v7097_v59  ;;  %v2365_v29 = vrot.slane %v8106_v48, %v7100_v2  ;;  %v5426_v54 = vrot.slane %v5398_v11, %v7119_v50  ;;  %v2369_v4 = vrot.slane %v8106_v48, %v7106_v20 }
 0x1b1   : > { %v5198_v33 = vcombine.low %v5190_v52, %v5197_v5  ;;  %v2373_v61 = vrot.slane %v8106_v48, %v7109_v30  ;;  %v5427_v18 = vcombine.low %v5405_v1, %v5412_v6  ;;  %v2377_v38 = vrot.slane %v8106_v48, %v7112_v31 }
 0x1b2   : > { %v2381_v53 = vrot.slane %v8106_v48, %v7116_v49  ;;  %v5248_v28 = vcombine.low %v2353_v34, %v2357_v26  ;;  %v8252_v17 = vadd.f32 %v7088_v35, %v601_v14  ;;  %v5428_v41 = vcombine.low %v5419_v7, %v5426_v54  ;;  %v8278_v34 = vpop.xlane.xlu1 %612 }
 0x1b3   : > { %6079 = vperm.xlu1 %6647, %v5198_v33   ;;  %v5249_v44 = vcombine.low %v2361_v16, %v2365_v29  ;;  %v5250_v21 = vcombine.low %v2369_v4, %v2373_v61  ;;  %v5435_v25 = vrot.slane %v5427_v18, %v7119_v50  ;;  %v2513_v24 = vrot.slane %v8158_v8, %v7091_v51 }
 0x1b4   : > { %v5251_v45 = vcombine.low %v2377_v38, %v2381_v53  ;;  %v5258_v47 = vrot.slane %v5248_v28, %v7119_v50  ;;  %v5442_v48 = vrot.slane %v5428_v41, %v7119_v50  ;;  %v2517_v43 = vrot.slane %v8158_v8, %v7094_v58  ;;  %v598_v28 = vpop.xlane.xlu0 %597 }
 0x1b5   : > { %v5265_v42 = vrot.slane %v5249_v44, %v7119_v50  ;;  %v5272_v39 = vrot.slane %v5250_v21, %v7119_v50  ;;  %v2521_v15 = vrot.slane %v8158_v8, %v7097_v59  ;;  %v2525_v19 = vrot.slane %v8158_v8, %v7100_v2 }
 0x1b6   : > { %v5279_v46 = vrot.slane %v5251_v45, %v7119_v50  ;;  %v2529_v3 = vrot.slane %v8158_v8, %v7106_v20  ;;  %v5443_v37 = vcombine.low %v5435_v25, %v5442_v48  ;;  %v2533_v55 = vrot.slane %v8158_v8, %v7109_v30  ;;  %v8298_v53 = vpop.xlane.xlu1 %618 }
 0x1b7   : > { %v5280_v60 = vcombine.low %v5258_v47, %v5265_v42  ;;  %v2537_v9 = vrot.slane %v8158_v8, %v7112_v31  ;;  %v2541_v52 = vrot.slane %v8158_v8, %v7116_v49  ;;  %v5493_v63 = vcombine.low %v2513_v24, %v2517_v43 }
 0x1b8   : > { %v5281_v62 = vcombine.low %v5272_v39, %v5279_v46  ;;  %v5494_v56 = vcombine.low %v2521_v15, %v2525_v19  ;;  %6094 = vperm.xlu0 %6646, %v5443_v37   ;;  %v5495_v11 = vcombine.low %v2529_v3, %v2533_v55  ;;  %v2417_v1 = vrot.slane %v8155_v36, %v7091_v51 }
 0x1b9   : > { %v5288_v5 = vrot.slane %v5280_v60, %v7119_v50  ;;  %v2421_v26 = vrot.slane %v8155_v36, %v7094_v58  ;;  %v5496_v6 = vcombine.low %v2537_v9, %v2541_v52  ;;  %v5503_v7 = vrot.slane %v5493_v63, %v7119_v50 }
 0x1ba   : > { %v5295_v14 = vrot.slane %v5281_v62, %v7119_v50  ;;  %v5510_v8 = vrot.slane %v5494_v56, %v7119_v50  ;;  %v5517_v16 = vrot.slane %v5495_v11, %v7119_v50  ;;  %v2425_v29 = vrot.slane %v8155_v36, %v7097_v59  ;;  %v8318_v37 = vpop.permute.xlu1 %5938 }
 0x1bb   : > { %v2429_v33 = vrot.slane %v8155_v36, %v7100_v2  ;;  %v2433_v54 = vrot.slane %v8155_v36, %v7106_v20  ;;  %v5524_v61 = vrot.slane %v5496_v6, %v7119_v50  ;;  %v2437_v38 = vrot.slane %v8155_v36, %v7109_v30 }
 0x1bc   : > { %v5296_v4 = vcombine.low %v5288_v5, %v5295_v14  ;;  %v5525_v18 = vcombine.low %v5503_v7, %v5510_v8  ;;  %v2441_v41 = vrot.slane %v8155_v36, %v7112_v31  ;;  %v2445_v44 = vrot.slane %v8155_v36, %v7116_v49 }
 0x1bd   : > { %v5346_v21 = vcombine.low %v2417_v1, %v2421_v26  ;;  %v5347_v25 = vcombine.low %v2425_v29, %v2429_v33  ;;  %v8305_v45 = vadd.f32 %v7088_v35, %v598_v28  ;;  %v5526_v47 = vcombine.low %v5517_v16, %v5524_v61 }
 0x1be   : > { %6085 = vperm.xlu1 %6647, %v5296_v4   ;;  %v5533_v24 = vrot.slane %v5525_v18, %v7119_v50  ;;  %v5348_v48 = vcombine.low %v2433_v54, %v2437_v38  ;;  %v5349_v42 = vcombine.low %v2441_v41, %v2445_v44  ;;  %v2577_v46 = vrot.slane %v8252_v17, %v7091_v51  ;;  %v604_v4 = vpop.xlane.xlu0 %603  ;;  %v8347_v41 = vpop.permute.xlu1 %5941 }
 0x1bf   : > { %v5356_v39 = vrot.slane %v5346_v21, %v7119_v50  ;;  %v5363_v43 = vrot.slane %v5347_v25, %v7119_v50  ;;  %v5540_v36 = vrot.slane %v5526_v47, %v7119_v50  ;;  %v2581_v19 = vrot.slane %v8252_v17, %v7094_v58 }
 0x1c0   : > { %v5370_v15 = vrot.slane %v5348_v48, %v7119_v50  ;;  %v2585_v3 = vrot.slane %v8252_v17, %v7097_v59  ;;  %v5377_v60 = vrot.slane %v5349_v42, %v7119_v50  ;;  %v2589_v9 = vrot.slane %v8252_v17, %v7100_v2 }
 0x1c1   : > { %v5378_v55 = vcombine.low %v5356_v39, %v5363_v43  ;;  %v2593_v62 = vrot.slane %v8252_v17, %v7106_v20  ;;  %v5541_v52 = vcombine.low %v5533_v24, %v5540_v36  ;;  %v2597_v63 = vrot.slane %v8252_v17, %v7109_v30 }
 0x1c2   : > { %v2601_v56 = vrot.slane %v8252_v17, %v7112_v31  ;;  %v2605_v5 = vrot.slane %v8252_v17, %v7116_v49  ;;  %v5379_v11 = vcombine.low %v5370_v15, %v5377_v60  ;;  %v5591_v26 = vcombine.low %v2577_v46, %v2581_v19 }
 0x1c3   : > { %v5386_v1 = vrot.slane %v5378_v55, %v7119_v50  ;;  %v5592_v14 = vcombine.low %v2585_v3, %v2589_v9  ;;  %6100 = vperm.xlu0 %6646, %v5541_v52   ;;  %v5593_v6 = vcombine.low %v2593_v62, %v2597_v63  ;;  %v2481_v8 = vrot.slane %v8205_v12, %v7091_v51 }
 0x1c4   : > { %v5594_v7 = vcombine.low %v2601_v56, %v2605_v5  ;;  %v2485_v16 = vrot.slane %v8205_v12, %v7094_v58  ;;  %v5393_v29 = vrot.slane %v5379_v11, %v7119_v50  ;;  %v5601_v33 = vrot.slane %v5591_v26, %v7119_v50 }
 0x1c5   : > { %v5608_v17 = vrot.slane %v5592_v14, %v7119_v50  ;;  %v2489_v54 = vrot.slane %v8205_v12, %v7097_v59  ;;  %v5615_v61 = vrot.slane %v5593_v6, %v7119_v50  ;;  %v2493_v38 = vrot.slane %v8205_v12, %v7100_v2 }
 0x1c6   : > { %v5622_v18 = vrot.slane %v5594_v7, %v7119_v50  ;;  %v2497_v28 = vrot.slane %v8205_v12, %v7106_v20  ;;  %v5394_v44 = vcombine.low %v5386_v1, %v5393_v29  ;;  %v2501_v25 = vrot.slane %v8205_v12, %v7109_v30  ;;  %v8372_v1 = vpop.permute.xlu1 %5944 }
 0x1c7   : > { %v5623_v21 = vcombine.low %v5601_v33, %v5608_v17  ;;  %v2505_v47 = vrot.slane %v8205_v12, %v7112_v31  ;;  %v2509_v48 = vrot.slane %v8205_v12, %v7116_v49  ;;  %v5444_v42 = vcombine.low %v2481_v8, %v2485_v16 }
 0x1c8   : > { %v5624_v24 = vcombine.low %v5615_v61, %v5622_v18  ;;  %v5445_v39 = vcombine.low %v2489_v54, %v2493_v38  ;;  %v680_v43 = vadd.f32 %v7088_v35, %v604_v4  ;;  %6091 = vperm.xlu1 %6647, %v5394_v44   ;;  %v5446_v36 = vcombine.low %v2497_v28, %v2501_v25 }
 0x1c9   : > { %v5631_v46 = vrot.slane %v5623_v21, %v7119_v50  ;;  %v2545_v15 = vrot.slane %v8305_v45, %v7091_v51  ;;  %v5447_v3 = vcombine.low %v2505_v47, %v2509_v48  ;;  %v5454_v60 = vrot.slane %v5444_v42, %v7119_v50 }
 0x1ca   : > { %v5638_v19 = vrot.slane %v5624_v24, %v7119_v50  ;;  %v5461_v55 = vrot.slane %v5445_v39, %v7119_v50  ;;  %v5468_v12 = vrot.slane %v5446_v36, %v7119_v50  ;;  %v2549_v9 = vrot.slane %v8305_v45, %v7094_v58 }
 0x1cb   : > { %v2553_v62 = vrot.slane %v8305_v45, %v7097_v59  ;;  %v2557_v52 = vrot.slane %v8305_v45, %v7100_v2  ;;  %v5475_v56 = vrot.slane %v5447_v3, %v7119_v50  ;;  %v2561_v11 = vrot.slane %v8305_v45, %v7106_v20 }
 0x1cc   : > { %v5639_v63 = vcombine.low %v5631_v46, %v5638_v19  ;;  %v5476_v5 = vcombine.low %v5454_v60, %v5461_v55  ;;  %v2565_v26 = vrot.slane %v8305_v45, %v7109_v30  ;;  %v2569_v14 = vrot.slane %v8305_v45, %v7112_v31  ;;  %v8394_v46 = vpop.permute.xlu1 %5947 }
 0x1cd   : > { %v2573_v6 = vrot.slane %v8305_v45, %v7116_v49  ;;  %v5542_v7 = vcombine.low %v2545_v15, %v2549_v9  ;;  %v5477_v8 = vcombine.low %v5468_v12, %v5475_v56  ;;  %v5543_v29 = vcombine.low %v2553_v62, %v2557_v52 }
 0x1ce   : > { %6106 = vperm.xlu0 %6646, %v5639_v63   ;;  %v5484_v16 = vrot.slane %v5476_v5, %v7119_v50  ;;  %v2609_v33 = vrot.slane %v680_v43, %v7091_v51  ;;  %v5544_v17 = vcombine.low %v2561_v11, %v2565_v26  ;;  %v2613_v61 = vrot.slane %v680_v43, %v7094_v58 }
 0x1cf   : > { %v5545_v54 = vcombine.low %v2569_v14, %v2573_v6  ;;  %v5552_v4 = vrot.slane %v5542_v7, %v7119_v50  ;;  %v5491_v18 = vrot.slane %v5477_v8, %v7119_v50  ;;  %v5559_v38 = vrot.slane %v5543_v29, %v7119_v50 }
 0x1d0   : > { %v2617_v45 = vrot.slane %v680_v43, %v7097_v59  ;;  %v2621_v28 = vrot.slane %v680_v43, %v7100_v2  ;;  %v5566_v44 = vrot.slane %v5544_v17, %v7119_v50  ;;  %v2625_v25 = vrot.slane %v680_v43, %v7106_v20  ;;  %v8420_v17 = vpop.permute.xlu1 %5950 }
 0x1d1   : > { %v5573_v21 = vrot.slane %v5545_v54, %v7119_v50  ;;  %v2629_v47 = vrot.slane %v680_v43, %v7109_v30  ;;  %v5492_v24 = vcombine.low %v5484_v16, %v5491_v18  ;;  %v5574_v48 = vcombine.low %v5552_v4, %v5559_v38 }
 0x1d2   : > { %v2633_v42 = vrot.slane %v680_v43, %v7112_v31  ;;  %v2637_v39 = vrot.slane %v680_v43, %v7116_v49  ;;  %v5640_v15 = vcombine.low %v2609_v33, %v2613_v61  ;;  %v5641_v19 = vcombine.low %v2617_v45, %v2621_v28 }
 0x1d3   : > { %v5575_v36 = vcombine.low %v5566_v44, %v5573_v21  ;;  %v5642_v3 = vcombine.low %v2625_v25, %v2629_v47  ;;  %v681_v60 = vadd.f32 %v7088_v35, %v8256_v40  ;;  %6097 = vperm.xlu1 %6647, %v5492_v24   ;;  %v5582_v55 = vrot.slane %v5574_v48, %v7119_v50  ;;  %v610_v21 = vpop.xlane.xlu0 %609 }
 0x1d4   : > { %v5643_v12 = vcombine.low %v2633_v42, %v2637_v39  ;;  %v2097_v9 = vrot.slane %v8022_v10, %v7091_v51  ;;  %v5650_v43 = vrot.slane %v5640_v15, %v7119_v50  ;;  %v5657_v52 = vrot.slane %v5641_v19, %v7119_v50 }
 0x1d5   : > { %v5589_v62 = vrot.slane %v5575_v36, %v7119_v50  ;;  %v5664_v63 = vrot.slane %v5642_v3, %v7119_v50  ;;  %v2101_v40 = vrot.slane %v8022_v10, %v7094_v58  ;;  %v2105_v5 = vrot.slane %v8022_v10, %v7097_v59 }
 0x1d6   : > { %v5671_v56 = vrot.slane %v5643_v12, %v7119_v50  ;;  %v2109_v11 = vrot.slane %v8022_v10, %v7100_v2  ;;  %v5672_v14 = vcombine.low %v5650_v43, %v5657_v52  ;;  %v2113_v6 = vrot.slane %v8022_v10, %v7106_v20  ;;  %v8437_v52 = vpop.permute.xlu1 %5953 }
 0x1d7   : > { %v5590_v26 = vcombine.low %v5582_v55, %v5589_v62  ;;  %v2117_v7 = vrot.slane %v8022_v10, %v7109_v30  ;;  %v2121_v16 = vrot.slane %v8022_v10, %v7112_v31  ;;  %v2125_v29 = vrot.slane %v8022_v10, %v7116_v49 }
 0x1d8   : > { %v5673_v8 = vcombine.low %v5664_v63, %v5671_v56  ;;  %v4856_v33 = vcombine.low %v2097_v9, %v2101_v40  ;;  %v5680_v54 = vrot.slane %v5672_v14, %v7119_v50  ;;  %v4857_v4 = vcombine.low %v2105_v5, %v2109_v11 }
 0x1d9   : > { %6103 = vperm.xlu1 %6647, %v5590_v26   ;;  %v4858_v61 = vcombine.low %v2113_v6, %v2117_v7  ;;  %v2641_v18 = vrot.slane %v681_v60, %v7091_v51  ;;  %v4859_v45 = vcombine.low %v2121_v16, %v2125_v29  ;;  %v2645_v44 = vrot.slane %v681_v60, %v7094_v58 }
 0x1da   : > { %v5687_v38 = vrot.slane %v5673_v8, %v7119_v50  ;;  %v4866_v28 = vrot.slane %v4856_v33, %v7119_v50  ;;  %v4873_v10 = vrot.slane %v4857_v4, %v7119_v50  ;;  %v2649_v47 = vrot.slane %v681_v60, %v7097_v59 }
 0x1db   : > { %v4880_v25 = vrot.slane %v4858_v61, %v7119_v50  ;;  %v2653_v24 = vrot.slane %v681_v60, %v7100_v2  ;;  %v4887_v42 = vrot.slane %v4859_v45, %v7119_v50  ;;  %v2657_v39 = vrot.slane %v681_v60, %v7106_v20 }
 0x1dc   : > { %v5688_v48 = vcombine.low %v5680_v54, %v5687_v38  ;;  %v2661_v36 = vrot.slane %v681_v60, %v7109_v30  ;;  %v4888_v15 = vcombine.low %v4866_v28, %v4873_v10  ;;  %v2665_v19 = vrot.slane %v681_v60, %v7112_v31 }
 0x1dd   : > { %v2669_v3 = vrot.slane %v681_v60, %v7116_v49  ;;  %v5689_v55 = vcombine.low %v2641_v18, %v2645_v44  ;;  %v682_v12 = vadd.f32 %v7088_v35, %v610_v21  ;;  %v4889_v9 = vcombine.low %v4880_v25, %v4887_v42  ;;  %v8464_v25 = vpop.permute.xlu1 %5956 }
 0x1de   : > { %6109 = vperm.xlu0 %6646, %v5688_v48   ;;  %v5690_v62 = vcombine.low %v2649_v47, %v2653_v24  ;;  %v5691_v43 = vcombine.low %v2657_v39, %v2661_v36  ;;  %v4896_v63 = vrot.slane %v4888_v15, %v7119_v50  ;;  %v2129_v5 = vrot.slane %v8019_v32, %v7091_v51  ;;  %v8466_v47 = vpop.xlane.xlu0 %615 }
 0x1df   : > { %v5692_v56 = vcombine.low %v2665_v19, %v2669_v3  ;;  %v5699_v40 = vrot.slane %v5689_v55, %v7119_v50  ;;  %v4903_v11 = vrot.slane %v4889_v9, %v7119_v50  ;;  %v2133_v14 = vrot.slane %v8019_v32, %v7094_v58 }
 0x1e0   : > { %v5706_v60 = vrot.slane %v5690_v62, %v7119_v50  ;;  %v5713_v26 = vrot.slane %v5691_v43, %v7119_v50  ;;  %v2137_v7 = vrot.slane %v8019_v32, %v7097_v59  ;;  %v2141_v8 = vrot.slane %v8019_v32, %v7100_v2 }
 0x1e1   : > { %v5720_v6 = vrot.slane %v5692_v56, %v7119_v50  ;;  %v2145_v16 = vrot.slane %v8019_v32, %v7106_v20  ;;  %v4904_v29 = vcombine.low %v4896_v63, %v4903_v11  ;;  %v2149_v54 = vrot.slane %v8019_v32, %v7109_v30 }
 0x1e2   : > { %v5721_v33 = vcombine.low %v5699_v40, %v5706_v60  ;;  %v2153_v4 = vrot.slane %v8019_v32, %v7112_v31  ;;  %v2157_v18 = vrot.slane %v8019_v32, %v7116_v49  ;;  %v4905_v38 = vcombine.low %v2129_v5, %v2133_v14 }
 0x1e3   : > { %v5722_v61 = vcombine.low %v5713_v26, %v5720_v6  ;;  %v4906_v45 = vcombine.low %v2137_v7, %v2141_v8  ;;  %6061 = vperm.xlu1 %6647, %v4904_v29   ;;  %v4907_v44 = vcombine.low %v2145_v16, %v2149_v54  ;;  %v2673_v21 = vrot.slane %v682_v12, %v7091_v51  ;;  %v8480_v26 = vpop.permute.xlu0 %5935  ;;  %v8486_v16 = vpop.permute.xlu1 %5959 }
 0x1e4   : > { %v5729_v28 = vrot.slane %v5721_v33, %v7119_v50  ;;  %v2677_v10 = vrot.slane %v682_v12, %v7094_v58  ;;  %v4908_v48 = vcombine.low %v2153_v4, %v2157_v18  ;;  %v4915_v42 = vrot.slane %v4905_v38, %v7119_v50 }
 0x1e5   : > { %v5736_v24 = vrot.slane %v5722_v61, %v7119_v50  ;;  %v4922_v32 = vrot.slane %v4906_v45, %v7119_v50  ;;  %v4929_v39 = vrot.slane %v4907_v44, %v7119_v50  ;;  %v2681_v36 = vrot.slane %v682_v12, %v7097_v59 }
 0x1e6   : > { %v2685_v15 = vrot.slane %v682_v12, %v7100_v2  ;;  %v2689_v19 = vrot.slane %v682_v12, %v7106_v20  ;;  %v4936_v55 = vrot.slane %v4908_v48, %v7119_v50  ;;  %v2693_v62 = vrot.slane %v682_v12, %v7109_v30 }
 0x1e7   : > { %v5737_v3 = vcombine.low %v5729_v28, %v5736_v24  ;;  %v4937_v9 = vcombine.low %v4915_v42, %v4922_v32  ;;  %v2697_v43 = vrot.slane %v682_v12, %v7112_v31  ;;  %v2701_v63 = vrot.slane %v682_v12, %v7116_v49 }
 0x1e8   : > { %v5738_v56 = vcombine.low %v2673_v21, %v2677_v10  ;;  %v5739_v40 = vcombine.low %v2681_v36, %v2685_v15  ;;  %v4938_v5 = vcombine.low %v4929_v39, %v4936_v55  ;;  %v5740_v60 = vcombine.low %v2689_v19, %v2693_v62  ;;  %v8507_v21 = vpop.permute.xlu0 %5962 }
 0x1e9   : > { %6112 = vperm.xlu0 %6646, %v5737_v3   ;;  %v4945_v11 = vrot.slane %v4937_v9, %v7119_v50  ;;  %v683_v14 = vadd.f32 %v7088_v35, %v8278_v34  ;;  %v5741_v6 = vcombine.low %v2697_v43, %v2701_v63  ;;  %v2161_v33 = vrot.slane %v8049_v22, %v7091_v51  ;;  %v8518_v9 = vpop.permute.xlu1 %5965 }
 0x1ea   : > { %v5748_v7 = vrot.slane %v5738_v56, %v7119_v50  ;;  %v5755_v8 = vrot.slane %v5739_v40, %v7119_v50  ;;  %v4952_v12 = vrot.slane %v4938_v5, %v7119_v50  ;;  %v5762_v29 = vrot.slane %v5740_v60, %v7119_v50 }
 0x1eb   : > { %v2165_v54 = vrot.slane %v8049_v22, %v7094_v58  ;;  %v5769_v4 = vrot.slane %v5741_v6, %v7119_v50  ;;  %v2169_v61 = vrot.slane %v8049_v22, %v7097_v59  ;;  %v2173_v18 = vrot.slane %v8049_v22, %v7100_v2 }
 0x1ec   : > { %v5770_v34 = vcombine.low %v5748_v7, %v5755_v8  ;;  %v8501_v38 = vadd.f32 %v7088_v35, %v7971_v23  ;;  %v4953_v45 = vcombine.low %v4945_v11, %v4952_v12  ;;  %v2177_v28 = vrot.slane %v8049_v22, %v7106_v20  ;;  %v8529_v12 = vpop.permute.xlu0 %5968 }
 0x1ed   : > { %v2181_v44 = vrot.slane %v8049_v22, %v7109_v30  ;;  %v5771_v10 = vcombine.low %v5762_v29, %v5769_v4  ;;  %v2185_v48 = vrot.slane %v8049_v22, %v7112_v31  ;;  %v2189_v42 = vrot.slane %v8049_v22, %v7116_v49 }
 0x1ee   : > { %v5778_v24 = vrot.slane %v5770_v34, %v7119_v50  ;;  %6064 = vperm.xlu1 %6647, %v4953_v45   ;;  %v4954_v23 = vcombine.low %v2161_v33, %v2165_v54  ;;  %v4955_v32 = vcombine.low %v2169_v61, %v2173_v18  ;;  %v2705_v36 = vrot.slane %v683_v14, %v7091_v51 }
 0x1ef   : > { %v4956_v39 = vcombine.low %v2177_v28, %v2181_v44  ;;  %v5785_v15 = vrot.slane %v5771_v10, %v7119_v50  ;;  %v4957_v19 = vcombine.low %v2185_v48, %v2189_v42  ;;  %v2709_v3 = vrot.slane %v683_v14, %v7094_v58  ;;  %v8538_v44 = vpop.permute.xlu1 %5971 }
 0x1f0   : > { %v2713_v55 = vrot.slane %v683_v14, %v7097_v59  ;;  %v4964_v62 = vrot.slane %v4954_v23, %v7119_v50  ;;  %v4971_v43 = vrot.slane %v4955_v32, %v7119_v50  ;;  %v2717_v63 = vrot.slane %v683_v14, %v7100_v2 }
 0x1f1   : > { %v4978_v22 = vrot.slane %v4956_v39, %v7119_v50  ;;  %v5786_v56 = vcombine.low %v5778_v24, %v5785_v15  ;;  %v4985_v40 = vrot.slane %v4957_v19, %v7119_v50  ;;  %v2721_v5 = vrot.slane %v683_v14, %v7106_v20 }
 0x1f2   : > { %v2725_v11 = vrot.slane %v683_v14, %v7109_v30  ;;  %v4986_v60 = vcombine.low %v4964_v62, %v4971_v43  ;;  %v2729_v6 = vrot.slane %v683_v14, %v7112_v31  ;;  %v2733_v7 = vrot.slane %v683_v14, %v7116_v49 }
 0x1f3   : > { %v5787_v8 = vcombine.low %v2705_v36, %v2709_v3  ;;  %6115 = vperm.xlu0 %6646, %v5786_v56   ;;  %v4987_v29 = vcombine.low %v4978_v22, %v4985_v40  ;;  %v5788_v33 = vcombine.low %v2713_v55, %v2717_v63  ;;  %v684_v18 = vadd.f32 %v7088_v35, %v8466_v47  ;;  %v8555_v3 = vpop.permute.xlu0 %5974 }
 0x1f4   : > { %v5789_v54 = vcombine.low %v2721_v5, %v2725_v11  ;;  %v4994_v4 = vrot.slane %v4986_v60, %v7119_v50  ;;  %v5790_v34 = vcombine.low %v2729_v6, %v2733_v7  ;;  %v2193_v24 = vrot.slane %v8501_v38, %v7091_v51  ;;  %v8567_v7 = vpop.permute.xlu1 %5977 }
 0x1f5   : > { %v5797_v61 = vrot.slane %v5787_v8, %v7119_v50  ;;  %v5001_v45 = vrot.slane %v4987_v29, %v7119_v50  ;;  %v5804_v28 = vrot.slane %v5788_v33, %v7119_v50  ;;  %v2197_v48 = vrot.slane %v8501_v38, %v7094_v58 }
 0x1f6   : > { %v5811_v14 = vrot.slane %v5789_v54, %v7119_v50  ;;  %v5818_v10 = vrot.slane %v5790_v34, %v7119_v50  ;;  %v2201_v42 = vrot.slane %v8501_v38, %v7097_v59  ;;  %v2205_v32 = vrot.slane %v8501_v38, %v7100_v2 }
 0x1f7   : > { %v5002_v47 = vcombine.low %v4994_v4, %v5001_v45  ;;  %v5819_v23 = vcombine.low %v5797_v61, %v5804_v28  ;;  %v2209_v36 = vrot.slane %v8501_v38, %v7106_v20  ;;  %v2213_v15 = vrot.slane %v8501_v38, %v7109_v30 }
 0x1f8   : > { %v5820_v39 = vcombine.low %v5811_v14, %v5818_v10  ;;  %v2217_v19 = vrot.slane %v8501_v38, %v7112_v31  ;;  %v668_v55 = vadd.f32 %v7088_v35, %v8042_v57  ;;  %v2221_v43 = vrot.slane %v8501_v38, %v7116_v49 }
 0x1f9   : > { %6067 = vperm.xlu1 %6647, %v5002_v47   ;;  %v5827_v62 = vrot.slane %v5819_v23, %v7119_v50  ;;  %v5003_v22 = vcombine.low %v2193_v24, %v2197_v48  ;;  %v5004_v56 = vcombine.low %v2201_v42, %v2205_v32  ;;  %v5005_v40 = vcombine.low %v2209_v36, %v2213_v15  ;;  %v8577_v24 = vpop.permute.xlu0 %5980 }
 0x1fa   : > { %v5834_v63 = vrot.slane %v5820_v39, %v7119_v50  ;;  %v2737_v5 = vrot.slane %v684_v18, %v7091_v51  ;;  %v5006_v11 = vcombine.low %v2217_v19, %v2221_v43  ;;  %v2741_v6 = vrot.slane %v684_v18, %v7094_v58  ;;  %8966 = vst [vmem:[#allocation7_spill] sm:$0xff] %v8577_v24 }
 0x1fb   : > { %v5013_v60 = vrot.slane %v5003_v22, %v7119_v50  ;;  %v2745_v57 = vrot.slane %v684_v18, %v7097_v59  ;;  %v5020_v29 = vrot.slane %v5004_v56, %v7119_v50  ;;  %v5027_v38 = vrot.slane %v5005_v40, %v7119_v50 }
 0x1fc   : > { %v5835_v8 = vcombine.low %v5827_v62, %v5834_v63  ;;  %v2749_v33 = vrot.slane %v684_v18, %v7100_v2  ;;  %v5034_v54 = vrot.slane %v5006_v11, %v7119_v50  ;;  %v2753_v4 = vrot.slane %v684_v18, %v7106_v20  ;;  %v8587_v62 = vpop.permute.xlu1 %5983 }
 0x1fd   : > { %v2757_v34 = vrot.slane %v684_v18, %v7109_v30  ;;  %v2761_v61 = vrot.slane %v684_v18, %v7112_v31  ;;  %v5035_v45 = vcombine.low %v5013_v60, %v5020_v29  ;;  %v2765_v28 = vrot.slane %v684_v18, %v7116_v49 }
 0x1fe   : > { %6118 = vperm.xlu0 %6646, %v5835_v8   ;;  %v5836_v14 = vcombine.low %v2737_v5, %v2741_v6  ;;  %v5837_v10 = vcombine.low %v2745_v57, %v2749_v33  ;;  %v5036_v48 = vcombine.low %v5027_v38, %v5034_v54  ;;  %v685_v36 = vadd.f32 %v7088_v35, %v8298_v53  ;;  %v8597_v8 = vpop.permute.xlu0 %5986 }
 0x1ff   : > { %v5838_v42 = vcombine.low %v2753_v4, %v2757_v34  ;;  %v5043_v47 = vrot.slane %v5035_v45, %v7119_v50  ;;  %v5839_v23 = vcombine.low %v2761_v61, %v2765_v28  ;;  %v2225_v19 = vrot.slane %v668_v55, %v7091_v51 }
 0x200   : > { %v5846_v32 = vrot.slane %v5836_v14, %v7119_v50  ;;  %v5853_v39 = vrot.slane %v5837_v10, %v7119_v50  ;;  %v5050_v15 = vrot.slane %v5036_v48, %v7119_v50  ;;  %v2229_v63 = vrot.slane %v668_v55, %v7094_v58 }
 0x201   : > { %v5860_v18 = vrot.slane %v5838_v42, %v7119_v50  ;;  %v5867_v43 = vrot.slane %v5839_v23, %v7119_v50  ;;  %v2233_v56 = vrot.slane %v668_v55, %v7097_v59  ;;  %v2237_v5 = vrot.slane %v668_v55, %v7100_v2 }
 0x202   : > { %v5868_v22 = vcombine.low %v5846_v32, %v5853_v39  ;;  %v5051_v40 = vcombine.low %v5043_v47, %v5050_v15  ;;  %v2241_v53 = vrot.slane %v668_v55, %v7106_v20  ;;  %v2245_v6 = vrot.slane %v668_v55, %v7109_v30 }
 0x203   : > { %v5869_v11 = vcombine.low %v5860_v18, %v5867_v43  ;;  %v2249_v57 = vrot.slane %v668_v55, %v7112_v31  ;;  %v669_v29 = vadd.f32 %v7088_v35, %v8000_v0  ;;  %v2253_v38 = vrot.slane %v668_v55, %v7116_v49  ;;  %v8608_v35 = vpop.permute.xlu1 %5989 }
 0x204   : > { %v5876_v60 = vrot.slane %v5868_v22, %v7119_v50  ;;  %6070 = vperm.xlu1 %6647, %v5051_v40   ;;  %v5052_v33 = vcombine.low %v2225_v19, %v2229_v63  ;;  %v5053_v54 = vcombine.low %v2233_v56, %v2237_v5  ;;  %v5054_v34 = vcombine.low %v2241_v53, %v2245_v6  ;;  %v8617_v22 = vpop.permute.xlu0 %5992 }
 0x205   : > { %v5883_v4 = vrot.slane %v5869_v11, %v7119_v50  ;;  %v2769_v61 = vrot.slane %v685_v36, %v7091_v51  ;;  %v2773_v45 = vrot.slane %v685_v36, %v7094_v58  ;;  %v5055_v28 = vcombine.low %v2249_v57, %v2253_v38 }
 0x206   : > { %v5062_v14 = vrot.slane %v5052_v33, %v7119_v50  ;;  %v5069_v10 = vrot.slane %v5053_v54, %v7119_v50  ;;  %v2777_v48 = vrot.slane %v685_v36, %v7097_v59  ;;  %v5076_v55 = vrot.slane %v5054_v34, %v7119_v50 }
 0x207   : > { %v5884_v0 = vcombine.low %v5876_v60, %v5883_v4  ;;  %v2781_v42 = vrot.slane %v685_v36, %v7100_v2  ;;  %v2785_v47 = vrot.slane %v685_v36, %v7106_v20  ;;  %v5083_v23 = vrot.slane %v5055_v28, %v7119_v50  ;;  %v8626_v38 = vpop.permute.xlu1 %5995 }
 0x208   : > { %v5084_v32 = vcombine.low %v5062_v14, %v5069_v10  ;;  %v2789_v39 = vrot.slane %v685_v36, %v7109_v30  ;;  %v2793_v15 = vrot.slane %v685_v36, %v7112_v31  ;;  %v2797_v18 = vrot.slane %v685_v36, %v7116_v49 }
 0x209   : > { %6121 = vperm.xlu0 %6646, %v5884_v0   ;;  %v5885_v19 = vcombine.low %v2769_v61, %v2773_v45  ;;  %v5886_v43 = vcombine.low %v2777_v48, %v2781_v42  ;;  %v5085_v63 = vcombine.low %v5076_v55, %v5083_v23  ;;  %v2257_v57 = vrot.slane %v669_v29, %v7091_v51 }
 0x20a   : > { %v5092_v56 = vrot.slane %v5084_v32, %v7119_v50  ;;  %v5887_v40 = vcombine.low %v2785_v47, %v2789_v39  ;;  %v5888_v5 = vcombine.low %v2793_v15, %v2797_v18  ;;  %v2261_v36 = vrot.slane %v669_v29, %v7094_v58  ;;  %v8635_v58 = vpop.permute.xlu0 %5998 }
 0x20b   : > { %v5895_v53 = vrot.slane %v5885_v19, %v7119_v50  ;;  %v5902_v11 = vrot.slane %v5886_v43, %v7119_v50  ;;  %v5099_v60 = vrot.slane %v5085_v63, %v7119_v50  ;;  %v2265_v4 = vrot.slane %v669_v29, %v7097_v59  ;;  %v8642_v23 = vpop.permute.xlu1 %6001 }
 0x20c   : > { %v5909_v6 = vrot.slane %v5887_v40, %v7119_v50  ;;  %v5916_v33 = vrot.slane %v5888_v5, %v7119_v50  ;;  %v2269_v61 = vrot.slane %v669_v29, %v7100_v2  ;;  %v2273_v45 = vrot.slane %v669_v29, %v7106_v20 }
 0x20d   : > { %v5917_v54 = vcombine.low %v5895_v53, %v5902_v11  ;;  %v5100_v34 = vcombine.low %v5092_v56, %v5099_v60  ;;  %v2277_v28 = vrot.slane %v669_v29, %v7109_v30  ;;  %v2281_v51 = vrot.slane %v669_v29, %v7112_v31 }
 0x20e   : > { %v5918_v14 = vcombine.low %v5909_v6, %v5916_v33  ;;  %v2285_v48 = vrot.slane %v669_v29, %v7116_v49  ;;  %v5101_v0 = vcombine.low %v2257_v57, %v2261_v36  ;;  %v5102_v55 = vcombine.low %v2265_v4, %v2269_v61  ;;  %v8645_v49 = vpop.permute.xlu0 %6004 }
 0x20f   : > { %v5925_v10 = vrot.slane %v5917_v54, %v7119_v50  ;;  %6073 = vperm.xlu1 %6647, %v5100_v34   ;;  %v5103_v59 = vcombine.low %v2273_v45, %v2277_v28  ;;  %v8649_v19 = vpop.permute.xlu1 %6007  ;;  %v6127_v43 = vand.u32 127, %v8958_v13 }
 0x210   : > { %v5932_v42 = vrot.slane %v5918_v14, %v7119_v50  ;;  %v5104_v2 = vcombine.low %v2281_v51, %v2285_v48  ;;  %v5111_v20 = vrot.slane %v5101_v0, %v7119_v50  ;;  %v5118_v30 = vrot.slane %v5102_v55, %v7119_v50 }
 0x211   : > { %v5125_v47 = vrot.slane %v5103_v59, %v7119_v50  ;;  %v6132_v56 = vadd.s32 4294967288, %v6127_v43  ;;  %v6139_v5 = vadd.s32 4294967280, %v6127_v43  ;;  %v6146_v53 = vadd.s32 4294967272, %v6127_v43 }
 0x212   : > { %v5933_v31 = vcombine.low %v5925_v10, %v5932_v42  ;;  %v5132_v32 = vrot.slane %v5104_v2, %v7119_v50  ;;  %v5133_v39 = vcombine.low %v5111_v20, %v5118_v30  ;;  %v8652_v40 = vpop.permute.xlu0 %6010  ;;  %v6153_v11 = vadd.s32 4294967264, %v6127_v43 }
 0x213   : > { %v6188_v60 = vadd.s32 4294967224, %v6127_v43  ;;  %v8655_v6 = vsub.s32 %v6127_v43, %v7086_v27  ;;  %v8657_v57 = vpop.permute.xlu1 %6013  ;;  %v8660_v36 = vsub.s32 %v6132_v56, %v7086_v27  ;;  %v6167_v33 = vadd.s32 4294967248, %v6127_v43 }
 0x214   : > { %6124 = vperm.xlu0 %6646, %v5933_v31   ;;  %v5134_v29 = vcombine.low %v5125_v47, %v5132_v32  ;;  %v5141_v15 = vrot.slane %v5133_v39, %v7119_v50  ;;  %v8663_v54 = vsub.s32 %v6139_v5, %v7086_v27  ;;  %v8666_v4 = vsub.s32 %v6146_v53, %v7086_v27 }
 0x215   : > { %v6160_v34 = vadd.s32 4294967256, %v6127_v43  ;;  %v8669_v61 = vsub.s32 %v6153_v11, %v7086_v27  ;;  %v8672_v45 = vsub.s32 %v6188_v60, %v7086_v27  ;;  %v6181_v28 = vadd.s32 4294967232, %v6127_v43 }
 0x216   : > { %v5148_v18 = vrot.slane %v5134_v29, %v7119_v50  ;;  %v6017_v14 = vpop.permute.xlu0 %6016  ;;  %v6202_v10 = vadd.s32 4294967208, %v6127_v43  ;;  %v6174_v51 = vadd.s32 4294967240, %v6127_v43  ;;  %v6244_v48 = vrot.slane %v8597_v8, %v8660_v36 }
 0x217   : > { %v6240_v0 = vrot.slane %v8587_v62, %v8655_v6  ;;  %v8679_v55 = vsub.s32 %v6167_v33, %v7086_v27  ;;  %v6195_v59 = vadd.s32 4294967216, %v6127_v43  ;;  %v6249_v42 = vrot.slane %v8608_v35, %v8663_v54  ;;  %v6020_v62 = vpop.permute.xlu1 %6019 }
 0x218   : > { %v5149_v63 = vcombine.low %v5141_v15, %v5148_v18  ;;  %v8684_v2 = vsub.s32 %v6160_v34, %v7086_v27  ;;  %v6254_v20 = vrot.slane %v8617_v22, %v8666_v4  ;;  %v6259_v8 = vrot.slane %v8626_v38, %v8669_v61 }
 0x219   : > { %v6245_v30 = vsel %vm6137_vm1, %v6244_v48, %v6240_v0  ;;  %v8692_v47 = vsub.s32 %v6181_v28, %v7086_v27  ;;  %v6209_v31 = vadd.s32 4294967200, %v6127_v43  ;;  %v6269_v35 = vrot.slane %v8642_v23, %v8679_v55 }
 0x21a   : > { %6076 = vperm.xlu1 %6647, %v5149_v63   ;;  %v6250_v32 = vsel %vm6144_vm2, %v6249_v42, %v6245_v30  ;;  %v8698_v39 = vsub.s32 %v6202_v10, %v7086_v27  ;;  %v8701_v22 = vsub.s32 %v6174_v51, %v7086_v27  ;;  %v6264_v29 = vrot.slane %v8635_v58, %v8684_v2  ;;  %v6023_v56 = vpop.permute.xlu0 %6022 }
 0x21b   : > { %v6255_v38 = vsel %vm6151_vm3, %v6254_v20, %v6250_v32  ;;  %v8707_v15 = vsub.s32 %v6195_v59, %v7086_v27  ;;  %v6223_v18 = vadd.s32 4294967184, %v6127_v43  ;;  %v6279_v23 = vrot.slane %v8649_v19, %v8692_v47  ;;  %v6026_v10 = vpop.permute.xlu1 %6025 }
 0x21c   : > { %v6260_v63 = vsel %vm6158_vm4, %v6259_v8, %v6255_v38  ;;  %v6216_v5 = vadd.s32 4294967192, %v6127_v43  ;;  %v6274_v53 = vrot.slane %v8645_v49, %v8701_v22  ;;  %v8716_v58 = vsub.s32 %v6209_v31, %v7086_v27 }
 0x21d   : > { %v6265_v11 = vsel %vm6165_vm5, %v6264_v29, %v6260_v63  ;;  %v6289_v33 = vrot.slane %v8657_v57, %v8707_v15  ;;  %v6230_v34 = vadd.s32 4294967176, %v6127_v43  ;;  %v6284_v19 = vrot.slane %v8652_v40, %v8672_v45 }
 0x21e   : > { %v6270_v60 = vsel %vm6172_vm6, %v6269_v35, %v6265_v11  ;;  %v8725_v49 = vsub.s32 %v6223_v18, %v7086_v27  ;;  %v6299_v48 = vrot.slane %v6020_v62, %v8716_v58  ;;  %v8730_v0 = vsub.s32 %v6216_v5, %v7086_v27  ;;  %v6029_v40 = vpop.permute.xlu0 %6028 }
 0x21f   : > { %v6275_v28 = vsel %vm6179_vm7, %v6274_v53, %v6270_v60  ;;  %v6294_v43 = vrot.slane %v6017_v14, %v8698_v39  ;;  %v8737_v20 = vsub.s32 %v6230_v34, %v7086_v27  ;;  %v6032_v29 = vpop.permute.xlu1 %6031  ;;  %v6157_v50 = vrot.slane %v8394_v46, %v8669_v61 }
 0x220   : > { %v6280_v51 = vsel %vm6186_vm8, %v6279_v23, %v6275_v28  ;;  %v6309_v42 = vrot.slane %v6026_v10, %v8725_v49  ;;  %v6304_v30 = vrot.slane %v6023_v56, %v8730_v0 }
 0x221   : > { %v6285_v57 = vsel %vm6193_vm9, %v6284_v19, %v6280_v51  ;;  %8967 = vst [vmem:[#allocation8_spill] sm:$0xff] %v8737_v20  ;;  %v6314_v14 = vrot.slane %v6029_v40, %v8737_v20 }
 0x222   : > { %v6290_v59 = vsel %vm6200_vm10, %v6289_v33, %v6285_v57  ;;  %v6035_v27 = vpop.permute.xlu0 %6034 }
 0x223   : > { %v6295_v8 = vsel %vm6207_vm11, %v6294_v43, %v6290_v59  ;;  %v6038_v18 = vpop.permute.xlu1 %6037 }
 0x224   : > { %v6300_v62 = vsel %vm6214_vm12, %v6299_v48, %v6295_v8 }
 0x225   : > { %v6305_v31 = vsel %vm6221_vm13, %v6304_v30, %v6300_v62  ;;  %v6136_v30 = vrot.slane %v8318_v37, %v8660_v36  ;;  %v6143_v62 = vrot.slane %v8347_v41, %v8663_v54  ;;  %v6164_v41 = vrot.slane %v8420_v17, %v8684_v2 }
 0x226   : > { %v6310_v32 = vsel %vm6228_vm14, %v6309_v42, %v6305_v31  ;;  %v8748_v38 = vpop.permute.xlu0 %6040  ;;  %v6131_v31 = vrot.slane %v8480_v26, %v8655_v6  ;;  %v6323_v17 = vrot.slane %v6035_v27, %v8660_v36 }
 0x227   : > { %v8746_v35 = vsel %vm6235_vm15, %v6314_v14, %v6310_v32  ;;  %v8752_v56 = vpop.permute.xlu1 %6043  ;;  %v6150_v32 = vrot.slane %v8372_v1, %v8666_v4  ;;  %v6328_v1 = vrot.slane %v6038_v18, %v8663_v54  ;;  %v6185_v18 = vrot.slane %v8486_v16, %v8692_v47 }
 0x228   : > { %8968 = vst [vmem:[#allocation9_spill] sm:$0xff] %v8746_v35  ;;  %v6138_v37 = vsel %vm6137_vm1, %v6136_v30, %v6131_v31  ;;  %v6171_v30 = vrot.slane %v8437_v52, %v8679_v55  ;;  %v6333_v16 = vrot.slane %v8748_v38, %v8666_v4 }
 0x229   : > { %v6145_v26 = vsel %vm6144_vm2, %v6143_v62, %v6138_v37  ;;  %v6192_v62 = vrot.slane %v8507_v21, %v8672_v45 }
 0x22a   : > { %v8750_v63 = vpop.permute.xlu0 %6046  ;;  %v6152_v20 = vsel %vm6151_vm3, %v6150_v32, %v6145_v26 }
 0x22b   : > { %v8756_v5 = vpop.permute.xlu1 %6049 }
 0x22e   : > { %v8754_v23 = vpop.permute.xlu0 %6052 }
 0x22f   : > { %v8760_v11 = vpop.permute.xlu1 %6055 }
 0x232   : > { %v8758_v53 = vpop.permute.xlu0 %6058 }
 0x233   : > { %v6080_v33 = vpop.permute.xlu1 %6079 }
 0x234   : > { %v6398_v8 = vrot.slane %v6080_v33, %v8655_v6  ;;  %v6319_v33 = vrot.slane %v6032_v29, %v8655_v6 }
 0x236   : > { %v6083_v60 = vpop.permute.xlu0 %6082 }
 0x237   : > { %v6402_v13 = vrot.slane %v6083_v60, %v8660_v36  ;;  %v6338_v36 = vrot.slane %v8752_v56, %v8669_v61 }
 0x23a   : > { %v6089_v34 = vpop.permute.xlu0 %6088 }
 0x23b   : > { %v6412_v6 = vrot.slane %v6089_v34, %v8666_v4  ;;  %v6348_v4 = vrot.slane %v8756_v5, %v8679_v55 }
 0x23d   : > { %v6086_v19 = vpop.permute.xlu1 %6085 }
 0x23e   : > { %v6095_v28 = vpop.permute.xlu0 %6094  ;;  %v6407_v14 = vrot.slane %v6086_v19, %v8663_v54  ;;  %v6403_v19 = vsel %vm6137_vm1, %v6402_v13, %v6398_v8  ;;  %v6159_v13 = vsel %vm6158_vm4, %v6157_v50, %v6152_v20  ;;  %v6178_v54 = vrot.slane %v8464_v25, %v8701_v22 }
 0x23f   : > { %v6166_v29 = vsel %vm6165_vm5, %v6164_v41, %v6159_v13  ;;  %v6422_v34 = vrot.slane %v6095_v28, %v8684_v2  ;;  %v6343_v28 = vrot.slane %v8750_v63, %v8684_v2 }
 0x240   : > { %v6408_v60 = vsel %vm6144_vm2, %v6407_v14, %v6403_v19  ;;  %v6173_v25 = vsel %vm6172_vm6, %v6171_v30, %v6166_v29 }
 0x241   : > { %v6413_v8 = vsel %vm6151_vm3, %v6412_v6, %v6408_v60  ;;  %v6180_v14 = vsel %vm6179_vm7, %v6178_v54, %v6173_v25 }
 0x242   : > { %v6101_v51 = vpop.permute.xlu0 %6100 }
 0x243   : > { %v6432_v37 = vrot.slane %v6101_v51, %v8701_v22  ;;  %v6206_v51 = vrot.slane %v8529_v12, %v8698_v39 }
 0x247   : > { %v6092_v10 = vpop.permute.xlu1 %6091 }
 0x248   : > { %v6417_v24 = vrot.slane %v6092_v10, %v8669_v61  ;;  %v6324_v10 = vsel %vm6137_vm1, %v6323_v17, %v6319_v33  ;;  %v6187_v61 = vsel %vm6186_vm8, %v6185_v18, %v6180_v14 }
 0x249   : > { %v6329_v52 = vsel %vm6144_vm2, %v6328_v1, %v6324_v10  ;;  %v6353_v1 = vrot.slane %v8754_v23, %v8701_v22  ;;  %v8969_v10 = vld [vmem:[#allocation8_spill] sm:$0xff] }
 0x24a   : > { %v6418_v27 = vsel %vm6158_vm4, %v6417_v24, %v6413_v8  ;;  %v6199_v24 = vrot.slane %v8518_v9, %v8707_v15  ;;  %v6334_v56 = vsel %vm6151_vm3, %v6333_v16, %v6329_v52  ;;  %v6194_v9 = vsel %vm6193_vm9, %v6192_v62, %v6187_v61  ;;  %v8971_v62 = vld [vmem:[#allocation9_spill] sm:$0xff] }
 0x24b   : > { %v6339_v32 = vsel %vm6158_vm4, %v6338_v36, %v6334_v56 }
 0x24c   : > { %v6201_v33 = vsel %vm6200_vm10, %v6199_v24, %v6194_v9  ;;  %v6344_v19 = vsel %vm6165_vm5, %v6343_v28, %v6339_v32  ;;  %v8972_v32 = vld [vmem:[#allocation6_spill] sm:$0xff]  ;;  %v8973_v28 = vlaneseq }
 0x24d   : > { %v8762_v43 = vpop.permute.xlu0 %6106  ;;  %v6349_v5 = vsel %vm6172_vm6, %v6348_v4, %v6344_v19  ;;  %v6208_v30 = vsel %vm6207_vm11, %v6206_v51, %v6201_v33 }
 0x24e   : > { %v6442_v60 = vrot.slane %v8762_v43, %v8672_v45  ;;  %v6354_v17 = vsel %vm6179_vm7, %v6353_v1, %v6349_v5  ;;  %v6220_v43 = vrot.slane %v8555_v3, %v8730_v0  ;;  %vm6501_vm0 = vcmp.lt.s32.totalorder %v8973_v28, 512 }
 0x252   : > { %v6098_v48 = vpop.permute.xlu1 %6097 }
 0x253   : > { %v6427_v50 = vrot.slane %v6098_v48, %v8679_v55  ;;  %v6423_v48 = vsel %vm6165_vm5, %v6422_v34, %v6418_v27  ;;  %v6213_v55 = vrot.slane %v8538_v44, %v8716_v58  ;;  %v6227_v44 = vrot.slane %v8567_v7, %v8725_v49 }
 0x254   : > { %v6363_v7 = vrot.slane %v8758_v53, %v8672_v45 }
 0x255   : > { %v6428_v38 = vsel %vm6172_vm6, %v6427_v50, %v6423_v48 }
 0x256   : > { %v6433_v26 = vsel %vm6179_vm7, %v6432_v37, %v6428_v38 }
 0x258   : > { %v8764_v57 = vpop.permute.xlu1 %6103 }
 0x259   : > { %v6437_v21 = vrot.slane %v8764_v57, %v8692_v47  ;;  %v6358_v57 = vrot.slane %v8760_v11, %v8692_v47  ;;  %v6215_v11 = vsel %vm6214_vm12, %v6213_v55, %v6208_v30 }
 0x25a   : > { %v6222_v3 = vsel %vm6221_vm13, %v6220_v43, %v6215_v11 }
 0x25b   : > { %v6438_v2 = vsel %vm6186_vm8, %v6437_v21, %v6433_v26  ;;  %v6359_v6 = vsel %vm6186_vm8, %v6358_v57, %v6354_v17 }
 0x25c   : > { %v6443_v47 = vsel %vm6193_vm9, %v6442_v60, %v6438_v2  ;;  %v6364_v18 = vsel %vm6193_vm9, %v6363_v7, %v6359_v6 }
 0x25d   : > { %v8766_v40 = vpop.permute.xlu0 %6109 }
 0x25e   : > { %v6447_v12 = vrot.slane %v8766_v40, %v8707_v15 }
 0x260   : > { %v6448_v29 = vsel %vm6200_vm10, %v6447_v12, %v6443_v47 }
 0x262   : > { %v8768_v59 = vpop.permute.xlu1 %6061 }
 0x263   : > { %v6368_v22 = vrot.slane %v8768_v59, %v8707_v15 }
 0x268   : > { %v8770_v42 = vpop.permute.xlu0 %6112 }
 0x269   : > { %v6452_v13 = vrot.slane %v8770_v42, %v8698_v39  ;;  %v6229_v42 = vsel %vm6228_vm14, %v6227_v44, %v6222_v3 }
 0x26b   : > { %v6453_v52 = vsel %vm6207_vm11, %v6452_v13, %v6448_v29 }
 0x26d   : > { %v8785_v35 = vpop.permute.xlu1 %6064 }
 0x26e   : > { %v6373_v54 = vrot.slane %v8785_v35, %v8698_v39  ;;  %v6369_v39 = vsel %vm6200_vm10, %v6368_v22, %v6364_v18 }
 0x270   : > { %v6374_v36 = vsel %vm6207_vm11, %v6373_v54, %v6369_v39 }
 0x272   : > { %v8796_v46 = vpop.permute.xlu0 %6115 }
 0x273   : > { %v6457_v40 = vrot.slane %v8796_v46, %v8716_v58 }
 0x278   : > { %v8816_v20 = vpop.permute.xlu1 %6067 }
 0x279   : > { %v6378_v15 = vrot.slane %v8816_v20, %v8716_v58  ;;  %v8970_v58 = vld [vmem:[#allocation7_spill] sm:$0xff] }
 0x27a   : > { %v6234_v8 = vrot.slane %v8970_v58, %v8969_v10 }
 0x27b   : > { %v6379_v50 = vsel %vm6214_vm12, %v6378_v15, %v6374_v36 }
 0x27c   : > { %v6236_v25 = vsel %vm6235_vm15, %v6234_v8, %v6229_v42 }
 0x27d   : > { %v6119_v31 = vpop.permute.xlu0 %6118  ;;  %v6474_v14 = vcombine.low %v6236_v25, %v8971_v62 }
 0x27e   : > { %v6462_v45 = vrot.slane %v6119_v31, %v8730_v0 }
 0x27f   : > { %v6482_v4 = vrot.slane %v6474_v14, %v8972_v32 }
 0x283   : > { %v6071_v41 = vpop.permute.xlu1 %6070 }
 0x284   : > { %v6383_v53 = vrot.slane %v6071_v41, %v8730_v0  ;;  %v6458_v0 = vsel %vm6214_vm12, %v6457_v40, %v6453_v52 }
 0x285   : > { %v6463_v16 = vsel %vm6221_vm13, %v6462_v45, %v6458_v0 }
 0x288   : > { %v6122_v63 = vpop.permute.xlu0 %6121 }
 0x289   : > { %v6467_v35 = vrot.slane %v6122_v63, %v8725_v49 }
 0x28b   : > { %v6468_v31 = vsel %vm6228_vm14, %v6467_v35, %v6463_v16 }
 0x28e   : > { %v6074_v23 = vpop.permute.xlu1 %6073 }
 0x28f   : > { %v6388_v46 = vrot.slane %v6074_v23, %v8725_v49  ;;  %v6384_v49 = vsel %vm6221_vm13, %v6383_v53, %v6379_v50 }
 0x291   : > { %v6389_v61 = vsel %vm6228_vm14, %v6388_v46, %v6384_v49 }
 0x293   : > { %v6125_v59 = vpop.permute.xlu0 %6124 }
 0x294   : > { %v6472_v27 = vrot.slane %v6125_v59, %v8969_v10 }
 0x296   : > { %v6473_v24 = vsel %vm6235_vm15, %v6472_v27, %v6468_v31 }
 0x299   : > { %v6077_v20 = vpop.permute.xlu1 %6076 }
 0x29a   : > { %v6393_v34 = vrot.slane %v6077_v20, %v8969_v10 }
 0x29c   : > { %v6394_v56 = vsel %vm6235_vm15, %v6393_v34, %v6389_v61 }
 0x29d   : > { %v6475_v48 = vcombine.low %v6394_v56, %v6473_v24 }
 0x29f   : > { %v6489_v38 = vrot.slane %v6475_v48, %v8972_v32 }
 0x2a1   : > { %v6490_v21 = vcombine.low %v6482_v4, %v6489_v38 }
 0x2a3   : > { %v6497_v37 = vrot.slane %v6490_v21, %v8972_v32 }
 0x2a5   : > { %6503 = vst.msk [vmem:[%s205_s10] sm:$0xf] %vm6501_vm0, %v6497_v37 }
 0x2a6   : > { %6661 = shalt.err (!%p6658_p3)
}
 0x2a7   : > { %s6662_s25 = scalar_lea.hbm %s8912_s2, 64  ;;  %s6666_s30 = scalar_lea.hbm %s8957_s3, 128 }
 0x2a8   : > { %p6663_p4 = scmp.ne.s32.totalorder %s8912_s2, %s6662_s25  ;;  %p6667_p9 = scmp.lt.u32.totalorder %s8912_s2, %s8957_s3 }
 0x2a9   : > { %p6668_p10 = scmp.lt.u32.totalorder %s6666_s30, %s6662_s25  ;;  %p6670_p12 = scmp.lt.u32.totalorder %s6662_s25, %s8912_s2 }
 0x2aa   : > { %p6664_p7 = pnand %p6663_p4, %p6773_p5 }
 0x2ab   : > { %p6669_p11 = por %p6668_p10, %p6667_p9 }
 0x2ac   : > { %p6665_p8 = pneg %p6664_p7 }
 0x2ad   : > { %p6671_p13 = por %p6670_p12, %p6669_p11 }
 0x2af   : > { %p6672_p0 = pnand %p6671_p13, %p6665_p8 }
 0x2b1   : > { %6675 = shalt.err (!%p6672_p0)
}
 0x2b2   : > { %6605 = dma.vmem_to_hbm [thread:$0]  (%p6773_p5), %s8914_s11, 64, %s8912_s2, %s6505_s18  }
 0x2b3 PF: > { %p6611_p1 = scmp.ge.s32.totalorder %s6710_s17, 2  ;;  %s6531_s6 = sand.u32 1, %s6698_s14  }
 0x2b4   : > { %s6532_s7 = scalar_lea.sflag [#allocation4], %s6531_s6 }
 0x2b5   : > { %p6608_p2 = pnand %p6611_p1, %p6777_p6 }
 0x2b7   : > { %6693 = dma.done.wait (!%p6608_p2), %s6532_s7, 64  }
 0x2b8   : > { %6695 = vsyncadd (!%p6608_p2), %s6532_s7, 4294967232  ;;  %p14_p3 = scmp.ge.s32.totalorder %s6761_s19, 4   ;;  %s8974_s14 = smov %s6702_s15 }
 0x2b9   : > { %s8975_s15 = smov %s6706_s16  ;;  %s8976_s16 = smov %s6771_s22 }
 0x2ba   : > { %s8977_s17 = smov %s6761_s19  ;;  %16 = sbr.rel (!%p14_p3) target bundleno = 5 (0x5), region = 70 }
 0x2c1   :  { %6537 = vsyncpa [#allocation4], 1 }
 0x2c2   :  { %6539 = vsyncpa [#allocation4 + $0x1], 1 }

</bundles_post_ra>
